<compile_context>
chip_gen: v7x
topology: tpu7x:2x2x1
jax: 0.10.0
libtpu: 0.0.40
codegen_flags: <defaults>
</compile_context>

<pallas_src>
import jax
import jax.numpy as jnp
from jax.experimental import pallas as pl
from jax.experimental.pallas import tpu as pltpu


HPAD = 32   # Linear(676,20) out-features zero-padded to 32 lanes (was 128)
TB = 8      # batch tile (sublane-aligned)


def discriminator_kernel(conv_ref, x_ref, w1_ref, b1_ref, w2_ref, o_ref):
    """Fused DiscriminatorNet forward for one batch tile, fully VMEM-resident.

    conv_ref : SMEM f32[11] = [cw1_00, cw1_01, cw1_10, cw1_11, cb1,
                               cw2_00, cw2_01, cw2_10, cw2_11, cb2, lin2_bias]
    x_ref    : VMEM f32[TB, 28, 28]
    w1_ref   : VMEM bf16[26, 26, HPAD]  (Linear(676,20) weight, padded+reshaped)
    b1_ref   : VMEM f32[1, HPAD]
    w2_ref   : VMEM f32[1, HPAD]        (Linear(20,1) weight as one lane row)
    o_ref    : VMEM f32[TB, 1]
    """
    slope = jnp.float32(0.1)
    x = x_ref[...]                                              # (TB, 28, 28)
    tb = x.shape[0]
    hpad = w1_ref.shape[-1]

    # ---- conv1 (2x2, stride 1): (TB,28,28) -> (TB,27,27), LeakyReLU(0.1) ----
    h = (conv_ref[0] * x[:, 0:27, 0:27] + conv_ref[1] * x[:, 0:27, 1:28]
         + conv_ref[2] * x[:, 1:28, 0:27] + conv_ref[3] * x[:, 1:28, 1:28]
         + conv_ref[4])
    h = jnp.maximum(h, slope * h)

    # ---- conv2 (2x2, stride 1): (TB,27,27) -> (TB,26,26), LeakyReLU(0.1) ----
    h = (conv_ref[5] * h[:, 0:26, 0:26] + conv_ref[6] * h[:, 0:26, 1:27]
         + conv_ref[7] * h[:, 1:27, 0:26] + conv_ref[8] * h[:, 1:27, 1:27]
         + conv_ref[9])
    h = jnp.maximum(h, slope * h)                               # (TB,26,26) f32

    # ---- linear1: flatten(676) @ W1 + b1, LeakyReLU(0.1) ----
    # 26 independent chunk dots (no in-kernel reshape), bf16 MXU inputs with
    # f32 accumulation split over 4 partial accumulators to break the serial
    # add-after-pop chain. b1 is folded into the first accumulator's init.
    accs = [
        jnp.broadcast_to(b1_ref[...], (tb, hpad)),
        jnp.zeros((tb, hpad), jnp.float32),
        jnp.zeros((tb, hpad), jnp.float32),
        jnp.zeros((tb, hpad), jnp.float32),
    ]
    for i in range(26):  # static unroll
        lhs = h[:, i, :].astype(jnp.bfloat16)                   # (TB, 26) bf16
        accs[i % 4] = accs[i % 4] + jnp.dot(
            lhs, w1_ref[i], preferred_element_type=jnp.float32)
    z = (accs[0] + accs[1]) + (accs[2] + accs[3])               # (TB, HPAD)
    z = jnp.maximum(z, slope * z)

    # ---- linear2 + sigmoid: VPU multiply + XLU lane reduce (no MXU pass),
    #      transcendentals only on the single real output column. ----
    logits = jnp.sum(z * w2_ref[...], axis=-1, keepdims=True) + conv_ref[10]
    probs = pl.reciprocal(1.0 + jnp.exp(-logits), approx=True)  # (TB, 1)
    o_ref[...] = probs.astype(o_ref.dtype)


def discriminator_forward(x, params):
    """x: (B, 1, 28, 28) float32 -> (B, 1, 1) float32 (sigmoid probabilities)."""
    conv_scalars, w1r, b1p, w2row = params
    B = x.shape[0]
    hpad = w1r.shape[-1]
    x2d = x.reshape(B, 28, 28)

    # Pad batch to a multiple of the batch tile and grid over batch tiles.
    bp = ((B + TB - 1) // TB) * TB
    if bp != B:
        x2d = jnp.pad(x2d, ((0, bp - B), (0, 0), (0, 0)))
    grid = (bp // TB,)

    bytes_accessed = int(bp * 28 * 28 * 4 + conv_scalars.size * 4
                         + w1r.size * 2 + b1p.size * 4 + w2row.size * 4
                         + bp * 4)
    flops = int(2 * bp * (27 * 27 * 4 + 26 * 26 * 4 + 676 * hpad + hpad))

    out = pl.pallas_call(
        discriminator_kernel,
        out_shape=jax.ShapeDtypeStruct((bp, 1), jnp.float32),
        grid=grid,
        in_specs=[
            # 11 conv/bias scalars live whole in SMEM (not pipelined).
            pl.BlockSpec(memory_space=pltpu.MemorySpace.SMEM),
            # batch-tiled activations
            pl.BlockSpec((TB, 28, 28), lambda i: (i, 0, 0)),
            # weights: constant index maps -> stay resident across batch tiles
            pl.BlockSpec((26, 26, hpad), lambda i: (0, 0, 0)),
            pl.BlockSpec((1, hpad), lambda i: (0, 0)),
            pl.BlockSpec((1, hpad), lambda i: (0, 0)),
        ],
        out_specs=pl.BlockSpec((TB, 1), lambda i: (i, 0)),
        compiler_params=pltpu.CompilerParams(
            dimension_semantics=("parallel",)),
        cost_estimate=pl.CostEstimate(
            flops=flops, transcendentals=int(bp),
            bytes_accessed=bytes_accessed),
    )(conv_scalars, x2d, w1r, b1p, w2row)

    return out[:B].reshape(B, 1, 1)


def init_params(key, hpad=HPAD):
    """PyTorch-default-style init (U(-1/sqrt(fan_in), 1/sqrt(fan_in))), then:
    * conv weights/biases + the linear2 bias packed into 11 SMEM scalars,
    * W1 zero-padded 20->hpad lanes, reshaped to (26,26,hpad), cast bf16,
    * b1 padded to (1,hpad) f32,
    * W2 shipped as a single (1,hpad) f32 lane row (no MXU weight)."""
    k = jax.random.split(key, 8)

    # Conv2d(1,1,2): fan_in = 1*2*2 = 4 -> bound 0.5
    cbound = 0.5
    cw1 = jax.random.uniform(k[0], (2, 2), jnp.float32, -cbound, cbound)
    cb1 = jax.random.uniform(k[1], (1,), jnp.float32, -cbound, cbound)
    cw2 = jax.random.uniform(k[2], (2, 2), jnp.float32, -cbound, cbound)
    cb2 = jax.random.uniform(k[3], (1,), jnp.float32, -cbound, cbound)

    # Linear(676, 20)
    b1bound = 1.0 / (676.0 ** 0.5)
    w1 = jax.random.uniform(k[4], (676, 20), jnp.float32, -b1bound, b1bound)
    b1 = jax.random.uniform(k[5], (20,), jnp.float32, -b1bound, b1bound)
    # Linear(20, 1)
    b2bound = 1.0 / (20.0 ** 0.5)
    w2 = jax.random.uniform(k[6], (20, 1), jnp.float32, -b2bound, b2bound)
    b2 = jax.random.uniform(k[7], (1,), jnp.float32, -b2bound, b2bound)

    conv_scalars = jnp.concatenate(
        [cw1.reshape(-1), cb1, cw2.reshape(-1), cb2, b2]).astype(jnp.float32)  # (11,)

    w1p = jnp.zeros((676, hpad), jnp.float32).at[:, :20].set(w1)
    w1r = w1p.reshape(26, 26, hpad).astype(jnp.bfloat16)
    b1p = jnp.zeros((1, hpad), jnp.float32).at[0, :20].set(b1)
    w2row = jnp.zeros((1, hpad), jnp.float32).at[0, :20].set(w2[:, 0])
    return conv_scalars, w1r, b1p, w2row


def reference_forward(x, params):
    """Pure-JAX reference mirroring the kernel math (same padded bf16 W1)."""
    conv, w1r, b1p, w2row = params
    B = x.shape[0]
    xi = x.reshape(B, 28, 28)

    def leaky(h):
        return jnp.maximum(h, 0.1 * h)

    h = (conv[0] * xi[:, 0:27, 0:27] + conv[1] * xi[:, 0:27, 1:28]
         + conv[2] * xi[:, 1:28, 0:27] + conv[3] * xi[:, 1:28, 1:28] + conv[4])
    h = leaky(h)
    h = (conv[5] * h[:, 0:26, 0:26] + conv[6] * h[:, 0:26, 1:27]
         + conv[7] * h[:, 1:27, 0:26] + conv[8] * h[:, 1:27, 1:27] + conv[9])
    h = leaky(h)

    hf = h.reshape(B, 676).astype(jnp.bfloat16)
    w1f = w1r.reshape(676, -1)
    z = leaky(jnp.dot(hf, w1f, preferred_element_type=jnp.float32) + b1p)
    logits = jnp.sum(z * w2row, axis=-1, keepdims=True) + conv[10]
    y = 1.0 / (1.0 + jnp.exp(-logits))
    return y.reshape(B, 1, 1)


if __name__ == "__main__":
    key = jax.random.PRNGKey(0)
    k_params, k_x = jax.random.split(key)

    batch = 8  # MNIST-style input: (B, 1, 28, 28) so conv->conv->flatten gives 676
    params = init_params(k_params)
    x = jax.random.normal(k_x, (batch, 1, 28, 28), jnp.float32)

    out = jax.block_until_ready(discriminator_forward(x, params))
    ref = reference_forward(x, params)

    assert out.shape == (batch, 1, 1), out.shape
    assert bool(jnp.all(jnp.isfinite(out))), "non-finite output"
    assert jnp.allclose(out, ref, atol=2e-3, rtol=2e-3), "mismatch vs reference"

    print("KERNEL_OK")
</pallas_src>

<mosaic_0001>
module attributes {stable_mosaic.version = 11 : i64} {
  func.func @discriminator_kernel(%arg0: i32, %arg1: memref<11xf32, #tpu.memory_space<smem>>, %arg2: memref<8x28x28xf32, #tpu.memory_space<vmem>>, %arg3: memref<26x26x32xbf16, #tpu.memory_space<vmem>>, %arg4: memref<1x32xf32, #tpu.memory_space<vmem>>, %arg5: memref<1x32xf32, #tpu.memory_space<vmem>>, %arg6: memref<8x1xf32, #tpu.memory_space<vmem>>) attributes {dimension_semantics = [#tpu.dimension_semantics<parallel>], iteration_bounds = array<i64: 1>, scalar_prefetch = 0 : i64, scratch_operands = 0 : i64, tpu.core_type = #tpu.core_type<tc>, window_params = [{transform_indices = @transform_0, window_bounds = array<i64: 11>}, {transform_indices = @transform_1, window_bounds = array<i64: 8, 28, 28>}, {pipeline_mode = #tpu.pipeline_mode<synchronous>, transform_indices = @transform_2, window_bounds = array<i64: 26, 26, 32>}, {pipeline_mode = #tpu.pipeline_mode<synchronous>, transform_indices = @transform_3, window_bounds = array<i64: 1, 32>}, {pipeline_mode = #tpu.pipeline_mode<synchronous>, transform_indices = @transform_4, window_bounds = array<i64: 1, 32>}, {transform_indices = @transform_5, window_bounds = array<i64: 8, 1>}]} {
    %c0 = arith.constant 0 : index
    %c0_0 = arith.constant 0 : index
    %c0_1 = arith.constant 0 : index
    %0 = vector.load %arg2[%c0, %c0_0, %c0_1] : memref<8x28x28xf32, #tpu.memory_space<vmem>>, vector<8x28x28xf32>
    %c0_2 = arith.constant 0 : index
    %1 = memref.load %arg1[%c0_2] : memref<11xf32, #tpu.memory_space<smem>>
    %2 = vector.extract_strided_slice %0 {offsets = [0, 0, 0], sizes = [8, 27, 27], strides = [1, 1, 1]} : vector<8x28x28xf32> to vector<8x27x27xf32>
    %3 = vector.broadcast %1 : f32 to vector<8x27x27xf32>
    %4 = arith.mulf %3, %2 : vector<8x27x27xf32>
    %c1 = arith.constant 1 : index
    %5 = memref.load %arg1[%c1] : memref<11xf32, #tpu.memory_space<smem>>
    %6 = vector.extract_strided_slice %0 {offsets = [0, 0, 1], sizes = [8, 27, 27], strides = [1, 1, 1]} : vector<8x28x28xf32> to vector<8x27x27xf32>
    %7 = vector.broadcast %5 : f32 to vector<8x27x27xf32>
    %8 = arith.mulf %7, %6 : vector<8x27x27xf32>
    %9 = arith.addf %4, %8 : vector<8x27x27xf32>
    %c2 = arith.constant 2 : index
    %10 = memref.load %arg1[%c2] : memref<11xf32, #tpu.memory_space<smem>>
    %11 = vector.extract_strided_slice %0 {offsets = [0, 1, 0], sizes = [8, 27, 27], strides = [1, 1, 1]} : vector<8x28x28xf32> to vector<8x27x27xf32>
    %12 = vector.broadcast %10 : f32 to vector<8x27x27xf32>
    %13 = arith.mulf %12, %11 : vector<8x27x27xf32>
    %14 = arith.addf %9, %13 : vector<8x27x27xf32>
    %c3 = arith.constant 3 : index
    %15 = memref.load %arg1[%c3] : memref<11xf32, #tpu.memory_space<smem>>
    %16 = vector.extract_strided_slice %0 {offsets = [0, 1, 1], sizes = [8, 27, 27], strides = [1, 1, 1]} : vector<8x28x28xf32> to vector<8x27x27xf32>
    %17 = vector.broadcast %15 : f32 to vector<8x27x27xf32>
    %18 = arith.mulf %17, %16 : vector<8x27x27xf32>
    %19 = arith.addf %14, %18 : vector<8x27x27xf32>
    %c4 = arith.constant 4 : index
    %20 = memref.load %arg1[%c4] : memref<11xf32, #tpu.memory_space<smem>>
    %21 = vector.broadcast %20 : f32 to vector<8x27x27xf32>
    %22 = arith.addf %19, %21 : vector<8x27x27xf32>
    %cst = arith.constant 1.000000e-01 : f32
    %23 = vector.broadcast %cst : f32 to vector<8x27x27xf32>
    %24 = arith.mulf %23, %22 : vector<8x27x27xf32>
    %25 = arith.maximumf %22, %24 : vector<8x27x27xf32>
    %c5 = arith.constant 5 : index
    %26 = memref.load %arg1[%c5] : memref<11xf32, #tpu.memory_space<smem>>
    %27 = vector.extract_strided_slice %25 {offsets = [0, 0, 0], sizes = [8, 26, 26], strides = [1, 1, 1]} : vector<8x27x27xf32> to vector<8x26x26xf32>
    %28 = vector.broadcast %26 : f32 to vector<8x26x26xf32>
    %29 = arith.mulf %28, %27 : vector<8x26x26xf32>
    %c6 = arith.constant 6 : index
    %30 = memref.load %arg1[%c6] : memref<11xf32, #tpu.memory_space<smem>>
    %31 = vector.extract_strided_slice %25 {offsets = [0, 0, 1], sizes = [8, 26, 26], strides = [1, 1, 1]} : vector<8x27x27xf32> to vector<8x26x26xf32>
    %32 = vector.broadcast %30 : f32 to vector<8x26x26xf32>
    %33 = arith.mulf %32, %31 : vector<8x26x26xf32>
    %34 = arith.addf %29, %33 : vector<8x26x26xf32>
    %c7 = arith.constant 7 : index
    %35 = memref.load %arg1[%c7] : memref<11xf32, #tpu.memory_space<smem>>
    %36 = vector.extract_strided_slice %25 {offsets = [0, 1, 0], sizes = [8, 26, 26], strides = [1, 1, 1]} : vector<8x27x27xf32> to vector<8x26x26xf32>
    %37 = vector.broadcast %35 : f32 to vector<8x26x26xf32>
    %38 = arith.mulf %37, %36 : vector<8x26x26xf32>
    %39 = arith.addf %34, %38 : vector<8x26x26xf32>
    %c8 = arith.constant 8 : index
    %40 = memref.load %arg1[%c8] : memref<11xf32, #tpu.memory_space<smem>>
    %41 = vector.extract_strided_slice %25 {offsets = [0, 1, 1], sizes = [8, 26, 26], strides = [1, 1, 1]} : vector<8x27x27xf32> to vector<8x26x26xf32>
    %42 = vector.broadcast %40 : f32 to vector<8x26x26xf32>
    %43 = arith.mulf %42, %41 : vector<8x26x26xf32>
    %44 = arith.addf %39, %43 : vector<8x26x26xf32>
    %c9 = arith.constant 9 : index
    %45 = memref.load %arg1[%c9] : memref<11xf32, #tpu.memory_space<smem>>
    %46 = vector.broadcast %45 : f32 to vector<8x26x26xf32>
    %47 = arith.addf %44, %46 : vector<8x26x26xf32>
    %cst_3 = arith.constant 1.000000e-01 : f32
    %48 = vector.broadcast %cst_3 : f32 to vector<8x26x26xf32>
    %49 = arith.mulf %48, %47 : vector<8x26x26xf32>
    %50 = arith.maximumf %47, %49 : vector<8x26x26xf32>
    %c0_4 = arith.constant 0 : index
    %c0_5 = arith.constant 0 : index
    %51 = vector.load %arg4[%c0_4, %c0_5] : memref<1x32xf32, #tpu.memory_space<vmem>>, vector<1x32xf32>
    %52 = vector.shape_cast %51 : vector<1x32xf32> to vector<1x32xf32>
    %53 = vector.broadcast %52 : vector<1x32xf32> to vector<8x32xf32>
    %cst_6 = arith.constant 0.000000e+00 : f32
    %54 = vector.broadcast %cst_6 : f32 to vector<8x32xf32>
    %cst_7 = arith.constant 0.000000e+00 : f32
    %55 = vector.broadcast %cst_7 : f32 to vector<8x32xf32>
    %cst_8 = arith.constant 0.000000e+00 : f32
    %56 = vector.broadcast %cst_8 : f32 to vector<8x32xf32>
    %57 = vector.extract_strided_slice %50 {offsets = [0, 0, 0], sizes = [8, 1, 26], strides = [1, 1, 1]} : vector<8x26x26xf32> to vector<8x1x26xf32>
    %58 = vector.shape_cast %57 : vector<8x1x26xf32> to vector<8x26xf32>
    %59 = arith.truncf %58 : vector<8x26xf32> to vector<8x26xbf16>
    %c0_9 = arith.constant 0 : index
    %c0_10 = arith.constant 0 : index
    %c0_11 = arith.constant 0 : index
    %60 = vector.load %arg3[%c0_9, %c0_10, %c0_11] : memref<26x26x32xbf16, #tpu.memory_space<vmem>>, vector<1x26x32xbf16>
    %61 = vector.shape_cast %60 : vector<1x26x32xbf16> to vector<26x32xbf16>
    %cst_12 = arith.constant dense<0.000000e+00> : vector<8x32xf32>
    %62 = tpu.matmul %59, %61, %cst_12 {dimension_numbers = #tpu.dot_dimension_numbers<[1], [0], [0], [1], [0, 0, 1, 1], [], []>} : vector<8x26xbf16>, vector<26x32xbf16>, vector<8x32xf32> -> vector<8x32xf32>
    %63 = arith.addf %53, %62 : vector<8x32xf32>
    %64 = vector.extract_strided_slice %50 {offsets = [0, 1, 0], sizes = [8, 1, 26], strides = [1, 1, 1]} : vector<8x26x26xf32> to vector<8x1x26xf32>
    %65 = vector.shape_cast %64 : vector<8x1x26xf32> to vector<8x26xf32>
    %66 = arith.truncf %65 : vector<8x26xf32> to vector<8x26xbf16>
    %c1_13 = arith.constant 1 : index
    %c0_14 = arith.constant 0 : index
    %c0_15 = arith.constant 0 : index
    %67 = vector.load %arg3[%c1_13, %c0_14, %c0_15] : memref<26x26x32xbf16, #tpu.memory_space<vmem>>, vector<1x26x32xbf16>
    %68 = vector.shape_cast %67 : vector<1x26x32xbf16> to vector<26x32xbf16>
    %cst_16 = arith.constant dense<0.000000e+00> : vector<8x32xf32>
    %69 = tpu.matmul %66, %68, %cst_16 {dimension_numbers = #tpu.dot_dimension_numbers<[1], [0], [0], [1], [0, 0, 1, 1], [], []>} : vector<8x26xbf16>, vector<26x32xbf16>, vector<8x32xf32> -> vector<8x32xf32>
    %70 = arith.addf %54, %69 : vector<8x32xf32>
    %71 = vector.extract_strided_slice %50 {offsets = [0, 2, 0], sizes = [8, 1, 26], strides = [1, 1, 1]} : vector<8x26x26xf32> to vector<8x1x26xf32>
    %72 = vector.shape_cast %71 : vector<8x1x26xf32> to vector<8x26xf32>
    %73 = arith.truncf %72 : vector<8x26xf32> to vector<8x26xbf16>
    %c2_17 = arith.constant 2 : index
    %c0_18 = arith.constant 0 : index
    %c0_19 = arith.constant 0 : index
    %74 = vector.load %arg3[%c2_17, %c0_18, %c0_19] : memref<26x26x32xbf16, #tpu.memory_space<vmem>>, vector<1x26x32xbf16>
    %75 = vector.shape_cast %74 : vector<1x26x32xbf16> to vector<26x32xbf16>
    %cst_20 = arith.constant dense<0.000000e+00> : vector<8x32xf32>
    %76 = tpu.matmul %73, %75, %cst_20 {dimension_numbers = #tpu.dot_dimension_numbers<[1], [0], [0], [1], [0, 0, 1, 1], [], []>} : vector<8x26xbf16>, vector<26x32xbf16>, vector<8x32xf32> -> vector<8x32xf32>
    %77 = arith.addf %55, %76 : vector<8x32xf32>
    %78 = vector.extract_strided_slice %50 {offsets = [0, 3, 0], sizes = [8, 1, 26], strides = [1, 1, 1]} : vector<8x26x26xf32> to vector<8x1x26xf32>
    %79 = vector.shape_cast %78 : vector<8x1x26xf32> to vector<8x26xf32>
    %80 = arith.truncf %79 : vector<8x26xf32> to vector<8x26xbf16>
    %c3_21 = arith.constant 3 : index
    %c0_22 = arith.constant 0 : index
    %c0_23 = arith.constant 0 : index
    %81 = vector.load %arg3[%c3_21, %c0_22, %c0_23] : memref<26x26x32xbf16, #tpu.memory_space<vmem>>, vector<1x26x32xbf16>
    %82 = vector.shape_cast %81 : vector<1x26x32xbf16> to vector<26x32xbf16>
    %cst_24 = arith.constant dense<0.000000e+00> : vector<8x32xf32>
    %83 = tpu.matmul %80, %82, %cst_24 {dimension_numbers = #tpu.dot_dimension_numbers<[1], [0], [0], [1], [0, 0, 1, 1], [], []>} : vector<8x26xbf16>, vector<26x32xbf16>, vector<8x32xf32> -> vector<8x32xf32>
    %84 = arith.addf %56, %83 : vector<8x32xf32>
    %85 = vector.extract_strided_slice %50 {offsets = [0, 4, 0], sizes = [8, 1, 26], strides = [1, 1, 1]} : vector<8x26x26xf32> to vector<8x1x26xf32>
    %86 = vector.shape_cast %85 : vector<8x1x26xf32> to vector<8x26xf32>
    %87 = arith.truncf %86 : vector<8x26xf32> to vector<8x26xbf16>
    %c4_25 = arith.constant 4 : index
    %c0_26 = arith.constant 0 : index
    %c0_27 = arith.constant 0 : index
    %88 = vector.load %arg3[%c4_25, %c0_26, %c0_27] : memref<26x26x32xbf16, #tpu.memory_space<vmem>>, vector<1x26x32xbf16>
    %89 = vector.shape_cast %88 : vector<1x26x32xbf16> to vector<26x32xbf16>
    %cst_28 = arith.constant dense<0.000000e+00> : vector<8x32xf32>
    %90 = tpu.matmul %87, %89, %cst_28 {dimension_numbers = #tpu.dot_dimension_numbers<[1], [0], [0], [1], [0, 0, 1, 1], [], []>} : vector<8x26xbf16>, vector<26x32xbf16>, vector<8x32xf32> -> vector<8x32xf32>
    %91 = arith.addf %63, %90 : vector<8x32xf32>
    %92 = vector.extract_strided_slice %50 {offsets = [0, 5, 0], sizes = [8, 1, 26], strides = [1, 1, 1]} : vector<8x26x26xf32> to vector<8x1x26xf32>
    %93 = vector.shape_cast %92 : vector<8x1x26xf32> to vector<8x26xf32>
    %94 = arith.truncf %93 : vector<8x26xf32> to vector<8x26xbf16>
    %c5_29 = arith.constant 5 : index
    %c0_30 = arith.constant 0 : index
    %c0_31 = arith.constant 0 : index
    %95 = vector.load %arg3[%c5_29, %c0_30, %c0_31] : memref<26x26x32xbf16, #tpu.memory_space<vmem>>, vector<1x26x32xbf16>
    %96 = vector.shape_cast %95 : vector<1x26x32xbf16> to vector<26x32xbf16>
    %cst_32 = arith.constant dense<0.000000e+00> : vector<8x32xf32>
    %97 = tpu.matmul %94, %96, %cst_32 {dimension_numbers = #tpu.dot_dimension_numbers<[1], [0], [0], [1], [0, 0, 1, 1], [], []>} : vector<8x26xbf16>, vector<26x32xbf16>, vector<8x32xf32> -> vector<8x32xf32>
    %98 = arith.addf %70, %97 : vector<8x32xf32>
    %99 = vector.extract_strided_slice %50 {offsets = [0, 6, 0], sizes = [8, 1, 26], strides = [1, 1, 1]} : vector<8x26x26xf32> to vector<8x1x26xf32>
    %100 = vector.shape_cast %99 : vector<8x1x26xf32> to vector<8x26xf32>
    %101 = arith.truncf %100 : vector<8x26xf32> to vector<8x26xbf16>
    %c6_33 = arith.constant 6 : index
    %c0_34 = arith.constant 0 : index
    %c0_35 = arith.constant 0 : index
    %102 = vector.load %arg3[%c6_33, %c0_34, %c0_35] : memref<26x26x32xbf16, #tpu.memory_space<vmem>>, vector<1x26x32xbf16>
    %103 = vector.shape_cast %102 : vector<1x26x32xbf16> to vector<26x32xbf16>
    %cst_36 = arith.constant dense<0.000000e+00> : vector<8x32xf32>
    %104 = tpu.matmul %101, %103, %cst_36 {dimension_numbers = #tpu.dot_dimension_numbers<[1], [0], [0], [1], [0, 0, 1, 1], [], []>} : vector<8x26xbf16>, vector<26x32xbf16>, vector<8x32xf32> -> vector<8x32xf32>
    %105 = arith.addf %77, %104 : vector<8x32xf32>
    %106 = vector.extract_strided_slice %50 {offsets = [0, 7, 0], sizes = [8, 1, 26], strides = [1, 1, 1]} : vector<8x26x26xf32> to vector<8x1x26xf32>
    %107 = vector.shape_cast %106 : vector<8x1x26xf32> to vector<8x26xf32>
    %108 = arith.truncf %107 : vector<8x26xf32> to vector<8x26xbf16>
    %c7_37 = arith.constant 7 : index
    %c0_38 = arith.constant 0 : index
    %c0_39 = arith.constant 0 : index
    %109 = vector.load %arg3[%c7_37, %c0_38, %c0_39] : memref<26x26x32xbf16, #tpu.memory_space<vmem>>, vector<1x26x32xbf16>
    %110 = vector.shape_cast %109 : vector<1x26x32xbf16> to vector<26x32xbf16>
    %cst_40 = arith.constant dense<0.000000e+00> : vector<8x32xf32>
    %111 = tpu.matmul %108, %110, %cst_40 {dimension_numbers = #tpu.dot_dimension_numbers<[1], [0], [0], [1], [0, 0, 1, 1], [], []>} : vector<8x26xbf16>, vector<26x32xbf16>, vector<8x32xf32> -> vector<8x32xf32>
    %112 = arith.addf %84, %111 : vector<8x32xf32>
    %113 = vector.extract_strided_slice %50 {offsets = [0, 8, 0], sizes = [8, 1, 26], strides = [1, 1, 1]} : vector<8x26x26xf32> to vector<8x1x26xf32>
    %114 = vector.shape_cast %113 : vector<8x1x26xf32> to vector<8x26xf32>
    %115 = arith.truncf %114 : vector<8x26xf32> to vector<8x26xbf16>
    %c8_41 = arith.constant 8 : index
    %c0_42 = arith.constant 0 : index
    %c0_43 = arith.constant 0 : index
    %116 = vector.load %arg3[%c8_41, %c0_42, %c0_43] : memref<26x26x32xbf16, #tpu.memory_space<vmem>>, vector<1x26x32xbf16>
    %117 = vector.shape_cast %116 : vector<1x26x32xbf16> to vector<26x32xbf16>
    %cst_44 = arith.constant dense<0.000000e+00> : vector<8x32xf32>
    %118 = tpu.matmul %115, %117, %cst_44 {dimension_numbers = #tpu.dot_dimension_numbers<[1], [0], [0], [1], [0, 0, 1, 1], [], []>} : vector<8x26xbf16>, vector<26x32xbf16>, vector<8x32xf32> -> vector<8x32xf32>
    %119 = arith.addf %91, %118 : vector<8x32xf32>
    %120 = vector.extract_strided_slice %50 {offsets = [0, 9, 0], sizes = [8, 1, 26], strides = [1, 1, 1]} : vector<8x26x26xf32> to vector<8x1x26xf32>
    %121 = vector.shape_cast %120 : vector<8x1x26xf32> to vector<8x26xf32>
    %122 = arith.truncf %121 : vector<8x26xf32> to vector<8x26xbf16>
    %c9_45 = arith.constant 9 : index
    %c0_46 = arith.constant 0 : index
    %c0_47 = arith.constant 0 : index
    %123 = vector.load %arg3[%c9_45, %c0_46, %c0_47] : memref<26x26x32xbf16, #tpu.memory_space<vmem>>, vector<1x26x32xbf16>
    %124 = vector.shape_cast %123 : vector<1x26x32xbf16> to vector<26x32xbf16>
    %cst_48 = arith.constant dense<0.000000e+00> : vector<8x32xf32>
    %125 = tpu.matmul %122, %124, %cst_48 {dimension_numbers = #tpu.dot_dimension_numbers<[1], [0], [0], [1], [0, 0, 1, 1], [], []>} : vector<8x26xbf16>, vector<26x32xbf16>, vector<8x32xf32> -> vector<8x32xf32>
    %126 = arith.addf %98, %125 : vector<8x32xf32>
    %127 = vector.extract_strided_slice %50 {offsets = [0, 10, 0], sizes = [8, 1, 26], strides = [1, 1, 1]} : vector<8x26x26xf32> to vector<8x1x26xf32>
    %128 = vector.shape_cast %127 : vector<8x1x26xf32> to vector<8x26xf32>
    %129 = arith.truncf %128 : vector<8x26xf32> to vector<8x26xbf16>
    %c10 = arith.constant 10 : index
    %c0_49 = arith.constant 0 : index
    %c0_50 = arith.constant 0 : index
    %130 = vector.load %arg3[%c10, %c0_49, %c0_50] : memref<26x26x32xbf16, #tpu.memory_space<vmem>>, vector<1x26x32xbf16>
    %131 = vector.shape_cast %130 : vector<1x26x32xbf16> to vector<26x32xbf16>
    %cst_51 = arith.constant dense<0.000000e+00> : vector<8x32xf32>
    %132 = tpu.matmul %129, %131, %cst_51 {dimension_numbers = #tpu.dot_dimension_numbers<[1], [0], [0], [1], [0, 0, 1, 1], [], []>} : vector<8x26xbf16>, vector<26x32xbf16>, vector<8x32xf32> -> vector<8x32xf32>
    %133 = arith.addf %105, %132 : vector<8x32xf32>
    %134 = vector.extract_strided_slice %50 {offsets = [0, 11, 0], sizes = [8, 1, 26], strides = [1, 1, 1]} : vector<8x26x26xf32> to vector<8x1x26xf32>
    %135 = vector.shape_cast %134 : vector<8x1x26xf32> to vector<8x26xf32>
    %136 = arith.truncf %135 : vector<8x26xf32> to vector<8x26xbf16>
    %c11 = arith.constant 11 : index
    %c0_52 = arith.constant 0 : index
    %c0_53 = arith.constant 0 : index
    %137 = vector.load %arg3[%c11, %c0_52, %c0_53] : memref<26x26x32xbf16, #tpu.memory_space<vmem>>, vector<1x26x32xbf16>
    %138 = vector.shape_cast %137 : vector<1x26x32xbf16> to vector<26x32xbf16>
    %cst_54 = arith.constant dense<0.000000e+00> : vector<8x32xf32>
    %139 = tpu.matmul %136, %138, %cst_54 {dimension_numbers = #tpu.dot_dimension_numbers<[1], [0], [0], [1], [0, 0, 1, 1], [], []>} : vector<8x26xbf16>, vector<26x32xbf16>, vector<8x32xf32> -> vector<8x32xf32>
    %140 = arith.addf %112, %139 : vector<8x32xf32>
    %141 = vector.extract_strided_slice %50 {offsets = [0, 12, 0], sizes = [8, 1, 26], strides = [1, 1, 1]} : vector<8x26x26xf32> to vector<8x1x26xf32>
    %142 = vector.shape_cast %141 : vector<8x1x26xf32> to vector<8x26xf32>
    %143 = arith.truncf %142 : vector<8x26xf32> to vector<8x26xbf16>
    %c12 = arith.constant 12 : index
    %c0_55 = arith.constant 0 : index
    %c0_56 = arith.constant 0 : index
    %144 = vector.load %arg3[%c12, %c0_55, %c0_56] : memref<26x26x32xbf16, #tpu.memory_space<vmem>>, vector<1x26x32xbf16>
    %145 = vector.shape_cast %144 : vector<1x26x32xbf16> to vector<26x32xbf16>
    %cst_57 = arith.constant dense<0.000000e+00> : vector<8x32xf32>
    %146 = tpu.matmul %143, %145, %cst_57 {dimension_numbers = #tpu.dot_dimension_numbers<[1], [0], [0], [1], [0, 0, 1, 1], [], []>} : vector<8x26xbf16>, vector<26x32xbf16>, vector<8x32xf32> -> vector<8x32xf32>
    %147 = arith.addf %119, %146 : vector<8x32xf32>
    %148 = vector.extract_strided_slice %50 {offsets = [0, 13, 0], sizes = [8, 1, 26], strides = [1, 1, 1]} : vector<8x26x26xf32> to vector<8x1x26xf32>
    %149 = vector.shape_cast %148 : vector<8x1x26xf32> to vector<8x26xf32>
    %150 = arith.truncf %149 : vector<8x26xf32> to vector<8x26xbf16>
    %c13 = arith.constant 13 : index
    %c0_58 = arith.constant 0 : index
    %c0_59 = arith.constant 0 : index
    %151 = vector.load %arg3[%c13, %c0_58, %c0_59] : memref<26x26x32xbf16, #tpu.memory_space<vmem>>, vector<1x26x32xbf16>
    %152 = vector.shape_cast %151 : vector<1x26x32xbf16> to vector<26x32xbf16>
    %cst_60 = arith.constant dense<0.000000e+00> : vector<8x32xf32>
    %153 = tpu.matmul %150, %152, %cst_60 {dimension_numbers = #tpu.dot_dimension_numbers<[1], [0], [0], [1], [0, 0, 1, 1], [], []>} : vector<8x26xbf16>, vector<26x32xbf16>, vector<8x32xf32> -> vector<8x32xf32>
    %154 = arith.addf %126, %153 : vector<8x32xf32>
    %155 = vector.extract_strided_slice %50 {offsets = [0, 14, 0], sizes = [8, 1, 26], strides = [1, 1, 1]} : vector<8x26x26xf32> to vector<8x1x26xf32>
    %156 = vector.shape_cast %155 : vector<8x1x26xf32> to vector<8x26xf32>
    %157 = arith.truncf %156 : vector<8x26xf32> to vector<8x26xbf16>
    %c14 = arith.constant 14 : index
    %c0_61 = arith.constant 0 : index
    %c0_62 = arith.constant 0 : index
    %158 = vector.load %arg3[%c14, %c0_61, %c0_62] : memref<26x26x32xbf16, #tpu.memory_space<vmem>>, vector<1x26x32xbf16>
    %159 = vector.shape_cast %158 : vector<1x26x32xbf16> to vector<26x32xbf16>
    %cst_63 = arith.constant dense<0.000000e+00> : vector<8x32xf32>
    %160 = tpu.matmul %157, %159, %cst_63 {dimension_numbers = #tpu.dot_dimension_numbers<[1], [0], [0], [1], [0, 0, 1, 1], [], []>} : vector<8x26xbf16>, vector<26x32xbf16>, vector<8x32xf32> -> vector<8x32xf32>
    %161 = arith.addf %133, %160 : vector<8x32xf32>
    %162 = vector.extract_strided_slice %50 {offsets = [0, 15, 0], sizes = [8, 1, 26], strides = [1, 1, 1]} : vector<8x26x26xf32> to vector<8x1x26xf32>
    %163 = vector.shape_cast %162 : vector<8x1x26xf32> to vector<8x26xf32>
    %164 = arith.truncf %163 : vector<8x26xf32> to vector<8x26xbf16>
    %c15 = arith.constant 15 : index
    %c0_64 = arith.constant 0 : index
    %c0_65 = arith.constant 0 : index
    %165 = vector.load %arg3[%c15, %c0_64, %c0_65] : memref<26x26x32xbf16, #tpu.memory_space<vmem>>, vector<1x26x32xbf16>
    %166 = vector.shape_cast %165 : vector<1x26x32xbf16> to vector<26x32xbf16>
    %cst_66 = arith.constant dense<0.000000e+00> : vector<8x32xf32>
    %167 = tpu.matmul %164, %166, %cst_66 {dimension_numbers = #tpu.dot_dimension_numbers<[1], [0], [0], [1], [0, 0, 1, 1], [], []>} : vector<8x26xbf16>, vector<26x32xbf16>, vector<8x32xf32> -> vector<8x32xf32>
    %168 = arith.addf %140, %167 : vector<8x32xf32>
    %169 = vector.extract_strided_slice %50 {offsets = [0, 16, 0], sizes = [8, 1, 26], strides = [1, 1, 1]} : vector<8x26x26xf32> to vector<8x1x26xf32>
    %170 = vector.shape_cast %169 : vector<8x1x26xf32> to vector<8x26xf32>
    %171 = arith.truncf %170 : vector<8x26xf32> to vector<8x26xbf16>
    %c16 = arith.constant 16 : index
    %c0_67 = arith.constant 0 : index
    %c0_68 = arith.constant 0 : index
    %172 = vector.load %arg3[%c16, %c0_67, %c0_68] : memref<26x26x32xbf16, #tpu.memory_space<vmem>>, vector<1x26x32xbf16>
    %173 = vector.shape_cast %172 : vector<1x26x32xbf16> to vector<26x32xbf16>
    %cst_69 = arith.constant dense<0.000000e+00> : vector<8x32xf32>
    %174 = tpu.matmul %171, %173, %cst_69 {dimension_numbers = #tpu.dot_dimension_numbers<[1], [0], [0], [1], [0, 0, 1, 1], [], []>} : vector<8x26xbf16>, vector<26x32xbf16>, vector<8x32xf32> -> vector<8x32xf32>
    %175 = arith.addf %147, %174 : vector<8x32xf32>
    %176 = vector.extract_strided_slice %50 {offsets = [0, 17, 0], sizes = [8, 1, 26], strides = [1, 1, 1]} : vector<8x26x26xf32> to vector<8x1x26xf32>
    %177 = vector.shape_cast %176 : vector<8x1x26xf32> to vector<8x26xf32>
    %178 = arith.truncf %177 : vector<8x26xf32> to vector<8x26xbf16>
    %c17 = arith.constant 17 : index
    %c0_70 = arith.constant 0 : index
    %c0_71 = arith.constant 0 : index
    %179 = vector.load %arg3[%c17, %c0_70, %c0_71] : memref<26x26x32xbf16, #tpu.memory_space<vmem>>, vector<1x26x32xbf16>
    %180 = vector.shape_cast %179 : vector<1x26x32xbf16> to vector<26x32xbf16>
    %cst_72 = arith.constant dense<0.000000e+00> : vector<8x32xf32>
    %181 = tpu.matmul %178, %180, %cst_72 {dimension_numbers = #tpu.dot_dimension_numbers<[1], [0], [0], [1], [0, 0, 1, 1], [], []>} : vector<8x26xbf16>, vector<26x32xbf16>, vector<8x32xf32> -> vector<8x32xf32>
    %182 = arith.addf %154, %181 : vector<8x32xf32>
    %183 = vector.extract_strided_slice %50 {offsets = [0, 18, 0], sizes = [8, 1, 26], strides = [1, 1, 1]} : vector<8x26x26xf32> to vector<8x1x26xf32>
    %184 = vector.shape_cast %183 : vector<8x1x26xf32> to vector<8x26xf32>
    %185 = arith.truncf %184 : vector<8x26xf32> to vector<8x26xbf16>
    %c18 = arith.constant 18 : index
    %c0_73 = arith.constant 0 : index
    %c0_74 = arith.constant 0 : index
    %186 = vector.load %arg3[%c18, %c0_73, %c0_74] : memref<26x26x32xbf16, #tpu.memory_space<vmem>>, vector<1x26x32xbf16>
    %187 = vector.shape_cast %186 : vector<1x26x32xbf16> to vector<26x32xbf16>
    %cst_75 = arith.constant dense<0.000000e+00> : vector<8x32xf32>
    %188 = tpu.matmul %185, %187, %cst_75 {dimension_numbers = #tpu.dot_dimension_numbers<[1], [0], [0], [1], [0, 0, 1, 1], [], []>} : vector<8x26xbf16>, vector<26x32xbf16>, vector<8x32xf32> -> vector<8x32xf32>
    %189 = arith.addf %161, %188 : vector<8x32xf32>
    %190 = vector.extract_strided_slice %50 {offsets = [0, 19, 0], sizes = [8, 1, 26], strides = [1, 1, 1]} : vector<8x26x26xf32> to vector<8x1x26xf32>
    %191 = vector.shape_cast %190 : vector<8x1x26xf32> to vector<8x26xf32>
    %192 = arith.truncf %191 : vector<8x26xf32> to vector<8x26xbf16>
    %c19 = arith.constant 19 : index
    %c0_76 = arith.constant 0 : index
    %c0_77 = arith.constant 0 : index
    %193 = vector.load %arg3[%c19, %c0_76, %c0_77] : memref<26x26x32xbf16, #tpu.memory_space<vmem>>, vector<1x26x32xbf16>
    %194 = vector.shape_cast %193 : vector<1x26x32xbf16> to vector<26x32xbf16>
    %cst_78 = arith.constant dense<0.000000e+00> : vector<8x32xf32>
    %195 = tpu.matmul %192, %194, %cst_78 {dimension_numbers = #tpu.dot_dimension_numbers<[1], [0], [0], [1], [0, 0, 1, 1], [], []>} : vector<8x26xbf16>, vector<26x32xbf16>, vector<8x32xf32> -> vector<8x32xf32>
    %196 = arith.addf %168, %195 : vector<8x32xf32>
    %197 = vector.extract_strided_slice %50 {offsets = [0, 20, 0], sizes = [8, 1, 26], strides = [1, 1, 1]} : vector<8x26x26xf32> to vector<8x1x26xf32>
    %198 = vector.shape_cast %197 : vector<8x1x26xf32> to vector<8x26xf32>
    %199 = arith.truncf %198 : vector<8x26xf32> to vector<8x26xbf16>
    %c20 = arith.constant 20 : index
    %c0_79 = arith.constant 0 : index
    %c0_80 = arith.constant 0 : index
    %200 = vector.load %arg3[%c20, %c0_79, %c0_80] : memref<26x26x32xbf16, #tpu.memory_space<vmem>>, vector<1x26x32xbf16>
    %201 = vector.shape_cast %200 : vector<1x26x32xbf16> to vector<26x32xbf16>
    %cst_81 = arith.constant dense<0.000000e+00> : vector<8x32xf32>
    %202 = tpu.matmul %199, %201, %cst_81 {dimension_numbers = #tpu.dot_dimension_numbers<[1], [0], [0], [1], [0, 0, 1, 1], [], []>} : vector<8x26xbf16>, vector<26x32xbf16>, vector<8x32xf32> -> vector<8x32xf32>
    %203 = arith.addf %175, %202 : vector<8x32xf32>
    %204 = vector.extract_strided_slice %50 {offsets = [0, 21, 0], sizes = [8, 1, 26], strides = [1, 1, 1]} : vector<8x26x26xf32> to vector<8x1x26xf32>
    %205 = vector.shape_cast %204 : vector<8x1x26xf32> to vector<8x26xf32>
    %206 = arith.truncf %205 : vector<8x26xf32> to vector<8x26xbf16>
    %c21 = arith.constant 21 : index
    %c0_82 = arith.constant 0 : index
    %c0_83 = arith.constant 0 : index
    %207 = vector.load %arg3[%c21, %c0_82, %c0_83] : memref<26x26x32xbf16, #tpu.memory_space<vmem>>, vector<1x26x32xbf16>
    %208 = vector.shape_cast %207 : vector<1x26x32xbf16> to vector<26x32xbf16>
    %cst_84 = arith.constant dense<0.000000e+00> : vector<8x32xf32>
    %209 = tpu.matmul %206, %208, %cst_84 {dimension_numbers = #tpu.dot_dimension_numbers<[1], [0], [0], [1], [0, 0, 1, 1], [], []>} : vector<8x26xbf16>, vector<26x32xbf16>, vector<8x32xf32> -> vector<8x32xf32>
    %210 = arith.addf %182, %209 : vector<8x32xf32>
    %211 = vector.extract_strided_slice %50 {offsets = [0, 22, 0], sizes = [8, 1, 26], strides = [1, 1, 1]} : vector<8x26x26xf32> to vector<8x1x26xf32>
    %212 = vector.shape_cast %211 : vector<8x1x26xf32> to vector<8x26xf32>
    %213 = arith.truncf %212 : vector<8x26xf32> to vector<8x26xbf16>
    %c22 = arith.constant 22 : index
    %c0_85 = arith.constant 0 : index
    %c0_86 = arith.constant 0 : index
    %214 = vector.load %arg3[%c22, %c0_85, %c0_86] : memref<26x26x32xbf16, #tpu.memory_space<vmem>>, vector<1x26x32xbf16>
    %215 = vector.shape_cast %214 : vector<1x26x32xbf16> to vector<26x32xbf16>
    %cst_87 = arith.constant dense<0.000000e+00> : vector<8x32xf32>
    %216 = tpu.matmul %213, %215, %cst_87 {dimension_numbers = #tpu.dot_dimension_numbers<[1], [0], [0], [1], [0, 0, 1, 1], [], []>} : vector<8x26xbf16>, vector<26x32xbf16>, vector<8x32xf32> -> vector<8x32xf32>
    %217 = arith.addf %189, %216 : vector<8x32xf32>
    %218 = vector.extract_strided_slice %50 {offsets = [0, 23, 0], sizes = [8, 1, 26], strides = [1, 1, 1]} : vector<8x26x26xf32> to vector<8x1x26xf32>
    %219 = vector.shape_cast %218 : vector<8x1x26xf32> to vector<8x26xf32>
    %220 = arith.truncf %219 : vector<8x26xf32> to vector<8x26xbf16>
    %c23 = arith.constant 23 : index
    %c0_88 = arith.constant 0 : index
    %c0_89 = arith.constant 0 : index
    %221 = vector.load %arg3[%c23, %c0_88, %c0_89] : memref<26x26x32xbf16, #tpu.memory_space<vmem>>, vector<1x26x32xbf16>
    %222 = vector.shape_cast %221 : vector<1x26x32xbf16> to vector<26x32xbf16>
    %cst_90 = arith.constant dense<0.000000e+00> : vector<8x32xf32>
    %223 = tpu.matmul %220, %222, %cst_90 {dimension_numbers = #tpu.dot_dimension_numbers<[1], [0], [0], [1], [0, 0, 1, 1], [], []>} : vector<8x26xbf16>, vector<26x32xbf16>, vector<8x32xf32> -> vector<8x32xf32>
    %224 = arith.addf %196, %223 : vector<8x32xf32>
    %225 = vector.extract_strided_slice %50 {offsets = [0, 24, 0], sizes = [8, 1, 26], strides = [1, 1, 1]} : vector<8x26x26xf32> to vector<8x1x26xf32>
    %226 = vector.shape_cast %225 : vector<8x1x26xf32> to vector<8x26xf32>
    %227 = arith.truncf %226 : vector<8x26xf32> to vector<8x26xbf16>
    %c24 = arith.constant 24 : index
    %c0_91 = arith.constant 0 : index
    %c0_92 = arith.constant 0 : index
    %228 = vector.load %arg3[%c24, %c0_91, %c0_92] : memref<26x26x32xbf16, #tpu.memory_space<vmem>>, vector<1x26x32xbf16>
    %229 = vector.shape_cast %228 : vector<1x26x32xbf16> to vector<26x32xbf16>
    %cst_93 = arith.constant dense<0.000000e+00> : vector<8x32xf32>
    %230 = tpu.matmul %227, %229, %cst_93 {dimension_numbers = #tpu.dot_dimension_numbers<[1], [0], [0], [1], [0, 0, 1, 1], [], []>} : vector<8x26xbf16>, vector<26x32xbf16>, vector<8x32xf32> -> vector<8x32xf32>
    %231 = arith.addf %203, %230 : vector<8x32xf32>
    %232 = vector.extract_strided_slice %50 {offsets = [0, 25, 0], sizes = [8, 1, 26], strides = [1, 1, 1]} : vector<8x26x26xf32> to vector<8x1x26xf32>
    %233 = vector.shape_cast %232 : vector<8x1x26xf32> to vector<8x26xf32>
    %234 = arith.truncf %233 : vector<8x26xf32> to vector<8x26xbf16>
    %c25 = arith.constant 25 : index
    %c0_94 = arith.constant 0 : index
    %c0_95 = arith.constant 0 : index
    %235 = vector.load %arg3[%c25, %c0_94, %c0_95] : memref<26x26x32xbf16, #tpu.memory_space<vmem>>, vector<1x26x32xbf16>
    %236 = vector.shape_cast %235 : vector<1x26x32xbf16> to vector<26x32xbf16>
    %cst_96 = arith.constant dense<0.000000e+00> : vector<8x32xf32>
    %237 = tpu.matmul %234, %236, %cst_96 {dimension_numbers = #tpu.dot_dimension_numbers<[1], [0], [0], [1], [0, 0, 1, 1], [], []>} : vector<8x26xbf16>, vector<26x32xbf16>, vector<8x32xf32> -> vector<8x32xf32>
    %238 = arith.addf %210, %237 : vector<8x32xf32>
    %239 = arith.addf %231, %238 : vector<8x32xf32>
    %240 = arith.addf %217, %224 : vector<8x32xf32>
    %241 = arith.addf %239, %240 : vector<8x32xf32>
    %cst_97 = arith.constant 1.000000e-01 : f32
    %242 = vector.broadcast %cst_97 : f32 to vector<8x32xf32>
    %243 = arith.mulf %242, %241 : vector<8x32xf32>
    %244 = arith.maximumf %241, %243 : vector<8x32xf32>
    %c0_98 = arith.constant 0 : index
    %c0_99 = arith.constant 0 : index
    %245 = vector.load %arg5[%c0_98, %c0_99] : memref<1x32xf32, #tpu.memory_space<vmem>>, vector<1x32xf32>
    %246 = vector.broadcast %245 : vector<1x32xf32> to vector<8x32xf32>
    %247 = arith.mulf %244, %246 : vector<8x32xf32>
    %cst_100 = arith.constant dense<0.000000e+00> : vector<8xf32>
    %248 = vector.multi_reduction <add>, %247, %cst_100 [1] : vector<8x32xf32> to vector<8xf32>
    %249 = vector.shape_cast %248 : vector<8xf32> to vector<8x1xf32>
    %c10_101 = arith.constant 10 : index
    %250 = memref.load %arg1[%c10_101] : memref<11xf32, #tpu.memory_space<smem>>
    %251 = vector.broadcast %250 : f32 to vector<8x1xf32>
    %252 = arith.addf %249, %251 : vector<8x1xf32>
    %cst_102 = arith.constant 0.000000e+00 : f32
    %253 = vector.broadcast %cst_102 : f32 to vector<8x1xf32>
    %254 = arith.subf %253, %252 : vector<8x1xf32>
    %255 = math.exp %254 : vector<8x1xf32>
    %cst_103 = arith.constant 1.000000e+00 : f32
    %256 = vector.broadcast %cst_103 : f32 to vector<8x1xf32>
    %257 = arith.addf %256, %255 : vector<8x1xf32>
    %258 = tpu.reciprocal %257 {approx = true} : vector<8x1xf32> -> vector<8x1xf32>
    %c0_104 = arith.constant 0 : index
    %c0_105 = arith.constant 0 : index
    %259 = vector.load %arg6[%c0_104, %c0_105] : memref<8x1xf32, #tpu.memory_space<vmem>>, vector<8x1xf32>
    tpu.vector_store %arg6[%c0_104, %c0_105], %258 {strides = array<i32>} : memref<8x1xf32, #tpu.memory_space<vmem>>, vector<8x1xf32>,
    return
  }
  func.func @transform_0(%arg0: i32) -> i32 {
    %c0_i32 = arith.constant 0 : i32
    %c0_i32_0 = arith.constant 0 : i32
    return %c0_i32 : i32
  }
  func.func @transform_1(%arg0: i32) -> (i32, i32, i32) {
    %c0_i32 = arith.constant 0 : i32
    %c0_i32_0 = arith.constant 0 : i32
    %c0_i32_1 = arith.constant 0 : i32
    return %arg0, %c0_i32, %c0_i32_0 : i32, i32, i32
  }
  func.func @transform_2(%arg0: i32) -> (i32, i32, i32) {
    %c0_i32 = arith.constant 0 : i32
    %c0_i32_0 = arith.constant 0 : i32
    %c0_i32_1 = arith.constant 0 : i32
    %c0_i32_2 = arith.constant 0 : i32
    return %c0_i32, %c0_i32_0, %c0_i32_1 : i32, i32, i32
  }
  func.func @transform_3(%arg0: i32) -> (i32, i32) {
    %c0_i32 = arith.constant 0 : i32
    %c0_i32_0 = arith.constant 0 : i32
    %c0_i32_1 = arith.constant 0 : i32
    return %c0_i32, %c0_i32_0 : i32, i32
  }
  func.func @transform_4(%arg0: i32) -> (i32, i32) {
    %c0_i32 = arith.constant 0 : i32
    %c0_i32_0 = arith.constant 0 : i32
    %c0_i32_1 = arith.constant 0 : i32
    return %c0_i32, %c0_i32_0 : i32, i32
  }
  func.func @transform_5(%arg0: i32) -> (i32, i32) {
    %c0_i32 = arith.constant 0 : i32
    %c0_i32_0 = arith.constant 0 : i32
    return %arg0, %c0_i32 : i32, i32
  }
}

</mosaic_0001>

<bundles_post_ra>
// kernel: tpu_custom_call.1
= control target key start
LH: loop header
LB: loop body
LE: loop exit
PB: predicated region body
PF: predicated region fallthrough
CT: control target
= control target key end

     0   :  { %10 = vsyncpa [#allocation3], 0  ;;  %s7169_s0 = inlined_call_operand.vmem [shape: f32[11], index: 0, kind: input, shape index: {}]   ;;  %s7170_s1 = inlined_call_operand.vmem [shape: f32[8,28,28], index: 1, kind: input, shape index: {}]   ;;  %s7171_s2 = inlined_call_operand.vmem [shape: bf16[26,26,32], index: 2, kind: input, shape index: {}]   ;;  %s7172_s3 = inlined_call_operand.vmem [shape: f32[1,32], index: 3, kind: input, shape index: {}]   ;;  %s7173_s4 = inlined_call_operand.vmem [shape: f32[1,32], index: 4, kind: input, shape index: {}]   ;;  %s7174_s5 = inlined_call_operand.vmem [shape: f32[8,1], index: 5, kind: output, shape index: {}]  }
   0x1   :  { %s17_s20 = sshll.u32 %s7169_s0, 4  ;;  %s18_s20 = int_to_ptr.vmem [resolvable:$true] %s17_s20 }
   0x2   :  { %s4395_s21 = scalar_lea.vmem %s18_s20, 16  ;;  %p4400_p1 = scmp.lt.s32.totalorder %s18_s20, %s18_s20 }
   0x3   :  { %p4396_p0 = scmp.ne.s32.totalorder %s18_s20, %s4395_s21  ;;  %p4401_p2 = scmp.lt.s32.totalorder %s4395_s21, %s4395_s21 }
   0x5   :  { %p4402_p3 = por %p4401_p2, %p4400_p1 }
   0x7   :  { %p4403_p4 = pnand %p4402_p3, %p4396_p0 }
   0x9   :  { %4406 = shalt.err (!%p4403_p4)
}
   0xa   :  { %s4409_s22 = smov [#allocation2]  }
   0xb   :  { %20 = dma.vmem_to_smem %s18_s20, 16, %s4409_s22, [#allocation3]  }
   0xc   :  { %4407 = dma.done.wait [#allocation3], 16  }
   0xd   :  { %4408 = vsyncadd [#allocation3], 4294967280 }
   0xe   :  { %32 = sfence }
   0xf   :  { %s3756_s23 = sld [smem:[#allocation2 + $0x1]]  ;;  %v4449_v0 = vld [vmem:[%s7170_s1 + $0x40] sm:$0xff]  ;;  %v4461_v3 = vld [vmem:[%s7170_s1 + $0x28] sm:$0xff]  ;;  %s4410_s6 = smov 127   ;;  %v4502_v14 = vld [vmem:[%s7170_s1 + $0x10] sm:$0xff]  ;;  %vm360_vm0 = vcmask 1046528  }
  0x10   :  { %v4454_v1 = vld [vmem:[%s7170_s1 + $0x20] sm:$0xff]  ;;  %v4481_v9 = vld [vmem:[%s7170_s1 + $0x8] sm:$0xff]  ;;  %7264 = vst [vmem:[#allocation5_spill] sm:$0xff] %v4502_v14  ;;  %s3758_s15 = sld [smem:[#allocation2 + $0x3]]  ;;  %v4513_v17 = vld [vmem:[%s7170_s1 + $0x30] sm:$0xff]  ;;  %s3757_s24 = sld [smem:[#allocation2 + $0x2]] }
  0x11   :  { %v4466_v4 = vld [vmem:[%s7170_s1] sm:$0xff]  ;;  %v4486_v10 = vld [vmem:[%s7170_s1 + $0x48] sm:$0xff]  ;;  %7265 = vst [vmem:[#allocation6_spill] sm:$0xff] %v4513_v17  ;;  %v4534_v22 = vld [vmem:[%s7170_s1 + $0x50] sm:$0xff]  ;;  %s3759_s16 = sld [smem:[#allocation2 + $0x4]]  ;;  %s3761_s17 = sld [smem:[#allocation2 + $0x6]] }
  0x12   :  { %v4491_v11 = vld [vmem:[%s7170_s1 + $0x60] sm:$0xff]  ;;  %v4518_v18 = vld [vmem:[%s7170_s1 + $0x68] sm:$0xff]  ;;  %7268 = vst [vmem:[#allocation9_spill] sm:$0xff] %v4534_v22  ;;  %v4561_v30 = vld [vmem:[%s7170_s1 + $0x70] sm:$0xff]  ;;  %s3763_s18 = sld [smem:[#allocation2 + $0x8]]  ;;  %s3762_s19 = sld [smem:[#allocation2 + $0x7]] }
  0x13   :  { %7266 = vst [vmem:[#allocation7_spill] sm:$0xff] %v4518_v18  ;;  %v4523_v19 = vld [vmem:[%s7170_s1 + $0x80] sm:$0xff]  ;;  %v4547_v26 = vld [vmem:[%s7170_s1 + $0x88] sm:$0xff]  ;;  %7270 = vst [vmem:[#allocation11_spill] sm:$0xff] %v4561_v30  ;;  %vm1663_vm1 = vcmask 1044480   ;;  %vm4412_vm2 = vmmov 0  }
  0x14   :  { %7267 = vst [vmem:[#allocation8_spill] sm:$0xff] %v4523_v19  ;;  %7269 = vst [vmem:[#allocation10_spill] sm:$0xff] %v4547_v26  ;;  %v4552_v27 = vld [vmem:[%s7170_s1 + $0xa0] sm:$0xff]  ;;  %v4578_v37 = vld [vmem:[%s7170_s1 + $0xa8] sm:$0xff]  ;;  %s3760_s12 = sld [smem:[#allocation2 + $0x5]]  ;;  %s3764_s13 = sld [smem:[#allocation2 + $0x9]] }
  0x15   :  { %v4456_v2 = vstv %s3756_s23  ;;  %v4583_v38 = vld [vmem:[%s7170_s1 + $0xc0] sm:$0xff]  ;;  %v4616_v50 = vld [vmem:[%s7170_s1 + $0x18] sm:$0xf]  ;;  %v4622_v52 = vld [vmem:[%s7170_s1 + $0x90] sm:$0xff]  ;;  %vm1627_vm3 = vcmask 1041409   ;;  %vm1630_vm4 = vcmask 1042434  }
  0x16   :  { %v110_v5 = vmul.f32 %v4456_v2, %v4449_v0  ;;  %v106_v6 = vmul.f32 %v4456_v2, %v4454_v1  ;;  %v107_v7 = vmul.f32 %v4456_v2, %v4461_v3  ;;  %v102_v8 = vmul.f32 %v4456_v2, %v4466_v4  ;;  %v4627_v53 = vld [vmem:[%s7170_s1 + $0xc8] sm:$0xff]  ;;  %v4632_v55 = vld [vmem:[%s7170_s1 + $0x38] sm:$0xf]  ;;  %v4643_v59 = vld [vmem:[%s7170_s1 + $0xe0] sm:$0xff] }
  0x17   :  { %v103_v12 = vmul.f32 %v4456_v2, %v4481_v9  ;;  %v111_v13 = vmul.f32 %v4456_v2, %v4486_v10  ;;  %v114_v15 = vmul.f32 %v4456_v2, %v4491_v11  ;;  %v104_v16 = vmul.f32 %v4456_v2, %v4502_v14 }
  0x18   :  { %182 = vrot.lane.b32.xlu1 %v110_v5, %s4410_s6  ;;  %174 = vrot.lane.b32.xlu0 %v106_v6, %s4410_s6  ;;  %v108_v20 = vmul.f32 %v4456_v2, %v4513_v17  ;;  %v115_v21 = vmul.f32 %v4456_v2, %v4518_v18  ;;  %v4536_v23 = vstv %s3758_s15  ;;  %v118_v24 = vmul.f32 %v4456_v2, %v4523_v19  ;;  %v4657_v6 = vld [vmem:[%s7170_s1 + $0xe8] sm:$0xff]  ;;  %s66_s15 = sld [smem:[#allocation2]] }
  0x19   :  { %v112_v25 = vmul.f32 %v4456_v2, %v4534_v22  ;;  %v487_v28 = vmul.f32 %v4536_v23, %v4454_v1  ;;  %v488_v29 = vmul.f32 %v4536_v23, %v4461_v3  ;;  %v119_v31 = vmul.f32 %v4456_v2, %v4547_v26 }
  0x1a   :  { %v122_v32 = vmul.f32 %v4456_v2, %v4552_v27  ;;  %v4571_v35 = vmul.f32 %v4536_v23, %v4513_v17  ;;  %v491_v36 = vmul.f32 %v4536_v23, %v4449_v0  ;;  %v4587_v39 = vmul.f32 %v4536_v23, %v4486_v10 }
  0x1b   :  { %v554_v33 = vrot.slane %v487_v28, 1  ;;  %v555_v34 = vrot.slane %v488_v29, 1  ;;  %v483_v40 = vmul.f32 %v4536_v23, %v4466_v4  ;;  %v4591_v41 = vstv %s3757_s24 }
  0x1c   :  { %176 = vrot.lane.b32.xlu0 %v107_v7, %s4410_s6  ;;  %166 = vrot.lane.b32.xlu1 %v102_v8, %s4410_s6  ;;  %v116_v42 = vmul.f32 %v4456_v2, %v4561_v30  ;;  %v484_v43 = vmul.f32 %v4536_v23, %v4481_v9  ;;  %v4601_v44 = vmul.f32 %v4536_v23, %v4502_v14  ;;  %v7175_v48 = vrot.slane %v4571_v35, 1 }
  0x1d   :  { %v4605_v45 = vmul.f32 %v4536_v23, %v4534_v22  ;;  %v4609_v46 = vmul.f32 %v4536_v23, %v4491_v11  ;;  %v556_v47 = vsel %vm360_vm0, %v554_v33, %v555_v34  ;;  %v561_v49 = vrot.slane %v491_v36, 1 }
  0x1e   :  { %v562_v51 = vrot.slane %v4587_v39, 1  ;;  %v547_v54 = vrot.slane %v483_v40, 1  ;;  %v300_v56 = vmul.f32 %v4591_v41, %v4454_v1  ;;  %v123_v57 = vmul.f32 %v4456_v2, %v4578_v37 }
  0x1f   :  { %v126_v58 = vmul.f32 %v4456_v2, %v4583_v38  ;;  %v4647_v60 = vmul.f32 %v4536_v23, %v4518_v18  ;;  %v548_v61 = vrot.slane %v484_v43, 1  ;;  %v7177_v62 = vrot.slane %v4601_v44, 1 }
  0x20   :  { %168 = vrot.lane.b32.xlu0 %v103_v12, %s4410_s6  ;;  %184 = vrot.lane.b32.xlu1 %v111_v13, %s4410_s6  ;;  %v7179_v63 = vrot.slane %v4605_v45, 1  ;;  %v568_v5 = vrot.slane %v4609_v46, 1  ;;  %v304_v7 = vmul.f32 %v4591_v41, %v4449_v0  ;;  %v4663_v8 = vmul.f32 %v4536_v23, %v4616_v50 }
  0x21   :  { %v120_v12 = vmul.f32 %v4456_v2, %v4622_v52  ;;  %v127_v13 = vmul.f32 %v4456_v2, %v4627_v53  ;;  %v549_v28 = vsel %vm360_vm0, %v547_v54, %v548_v61  ;;  %v4685_v29 = vmul.f32 %v4456_v2, %v4657_v6 }
  0x22   :  { %v4692_v33 = vmul.f32 %v4591_v41, %v4513_v17  ;;  %v375_v36 = vrot.slane %v304_v7, 1  ;;  %v4699_v39 = vsel %vm360_vm0, %v548_v61, %v7177_v62  ;;  %v4710_v46 = vmul.f32 %v4536_v23, %v4523_v19 }
  0x23   :  { %v296_v54 = vmul.f32 %v4591_v41, %v4466_v4  ;;  %v306_v61 = vmul.f32 %v4591_v41, %v4534_v22  ;;  %vm1633_vm5 = vcmask 1043459   ;;  %vm1636_vm6 = vcmask 1044484  }
  0x24   :  { %190 = vrot.lane.b32.xlu0 %v114_v15, %s4410_s6  ;;  %170 = vrot.lane.b32.xlu1 %v104_v16, %s4410_s6  ;;  %v4671_v15 = vmul.f32 %v4536_v23, %v4632_v55  ;;  %v558_v16 = vsel %vm360_vm0, %v555_v34, %v7175_v48  ;;  %7271 = vst [vmem:[#allocation12_spill] sm:$0xff] %v4692_v33  ;;  %vm1639_vm7 = vcmask 1045509   ;;  %vm1642_vm8 = vcmask 1046534  }
  0x25   :  { %v305_v34 = vmul.f32 %v4591_v41, %v4486_v10  ;;  %v378_v40 = vrot.slane %v306_v61, 1  ;;  %vm1645_vm9 = vcmask 1047559   ;;  %vm1659_vm10 = vcmask 211968  }
  0x26   :  { %vm3737_vm11 = vcmask 261120   ;;  %vm3749_vm12 = vcmask 7168  }
  0x28   :  { %178 = vrot.lane.b32.xlu0 %v108_v20, %s4410_s6  ;;  %192 = vrot.lane.b32.xlu1 %v115_v21, %s4410_s6  ;;  %v130_v20 = vmul.f32 %v4456_v2, %v4643_v59  ;;  %v7180_v21 = vrot.slane %v4647_v60, 1 }
  0x2c   :  { %198 = vrot.lane.b32.xlu0 %v118_v24, %s4410_s6  ;;  %186 = vrot.lane.b32.xlu1 %v112_v25, %s4410_s6  ;;  %v368_v24 = vrot.slane %v300_v56, 1  ;;  %v563_v25 = vsel %vm360_vm0, %v561_v49, %v562_v51  ;;  %v376_v49 = vrot.slane %v305_v34, 1 }
  0x30   :  { %200 = vrot.lane.b32.xlu0 %v119_v31, %s4410_s6  ;;  %206 = vrot.lane.b32.xlu1 %v122_v32, %s4410_s6  ;;  %v301_v31 = vmul.f32 %v4591_v41, %v4461_v3  ;;  %v7186_v32 = vrot.slane %v4663_v8, 1 }
  0x32   :  { %v369_v43 = vrot.slane %v301_v31, 1  ;;  %v4739_v31 = vld [vmem:[%s7170_s1 + $0x58] sm:$0xf] }
  0x34   :  { %611 = vrot.lane.b32.xlu0 %v556_v47, %s4410_s6  ;;  %194 = vrot.lane.b32.xlu1 %v116_v42, %s4410_s6  ;;  %v4704_v42 = vmul.f32 %v4536_v23, %v4561_v30  ;;  %v7176_v47 = vrot.slane %v4692_v33, 1  ;;  %v4716_v56 = vsel %vm360_vm0, %v368_v24, %v369_v43  ;;  %v361_v24 = vrot.slane %v296_v54, 1 }
  0x35   :  { %v570_v54 = vsel %vm360_vm0, %v568_v5, %v7180_v21  ;;  %v7275_v5 = vrot.slane %v4601_v44, 1  ;;  %v4798_v21 = vmul.f32 %v4536_v23, %v4739_v31 }
  0x36   :  { %v4729_v7 = vsel %vm360_vm0, %v369_v43, %v7176_v47  ;;  %v309_v43 = vmul.f32 %v4591_v41, %v4518_v18 }
  0x38   :  { %208 = vrot.lane.b32.xlu0 %v123_v57, %s4410_s6  ;;  %214 = vrot.lane.b32.xlu1 %v126_v58, %s4410_s6  ;;  %v297_v57 = vmul.f32 %v4591_v41, %v4481_v9  ;;  %v4722_v58 = vmul.f32 %v4591_v41, %v4502_v14  ;;  %v383_v62 = vrot.slane %v309_v43, 1  ;;  %v313_v43 = vmul.f32 %v4591_v41, %v4547_v26 }
  0x3a   :  { %7272 = vst [vmem:[#allocation13_spill] sm:$0xff] %v4722_v58  ;;  %v362_v34 = vrot.slane %v297_v57, 1  ;;  %v7178_v48 = vrot.slane %v4722_v58, 1  ;;  %v390_v58 = vrot.slane %v313_v43, 1 }
  0x3c   :  { %613 = vrot.lane.b32.xlu0 %v558_v16, %s4410_s6  ;;  %619 = vrot.lane.b32.xlu1 %v563_v25, %s4410_s6  ;;  %v4732_v16 = vsel %vm360_vm0, %v375_v36, %v376_v49  ;;  %v308_v25 = vmul.f32 %v4591_v41, %v4491_v11  ;;  %v565_v36 = vsel %vm360_vm0, %v562_v51, %v7179_v63 }
  0x3d   :  { %v4754_v61 = vsel %vm360_vm0, %v361_v24, %v362_v34  ;;  %v4766_v51 = vmul.f32 %v4536_v23, %v4547_v26  ;;  %v312_v24 = vmul.f32 %v4591_v41, %v4523_v19  ;;  %v314_v63 = vmul.f32 %v4591_v41, %v4622_v52 }
  0x3e   :  { %v382_v47 = vrot.slane %v308_v25, 1  ;;  %v310_v25 = vmul.f32 %v4591_v41, %v4561_v30  ;;  %v7277_v30 = vrot.slane %v4571_v35, 1 }
  0x3f   :  { %v389_v33 = vrot.slane %v312_v24, 1  ;;  %v392_v14 = vrot.slane %v314_v63, 1  ;;  %v317_v24 = vmul.f32 %v4591_v41, %v4578_v37 }
  0x40   :  { %202 = vrot.lane.b32.xlu0 %v120_v12, %s4410_s6  ;;  %216 = vrot.lane.b32.xlu1 %v127_v13, %s4410_s6  ;;  %v4759_v12 = vsel %vm360_vm0, %v362_v34, %v7178_v48  ;;  %v4762_v13 = vsel %vm360_vm0, %v376_v49, %v378_v40  ;;  %v4776_v34 = vld [vmem:[%s7170_s1 + $0x78] sm:$0xf]  ;;  %v4779_v49 = vsel %vm360_vm0, %v382_v47, %v383_v62  ;;  %v385_v57 = vrot.slane %v310_v25, 1 }
  0x41   :  { %7273 = vst [vmem:[#allocation14_spill] sm:$0xff] %v4779_v49  ;;  %v4785_v48 = vmul.f32 %v4591_v41, %v4739_v31  ;;  %v553_v47 = vsel %vm360_vm0, %v7275_v5, %v7186_v32  ;;  %v4811_v5 = vld [vmem:[%s7170_s1 + $0xd0] sm:$0xff]  ;;  %v4816_v25 = vld [vmem:[%s7170_s1 + $0x98] sm:$0xf]  ;;  %v4825_v35 = vmul.f32 %v4591_v41, %v4776_v34  ;;  %v4833_v43 = vsel %vm360_vm0, %v389_v33, %v390_v58 }
  0x42   :  { %v4819_v63 = vsel %vm360_vm0, %v383_v62, %v385_v57  ;;  %7280 = vst [vmem:[#allocation18_spill] sm:$0xff] %v4833_v43  ;;  %v397_v26 = vrot.slane %v317_v24, 1  ;;  %v576_v24 = vrot.slane %v4766_v51, 1 }
  0x43   :  { %7274 = vst [vmem:[#allocation15_spill] sm:$0xff] %v4785_v48  ;;  %v7189_v17 = vrot.slane %v4785_v48, 1  ;;  %7278 = vst [vmem:[#allocation16_spill] sm:$0xff] %v4819_v63  ;;  %v320_v48 = vmul.f32 %v4591_v41, %v4583_v38 }
  0x44   :  { %222 = vrot.lane.b32.xlu0 %v130_v20, %s4410_s6  ;;  %603 = vrot.lane.b32.xlu1 %v549_v28, %s4410_s6  ;;  %v316_v20 = vmul.f32 %v4591_v41, %v4552_v27  ;;  %v7276_v28 = vrot.slane %v4671_v15, 1  ;;  %7279 = vst [vmem:[#allocation17_spill] sm:$0xff] %v4825_v35 }
  0x45   :  { %v4838_v62 = vsel %vm360_vm0, %v378_v40, %v7189_v17  ;;  %v4854_v40 = vld [vmem:[%s7170_s1 + $0xf0] sm:$0xff]  ;;  %v4870_v17 = vld [vmem:[%s7170_s1 + $0xd8] sm:$0xf]  ;;  %v403_v22 = vrot.slane %v320_v48, 1 }
  0x46   :  { %v560_v44 = vsel %vm360_vm0, %v7277_v30, %v7276_v28  ;;  %v4830_v30 = vld [vmem:[%s7170_s1 + $0xb0] sm:$0xff]  ;;  %7281 = vst [vmem:[#allocation19_spill] sm:$0xff] %v4838_v62  ;;  %v4841_v28 = vsel %vm360_vm0, %v390_v58, %v392_v14  ;;  %v396_v32 = vrot.slane %v316_v20, 1  ;;  %v321_v58 = vmul.f32 %v4591_v41, %v4627_v53 }
  0x47   :  { %7282 = vst [vmem:[#allocation20_spill] sm:$0xff] %v4841_v28  ;;  %v318_v33 = vmul.f32 %v4591_v41, %v4830_v30  ;;  %v324_v20 = vmul.f32 %v4591_v41, %v4643_v59  ;;  %v7284_v28 = vrot.slane %v4825_v35, 1 }
  0x48   :  { %605 = vrot.lane.b32.xlu0 %v4699_v39, %s4410_s6  ;;  %621 = vrot.lane.b32.xlu1 %v565_v36, %s4410_s6  ;;  %v4860_v39 = vmul.f32 %v4591_v41, %v4816_v25  ;;  %v322_v36 = vmul.f32 %v4591_v41, %v4811_v5  ;;  %v4873_v63 = vsel %vm360_vm0, %v396_v32, %v397_v26  ;;  %v404_v19 = vrot.slane %v321_v58, 1 }
  0x49   :  { %v4878_v62 = vsel %vm360_vm0, %v385_v57, %v7284_v28  ;;  %v399_v43 = vrot.slane %v318_v33, 1  ;;  %v325_v32 = vmul.f32 %v4591_v41, %v4657_v6  ;;  %v410_v35 = vrot.slane %v324_v20, 1 }
  0x4a   :  { %7283 = vst [vmem:[#allocation21_spill] sm:$0xff] %v4860_v39  ;;  %v7194_v49 = vrot.slane %v4860_v39, 1  ;;  %v406_v18 = vrot.slane %v322_v36, 1  ;;  %v326_v57 = vmul.f32 %v4591_v41, %v4854_v40  ;;  %v4892_v48 = vsel %vm360_vm0, %v403_v22, %v404_v19 }
  0x4b   :  { %v4885_v51 = vsel %vm360_vm0, %v397_v26, %v399_v43  ;;  %v4904_v26 = vmul.f32 %v4591_v41, %v4870_v17  ;;  %v411_v28 = vrot.slane %v325_v32, 1  ;;  %v7286_v58 = vrot.slane %v4704_v42, 1 }
  0x4c   :  { %627 = vrot.lane.b32.xlu0 %v570_v54, %s4410_s6  ;;  %224 = vrot.lane.b32.xlu1 %v4685_v29, %s4410_s6  ;;  %v4897_v54 = vsel %vm360_vm0, %v392_v14, %v7194_v49  ;;  %v4900_v29 = vsel %vm360_vm0, %v404_v19, %v406_v18  ;;  %v413_v33 = vrot.slane %v326_v57, 1  ;;  %v7287_v36 = vrot.slane %v4647_v60, 1  ;;  %v4924_v60 = vld [vmem:[%s7170_s1 + $0xb8] sm:$0xf] }
  0x4d   :  { %7285 = vst [vmem:[#allocation22_spill] sm:$0xff] %v4904_v26  ;;  %v501_v20 = vmul.f32 %v4536_v23, %v4622_v52  ;;  %v503_v14 = vmul.f32 %v4536_v23, %v4552_v27  ;;  %v7196_v19 = vrot.slane %v4904_v26, 1  ;;  %v504_v57 = vmul.f32 %v4536_v23, %v4578_v37 }
  0x4e   :  { %v572_v22 = vsel %vm360_vm0, %v7287_v36, %v7286_v58  ;;  %v4929_v58 = vld [vmem:[%s7170_s1 + $0xf8] sm:$0xf]  ;;  %v4932_v36 = vsel %vm360_vm0, %v410_v35, %v411_v28  ;;  %v4947_v39 = vmul.f32 %v4591_v41, %v4924_v60 }
  0x4f   :  { %7288 = vst [vmem:[#allocation23_spill] sm:$0xff] %v4932_v36  ;;  %v4943_v32 = vsel %vm360_vm0, %v406_v18, %v7196_v19  ;;  %v4951_v35 = vmul.f32 %v4591_v41, %v4929_v58  ;;  %v128_v18 = vmul.f32 %v4456_v2, %v4811_v5  ;;  %v578_v26 = vrot.slane %v501_v20, 1 }
  0x50   :  { %607 = vrot.lane.b32.xlu0 %v553_v47, %s4410_s6  ;;  %615 = vrot.lane.b32.xlu1 %v560_v44, %s4410_s6  ;;  %v4935_v47 = vsel %vm360_vm0, %v411_v28, %v413_v33  ;;  %v7290_v44 = vrot.slane %v4710_v46, 1  ;;  %7291 = vst [vmem:[#allocation25_spill] sm:$0xff] %v4943_v32  ;;  %7292 = vst [vmem:[#allocation26_spill] sm:$0xff] %v4947_v39  ;;  %v7198_v28 = vrot.slane %v4947_v39, 1  ;;  %v7294_v46 = vrot.slane %v4798_v21, 1 }
  0x51   :  { %7289 = vst [vmem:[#allocation24_spill] sm:$0xff] %v4935_v47  ;;  %7293 = vst [vmem:[#allocation27_spill] sm:$0xff] %v4951_v35  ;;  %v582_v32 = vrot.slane %v503_v14, 1  ;;  %v583_v36 = vrot.slane %v504_v57, 1  ;;  %v579_v20 = vsel %vm360_vm0, %v576_v24, %v578_v26  ;;  %v5024_v39 = vmul.f32 %v4536_v23, %v4870_v17 }
  0x52   :  { %v577_v49 = vsel %vm360_vm0, %v7290_v44, %v576_v24  ;;  %v7295_v44 = vrot.slane %v4605_v45, 1  ;;  %v4967_v47 = vsel %vm360_vm0, %v399_v43, %v7198_v28  ;;  %v4978_v45 = vmul.f32 %v4536_v23, %v4776_v34 }
  0x53   :  { %v584_v14 = vsel %vm360_vm0, %v582_v32, %v583_v36  ;;  %v505_v43 = vmul.f32 %v4536_v23, %v4830_v30  ;;  %v507_v24 = vmul.f32 %v4536_v23, %v4583_v38  ;;  %v508_v32 = vmul.f32 %v4536_v23, %v4627_v53 }
  0x54   :  { %629 = vrot.lane.b32.xlu0 %v572_v22, %s4410_s6  ;;  %635 = vrot.lane.b32.xlu1 %v577_v49, %s4410_s6  ;;  %v567_v19 = vsel %vm360_vm0, %v7295_v44, %v7294_v46  ;;  %v7296_v22 = vrot.slane %v4951_v35, 1  ;;  %v7200_v57 = vrot.slane %v4978_v45, 1  ;;  %v4997_v46 = vmul.f32 %v4536_v23, %v4816_v25 }
  0x55   :  { %v7297_v44 = vrot.slane %v4704_v42, 1  ;;  %v590_v35 = vrot.slane %v508_v32, 1 }
  0x56   :  { %v4972_v49 = vsel %vm360_vm0, %v413_v33, %v7296_v22  ;;  %v124_v33 = vmul.f32 %v4456_v2, %v4830_v30 }
  0x57   :  { %v574_v22 = vsel %vm360_vm0, %v7297_v44, %v7200_v57  ;;  %v513_v44 = vmul.f32 %v4536_v23, %v4854_v40 }
  0x58   :  { %218 = vrot.lane.b32.xlu0 %v128_v18, %s4410_s6  ;;  %623 = vrot.lane.b32.xlu1 %v567_v19, %s4410_s6  ;;  %v132_v19 = vmul.f32 %v4456_v2, %v4854_v40  ;;  %v585_v18 = vrot.slane %v505_v43, 1  ;;  %v511_v43 = vmul.f32 %v4536_v23, %v4643_v59 }
  0x5a   :  { %v586_v28 = vsel %vm360_vm0, %v583_v36, %v585_v18 }
  0x5c   :  { %637 = vrot.lane.b32.xlu0 %v579_v20, %s4410_s6  ;;  %643 = vrot.lane.b32.xlu1 %v584_v14, %s4410_s6  ;;  %v589_v20 = vrot.slane %v507_v24, 1  ;;  %v509_v14 = vmul.f32 %v4536_v23, %v4811_v5  ;;  %v596_v24 = vrot.slane %v511_v43, 1  ;;  %v506_v43 = vmul.f32 %v4536_v23, %v4924_v60 }
  0x5e   :  { %v592_v42 = vrot.slane %v509_v14, 1  ;;  %v591_v57 = vsel %vm360_vm0, %v589_v20, %v590_v35  ;;  %v594_v20 = vrot.slane %v5024_v39, 1 }
  0x60   :  { %210 = vrot.lane.b32.xlu0 %v124_v33, %s4410_s6  ;;  %226 = vrot.lane.b32.xlu1 %v132_v19, %s4410_s6  ;;  %v580_v33 = vrot.slane %v4997_v46, 1  ;;  %v512_v19 = vmul.f32 %v4536_v23, %v4657_v6 }
  0x62   :  { %v581_v36 = vsel %vm360_vm0, %v578_v26, %v580_v33  ;;  %v597_v32 = vrot.slane %v512_v19, 1  ;;  %v514_v26 = vmul.f32 %v4536_v23, %v4929_v58  ;;  %v595_v19 = vsel %vm360_vm0, %v592_v42, %v594_v20 }
  0x63   :  { %v109_v23 = vmul.f32 %v4456_v2, %v4632_v55 }
  0x64   :  { %631 = vrot.lane.b32.xlu0 %v574_v22, %s4410_s6  ;;  %645 = vrot.lane.b32.xlu1 %v586_v28, %s4410_s6  ;;  %v593_v28 = vsel %vm360_vm0, %v590_v35, %v592_v42  ;;  %v599_v22 = vrot.slane %v513_v44, 1  ;;  %v598_v14 = vsel %vm360_vm0, %v596_v24, %v597_v32  ;;  %v587_v35 = vrot.slane %v506_v43, 1 }
  0x65   :  { %v601_v44 = vrot.slane %v514_v26, 1  ;;  %v113_v42 = vmul.f32 %v4456_v2, %v4739_v31  ;;  %v125_v31 = vmul.f32 %v4456_v2, %v4924_v60  ;;  %v7299_v26 = vrot.slane %v4798_v21, 1 }
  0x66   :  { %v588_v39 = vsel %vm360_vm0, %v585_v18, %v587_v35  ;;  %v117_v18 = vmul.f32 %v4456_v2, %v4776_v34  ;;  %v7298_v34 = vrot.slane %v4671_v15, 1 }
  0x67   :  { %v602_v24 = vsel %vm360_vm0, %v599_v22, %v601_v44 }
  0x68   :  { %651 = vrot.lane.b32.xlu0 %v591_v57, %s4410_s6  ;;  %639 = vrot.lane.b32.xlu1 %v581_v36, %s4410_s6  ;;  %v600_v57 = vsel %vm360_vm0, %v597_v32, %v599_v22  ;;  %v105_v36 = vmul.f32 %v4456_v2, %v4616_v50  ;;  %v121_v32 = vmul.f32 %v4456_v2, %v4816_v25  ;;  %v5071_v22 = vstv %s66_s15 }
  0x69   :  { %v133_v25 = vmul.f32 %v4456_v2, %v4929_v58  ;;  %v72_v43 = vmul.f32 %v5071_v22, %v4454_v1  ;;  %v7301_v1 = vrot.slane %v4978_v45, 1 }
  0x6c   :  { %653 = vrot.lane.b32.xlu0 %v593_v28, %s4410_s6  ;;  %659 = vrot.lane.b32.xlu1 %v598_v14, %s4410_s6  ;;  %v129_v28 = vmul.f32 %v4456_v2, %v4870_v17  ;;  %v76_v14 = vmul.f32 %v5071_v22, %v4449_v0  ;;  %v73_v2 = vmul.f32 %v5071_v22, %v4461_v3  ;;  %v7300_v0 = vrot.slane %v4663_v8, 1 }
  0x6d   :  { %v77_v8 = vmul.f32 %v5071_v22, %v4486_v10 }
  0x70   :  { %661 = vrot.lane.b32.xlu0 %v600_v57, %s4410_s6  ;;  %655 = vrot.lane.b32.xlu1 %v595_v19, %s4410_s6 }
  0x74   :  { %647 = vrot.lane.b32.xlu0 %v588_v39, %s4410_s6  ;;  %663 = vrot.lane.b32.xlu1 %v602_v24, %s4410_s6  ;;  %v68_v24 = vmul.f32 %v5071_v22, %v4466_v4  ;;  %v69_v4 = vmul.f32 %v5071_v22, %v4481_v9  ;;  %v80_v9 = vmul.f32 %v5071_v22, %v4491_v11 }
  0x78   :  { %180 = vrot.lane.b32.xlu0 %v109_v23, %s4410_s6  ;;  %188 = vrot.lane.b32.xlu1 %v113_v42, %s4410_s6 }
  0x7c   :  { %172 = vrot.lane.b32.xlu0 %v105_v36, %s4410_s6  ;;  %196 = vrot.lane.b32.xlu1 %v117_v18, %s4410_s6 }
  0x80   :  { %204 = vrot.lane.b32.xlu0 %v121_v32, %s4410_s6  ;;  %212 = vrot.lane.b32.xlu1 %v125_v31, %s4410_s6 }
  0x84   :  { %617 = vrot.lane.b32.xlu0 %v7298_v34, %s4410_s6  ;;  %220 = vrot.lane.b32.xlu1 %v129_v28, %s4410_s6 }
  0x88   :  { %625 = vrot.lane.b32.xlu0 %v7299_v26, %s4410_s6  ;;  %228 = vrot.lane.b32.xlu1 %v133_v25, %s4410_s6  ;;  %v7303_v25 = vld [vmem:[#allocation14_spill] sm:$0xff]  ;;  %v7305_v26 = vld [vmem:[#allocation9_spill] sm:$0xff] }
  0x8a   :  { %v183_v15 = vpop.permute.xlu1 %182  ;;  %v175_v57 = vpop.permute.xlu0 %174 }
  0x8b   :  { %v270_v19 = vadd.f32 %v183_v15, %v76_v14  ;;  %v266_v39 = vadd.f32 %v175_v57, %v72_v43  ;;  %v7304_v43 = vld [vmem:[#allocation8_spill] sm:$0xff] }
  0x8c   :  { %609 = vrot.lane.b32.xlu0 %v7300_v0, %s4410_s6  ;;  %633 = vrot.lane.b32.xlu1 %v7301_v1, %s4410_s6  ;;  %v7306_v15 = vld [vmem:[#allocation16_spill] sm:$0xff]  ;;  %v7307_v0 = vld [vmem:[#allocation10_spill] sm:$0xff] }
  0x8d   :  { %v453_v21 = vadd.f32 %v4716_v56, %v266_v39  ;;  %v5093_v23 = vadd.f32 %v4732_v16, %v270_v19  ;;  %v85_v1 = vmul.f32 %v5071_v22, %v7307_v0 }
  0x8e   :  { %v177_v42 = vpop.permute.xlu0 %176  ;;  %v167_v36 = vpop.permute.xlu1 %166 }
  0x8f   :  { %v267_v18 = vadd.f32 %v177_v42, %v73_v2  ;;  %v262_v3 = vadd.f32 %v167_v36, %v68_v24  ;;  %v88_v42 = vmul.f32 %v5071_v22, %v4552_v27  ;;  %v7308_v36 = vld [vmem:[#allocation18_spill] sm:$0xff]  ;;  %v5151_v27 = vstv %s3759_s16 }
  0x90   :  { %641 = vrot.lane.b32.xlu0 %v580_v33, %s4410_s6  ;;  %649 = vrot.lane.b32.xlu1 %v587_v35, %s4410_s6  ;;  %v7302_v35 = vld [vmem:[#allocation7_spill] sm:$0xff] }
  0x91   :  { %v454_v56 = vadd.f32 %v4729_v7, %v267_v18  ;;  %v5105_v16 = vadd.f32 %v4754_v61, %v262_v3  ;;  %v81_v34 = vmul.f32 %v5071_v22, %v7302_v35  ;;  %v7309_v3 = vld [vmem:[#allocation19_spill] sm:$0xff] }
  0x92   :  { %v169_v45 = vpop.permute.xlu0 %168  ;;  %v185_v32 = vpop.permute.xlu1 %184 }
  0x93   :  { %v263_v31 = vadd.f32 %v169_v45, %v69_v4  ;;  %v271_v28 = vadd.f32 %v185_v32, %v77_v8 }
  0x94   :  { %657 = vrot.lane.b32.xlu0 %v594_v20, %s4410_s6  ;;  %665 = vrot.lane.b32.xlu1 %v601_v44, %s4410_s6 }
  0x95   :  { %v5112_v10 = vadd.f32 %v4759_v12, %v263_v31  ;;  %v5115_v46 = vadd.f32 %v4762_v13, %v271_v28  ;;  %v84_v12 = vmul.f32 %v5071_v22, %v7304_v43  ;;  %v78_v13 = vmul.f32 %v5071_v22, %v7305_v26  ;;  %v7310_v28 = vld [vmem:[#allocation11_spill] sm:$0xff] }
  0x96   :  { %v191_v7 = vpop.permute.xlu0 %190  ;;  %v5117_v61 = vpop.permute.xlu1 %170  ;;  %v89_v43 = vmul.f32 %v5071_v22, %v4578_v37 }
  0x97   :  { %v274_v33 = vadd.f32 %v191_v7, %v80_v9  ;;  %v82_v9 = vmul.f32 %v5071_v22, %v7310_v28  ;;  %v7311_v7 = vld [vmem:[#allocation20_spill] sm:$0xff] }
  0x99   :  { %v5122_v14 = vadd.f32 %v7303_v25, %v274_v33 }
  0x9a   :  { %v5124_v11 = vpop.permute.xlu0 %178  ;;  %v193_v20 = vpop.permute.xlu1 %192 }
  0x9b   :  { %v275_v44 = vadd.f32 %v193_v20, %v81_v34 }
  0x9d   :  { %v5131_v57 = vadd.f32 %v7306_v15, %v275_v44 }
  0x9e   :  { %v199_v19 = vpop.permute.xlu0 %198  ;;  %v187_v39 = vpop.permute.xlu1 %186 }
  0x9f   :  { %v278_v2 = vadd.f32 %v199_v19, %v84_v12  ;;  %v272_v24 = vadd.f32 %v187_v39, %v78_v13  ;;  %v92_v12 = vmul.f32 %v5071_v22, %v4583_v38 }
  0xa1   :  { %v5138_v18 = vadd.f32 %v7308_v36, %v278_v2  ;;  %v5141_v4 = vadd.f32 %v7309_v3, %v272_v24 }
  0xa2   :  { %v201_v8 = vpop.permute.xlu0 %200  ;;  %v207_v45 = vpop.permute.xlu1 %206 }
  0xa3   :  { %v279_v32 = vadd.f32 %v201_v8, %v85_v1  ;;  %v282_v31 = vadd.f32 %v207_v45, %v88_v42  ;;  %v86_v1 = vmul.f32 %v5071_v22, %v4622_v52  ;;  %v93_v8 = vmul.f32 %v5071_v22, %v4627_v53 }
  0xa4   :  { %v96_v52 = vmul.f32 %v5071_v22, %v4643_v59 }
  0xa5   :  { %v5146_v33 = vadd.f32 %v7311_v7, %v279_v32  ;;  %v5149_v35 = vadd.f32 %v4873_v63, %v282_v31  ;;  %v5189_v31 = vstv %s3762_s19 }
  0xa6   :  { %v612_v34 = vpop.permute.xlu0 %611  ;;  %v195_v25 = vpop.permute.xlu1 %194 }
  0xa7   :  { %v703_v20 = vadd.f32 %v612_v34, %v453_v21  ;;  %v276_v44 = vadd.f32 %v195_v25, %v82_v9  ;;  %v5161_v21 = vstv %s3761_s17  ;;  %v5193_v34 = vmul.f32 %v4591_v41, %v4632_v55 }
  0xa9   :  { %v737_v26 = vadd.f32 %v5151_v27, %v703_v20  ;;  %v5159_v13 = vadd.f32 %v4878_v62, %v276_v44 }
  0xaa   :  { %v209_v15 = vpop.permute.xlu0 %208  ;;  %v215_v63 = vpop.permute.xlu1 %214 }
  0xab   :  { %v769_v19 = vmul.f32 0.1, %v737_v26  ;;  %v283_v39 = vadd.f32 %v209_v15, %v89_v43  ;;  %v286_v2 = vadd.f32 %v215_v63, %v92_v12  ;;  %v7315_v63 = vld [vmem:[#allocation5_spill] sm:$0xff] }
  0xad   :  { %v5163_v24 = vmax.f32 %v737_v26, %v769_v19  ;;  %v5166_v37 = vadd.f32 %v4885_v51, %v283_v39  ;;  %v5169_v38 = vadd.f32 %v4892_v48, %v286_v2  ;;  %v7316_v19 = vld [vmem:[#allocation6_spill] sm:$0xff]  ;;  %v7203_v2 = vrot.slane %v5193_v34, 1 }
  0xae   :  { %v614_v0 = vpop.permute.xlu0 %613  ;;  %v620_v62 = vpop.permute.xlu1 %619  ;;  %v74_v39 = vmul.f32 %v5071_v22, %v7316_v19 }
  0xaf   :  { %7312 = vst [vmem:[#allocation7_spill] sm:$0xff] %v5163_v24  ;;  %v704_v42 = vadd.f32 %v614_v0, %v454_v56  ;;  %v707_v36 = vadd.f32 %v620_v62, %v5093_v23  ;;  %v869_v3 = vmul.f32 %v5161_v21, %v5163_v24  ;;  %v5185_v23 = vmul.f32 %v4591_v41, %v4616_v50 }
  0xb0   :  { %v5187_v56 = vstv %s3763_s18  ;;  %v1063_v41 = vmul.f32 %v5189_v31, %v5163_v24 }
  0xb1   :  { %v738_v51 = vadd.f32 %v5151_v27, %v704_v42  ;;  %v741_v45 = vadd.f32 %v5151_v27, %v707_v36  ;;  %937 = vrot.lane.b32.xlu0 %v869_v3, %s4410_s6  ;;  %v7202_v12 = vrot.slane %v5185_v23, 1  ;;  %v1249_v26 = vmul.f32 %v5187_v56, %v5163_v24 }
  0xb2   :  { %v203_v48 = vpop.permute.xlu0 %202  ;;  %v217_v32 = vpop.permute.xlu1 %216 }
  0xb3   :  { %v770_v53 = vmul.f32 0.1, %v738_v51  ;;  %v773_v28 = vmul.f32 0.1, %v741_v45  ;;  %v280_v9 = vadd.f32 %v203_v48, %v86_v1  ;;  %v287_v7 = vadd.f32 %v217_v32, %v93_v8  ;;  %v7317_v1 = vld [vmem:[#allocation23_spill] sm:$0xff] }
  0xb4   :  { %v1316_v32 = vrot.slane %v1249_v26, 1 }
  0xb5   :  { %v5195_v25 = vmax.f32 %v738_v51, %v770_v53  ;;  %v5197_v20 = vmax.f32 %v741_v45, %v773_v28  ;;  %v5200_v59 = vadd.f32 %v4897_v54, %v280_v9  ;;  %v5203_v50 = vadd.f32 %v4900_v29, %v287_v7  ;;  %v7318_v51 = vld [vmem:[#allocation13_spill] sm:$0xff] }
  0xb6   :  { %v223_v44 = vpop.permute.xlu0 %222  ;;  %v604_v43 = vpop.permute.xlu1 %603  ;;  %v70_v29 = vmul.f32 %v5071_v22, %v7315_v63  ;;  %v7319_v45 = vrot.slane %v7318_v51, 1  ;;  %v1130_v53 = vrot.slane %v1063_v41, 1 }
  0xb7   :  { %7313 = vst [vmem:[#allocation14_spill] sm:$0xff] %v5195_v25  ;;  %7314 = vst [vmem:[#allocation8_spill] sm:$0xff] %v5197_v20  ;;  %v290_v55 = vadd.f32 %v223_v44, %v96_v52  ;;  %v699_v15 = vadd.f32 %v604_v43, %v5105_v16  ;;  %v873_v54 = vmul.f32 %v5161_v21, %v5197_v20 }
  0xb8   :  { %v5220_v0 = vmul.f32 %v5187_v56, %v5195_v25  ;;  %v97_v16 = vmul.f32 %v5071_v22, %v4657_v6  ;;  %v5231_v36 = vmul.f32 %v5189_v31, %v5195_v25  ;;  %v367_v48 = vsel %vm360_vm0, %v7319_v45, %v7202_v12 }
  0xb9   :  { %v733_v62 = vadd.f32 %v5151_v27, %v699_v15  ;;  %945 = vrot.lane.b32.xlu1 %v873_v54, %s4410_s6  ;;  %v5227_v42 = vadd.f32 %v7317_v1, %v290_v55  ;;  %v264_v44 = vadd.f32 %v5117_v61, %v70_v29  ;;  %v268_v43 = vadd.f32 %v5124_v11, %v74_v39  ;;  %v7320_v55 = vld [vmem:[#allocation12_spill] sm:$0xff] }
  0xba   :  { %v606_v3 = vpop.permute.xlu0 %605  ;;  %v622_v8 = vpop.permute.xlu1 %621  ;;  %v7206_v52 = vrot.slane %v5220_v0, 1  ;;  %v7204_v7 = vrot.slane %v5231_v36, 1  ;;  %v7321_v15 = vrot.slane %v7320_v55, 1  ;;  %v1253_v51 = vmul.f32 %v5187_v56, %v5197_v20 }
  0xbb   :  { %v765_v6 = vmul.f32 0.1, %v733_v62  ;;  %v700_v28 = vadd.f32 %v606_v3, %v5112_v10  ;;  %v708_v9 = vadd.f32 %v622_v8, %v5115_v46  ;;  %v451_v3 = vadd.f32 %v367_v48, %v264_v44 }
  0xbc   :  { %v374_v26 = vsel %vm360_vm0, %v7321_v15, %v7203_v2  ;;  %v5252_v41 = vsel %vm360_vm0, %v1316_v32, %v7206_v52  ;;  %v5261_v61 = vsel %vm360_vm0, %v1130_v53, %v7204_v7  ;;  %v94_v48 = vmul.f32 %v5071_v22, %v4811_v5 }
  0xbd   :  { %v5254_v10 = vmax.f32 %v733_v62, %v765_v6  ;;  %v734_v46 = vadd.f32 %v5151_v27, %v700_v28  ;;  %v742_v54 = vadd.f32 %v5151_v27, %v708_v9  ;;  %7323 = vst [vmem:[#allocation16_spill] sm:$0xff] %v5261_v61  ;;  %v455_v8 = vadd.f32 %v374_v26, %v268_v43  ;;  %v7326_v6 = vld [vmem:[#allocation24_spill] sm:$0xff] }
  0xbe   :  { %v628_v11 = vpop.permute.xlu0 %627  ;;  %v225_v63 = vpop.permute.xlu1 %224  ;;  %v5281_v9 = vmul.f32 %v5071_v22, %v4830_v30  ;;  %v1067_v30 = vmul.f32 %v5189_v31, %v5197_v20 }
  0xbf   :  { %7322 = vst [vmem:[#allocation9_spill] sm:$0xff] %v5254_v10  ;;  %v766_v29 = vmul.f32 0.1, %v734_v46  ;;  %v774_v19 = vmul.f32 0.1, %v742_v54  ;;  %v711_v39 = vadd.f32 %v628_v11, %v5122_v14  ;;  %v291_v1 = vadd.f32 %v225_v63, %v97_v16 }
  0xc0   :  { %v865_v62 = vmul.f32 %v5161_v21, %v5254_v10  ;;  %v1245_v44 = vmul.f32 %v5187_v56, %v5254_v10 }
  0xc1   :  { %v5268_v45 = vmax.f32 %v734_v46, %v766_v29  ;;  %v5270_v32 = vmax.f32 %v742_v54, %v774_v19  ;;  %v745_v53 = vadd.f32 %v5151_v27, %v711_v39  ;;  %v5274_v28 = vadd.f32 %v7326_v6, %v291_v1 }
  0xc2   :  { %929 = vrot.lane.b32.xlu0 %v865_v62, %s4410_s6  ;;  %v608_v14 = vpop.permute.xlu0 %607  ;;  %v616_v16 = vpop.permute.xlu1 %615  ;;  %v870_v46 = vmul.f32 %v5161_v21, %v5195_v25  ;;  %v1323_v19 = vrot.slane %v1253_v51, 1  ;;  %v4393_v25 = vld [vmem:[%s7170_s1 + $0x78] sm:$0xf] }
  0xc3   :  { %7324 = vst [vmem:[#allocation10_spill] sm:$0xff] %v5268_v45  ;;  %7325 = vst [vmem:[#allocation18_spill] sm:$0xff] %v5270_v32  ;;  %v777_v43 = vmul.f32 0.1, %v745_v53  ;;  %v701_v55 = vadd.f32 %v608_v14, %v451_v3  ;;  %v705_v15 = vadd.f32 %v616_v16, %v455_v8  ;;  %v866_v26 = vmul.f32 %v5161_v21, %v5268_v45 }
  0xc4   :  { %v5291_v54 = vmul.f32 %v5187_v56, %v5270_v32  ;;  %v1246_v5 = vmul.f32 %v5187_v56, %v5268_v45  ;;  %v1309_v3 = vrot.slane %v1245_v44, 1  ;;  %v5306_v6 = vmul.f32 %v5189_v31, %v5270_v32 }
  0xc5   :  { %v5297_v11 = vmax.f32 %v745_v53, %v777_v43  ;;  %v735_v63 = vadd.f32 %v5151_v27, %v701_v55  ;;  %v739_v29 = vadd.f32 %v5151_v27, %v705_v15  ;;  %931 = vrot.lane.b32.xlu1 %v866_v26, %s4410_s6  ;;  %v874_v55 = vmul.f32 %v5161_v21, %v5270_v32 }
  0xc6   :  { %939 = vrot.lane.b32.xlu0 %v870_v46, %s4410_s6  ;;  %v630_v39 = vpop.permute.xlu0 %629  ;;  %v636_v1 = vpop.permute.xlu1 %635  ;;  %v7205_v62 = vrot.slane %v5291_v54, 1  ;;  %v1310_v8 = vrot.slane %v1246_v5, 1 }
  0xc7   :  { %7327 = vst [vmem:[#allocation19_spill] sm:$0xff] %v5297_v11  ;;  %v767_v53 = vmul.f32 0.1, %v735_v63  ;;  %v771_v14 = vmul.f32 0.1, %v739_v29  ;;  %v712_v16 = vadd.f32 %v630_v39, %v5131_v57  ;;  %v715_v43 = vadd.f32 %v636_v1, %v5138_v18 }
  0xc8   :  { %v877_v51 = vmul.f32 %v5161_v21, %v5297_v11  ;;  %v5317_v44 = vsel %vm360_vm0, %v1323_v19, %v7205_v62  ;;  %v5320_v15 = vsel %vm360_vm0, %v1309_v3, %v1310_v8  ;;  %v98_v19 = vmul.f32 %v5071_v22, %v4854_v40 }
  0xc9   :  { %v5322_v26 = vmax.f32 %v735_v63, %v767_v53  ;;  %v5324_v46 = vmax.f32 %v739_v29, %v771_v14  ;;  %v746_v57 = vadd.f32 %v5151_v27, %v712_v16  ;;  %v749_v18 = vadd.f32 %v5151_v27, %v715_v43 }
  0xca   :  { %953 = vrot.lane.b32.xlu1 %v877_v51, %s4410_s6  ;;  %947 = vrot.lane.b32.xlu0 %v874_v55, %s4410_s6  ;;  %v219_v5 = vpop.permute.xlu0 %218  ;;  %v624_v39 = vpop.permute.xlu1 %623  ;;  %v1137_v1 = vrot.slane %v1067_v30, 1  ;;  %v7208_v3 = vrot.slane %v5306_v6, 1  ;;  %v5335_v63 = vmul.f32 %v5189_v31, %v5268_v45  ;;  %v1257_v40 = vmul.f32 %v5187_v56, %v5297_v11 }
  0xcb   :  { %v778_v29 = vmul.f32 0.1, %v746_v57  ;;  %v781_v53 = vmul.f32 0.1, %v749_v18  ;;  %v288_v14 = vadd.f32 %v219_v5, %v94_v48  ;;  %v709_v16 = vadd.f32 %v624_v39, %v5141_v4  ;;  %v7332_v48 = vld [vmem:[#allocation25_spill] sm:$0xff] }
  0xcc   :  { %v5340_v43 = vmul.f32 %v5187_v56, %v5324_v46  ;;  %v5344_v51 = vmul.f32 %v5187_v56, %v5322_v26  ;;  %v1059_v30 = vmul.f32 %v5189_v31, %v5254_v10  ;;  %v5363_v52 = vsel %vm360_vm0, %v1137_v1, %v7208_v3 }
  0xcd   :  { %v5350_v55 = vmax.f32 %v746_v57, %v778_v29  ;;  %v5352_v12 = vmax.f32 %v749_v18, %v781_v53  ;;  %v743_v4 = vadd.f32 %v5151_v27, %v709_v16  ;;  %v5356_v5 = vadd.f32 %v7332_v48, %v288_v14  ;;  %7333 = vst [vmem:[#allocation23_spill] sm:$0xff] %v5363_v52 }
  0xce   :  { %7328 = vst [vmem:[#allocation11_spill] sm:$0xff] %v5340_v43  ;;  %7329 = vst [vmem:[#allocation20_spill] sm:$0xff] %v5344_v51  ;;  %v638_v39 = vpop.permute.xlu0 %637  ;;  %v644_v2 = vpop.permute.xlu1 %643  ;;  %v7207_v7 = vrot.slane %v5340_v43, 1  ;;  %v7209_v62 = vrot.slane %v5344_v51, 1  ;;  %v1124_v57 = vrot.slane %v5335_v63, 1  ;;  %v7334_v48 = vrot.slane %v5220_v0, 1 }
  0xcf   :  { %7330 = vst [vmem:[#allocation5_spill] sm:$0xff] %v5350_v55  ;;  %7331 = vst [vmem:[#allocation6_spill] sm:$0xff] %v5352_v12  ;;  %v775_v18 = vmul.f32 0.1, %v743_v4  ;;  %v716_v29 = vadd.f32 %v638_v39, %v5146_v33  ;;  %v719_v53 = vadd.f32 %v644_v2, %v5149_v35  ;;  %v881_v14 = vmul.f32 %v5161_v21, %v5352_v12 }
  0xd0   :  { %v878_v16 = vmul.f32 %v5161_v21, %v5350_v55  ;;  %v5377_v1 = vsel %vm360_vm0, %v7334_v48, %v7207_v7  ;;  %v5382_v63 = vsel %vm360_vm0, %v1310_v8, %v7209_v62  ;;  %v1123_v33 = vrot.slane %v1059_v30, 1 }
  0xd1   :  { %v5384_v35 = vmax.f32 %v743_v4, %v775_v18  ;;  %v750_v2 = vadd.f32 %v5151_v27, %v716_v29  ;;  %v753_v39 = vadd.f32 %v5151_v27, %v719_v53  ;;  %961 = vrot.lane.b32.xlu1 %v881_v14, %s4410_s6  ;;  %v5391_v0 = vmul.f32 %v5187_v56, %v5350_v55 }
  0xd2   :  { %955 = vrot.lane.b32.xlu0 %v878_v16, %s4410_s6  ;;  %v211_v48 = vpop.permute.xlu0 %210  ;;  %v227_v7 = vpop.permute.xlu1 %226  ;;  %v1330_v3 = vrot.slane %v1257_v40, 1  ;;  %v5395_v8 = vsel %vm360_vm0, %v1123_v33, %v1124_v57  ;;  %v1261_v53 = vmul.f32 %v5187_v56, %v5352_v12  ;;  %v5407_v40 = vmul.f32 %v5189_v31, %v5324_v46 }
  0xd3   :  { %7335 = vst [vmem:[#allocation13_spill] sm:$0xff] %v5395_v8  ;;  %v782_v30 = vmul.f32 0.1, %v750_v2  ;;  %v785_v4 = vmul.f32 0.1, %v753_v39  ;;  %v284_v18 = vadd.f32 %v211_v48, %v5281_v9  ;;  %v292_v29 = vadd.f32 %v227_v7, %v98_v19 }
  0xd4   :  { %v7211_v14 = vrot.slane %v5391_v0, 1  ;;  %v5403_v62 = vmul.f32 %v5187_v56, %v5384_v35  ;;  %7336 = vst [vmem:[#allocation12_spill] sm:$0xff] %v5407_v40 }
  0xd5   :  { %v5409_v16 = vmax.f32 %v750_v2, %v782_v30  ;;  %v5411_v33 = vmax.f32 %v753_v39, %v785_v4  ;;  %v5414_v9 = vadd.f32 %v4967_v47, %v284_v18  ;;  %v5417_v7 = vadd.f32 %v4972_v49, %v292_v29 }
  0xd6   :  { %1373 = vrot.lane.b32.xlu0 %v5252_v41, %s4410_s6  ;;  %v632_v19 = vpop.permute.xlu0 %631  ;;  %v646_v48 = vpop.permute.xlu1 %645  ;;  %v5424_v32 = vsel %vm360_vm0, %v1330_v3, %v7211_v14  ;;  %v7212_v2 = vrot.slane %v5403_v62, 1  ;;  %v7213_v39 = vrot.slane %v5407_v40, 1  ;;  %v5430_v47 = vmul.f32 %v5189_v31, %v5322_v26 }
  0xd7   :  { %7337 = vst [vmem:[#allocation24_spill] sm:$0xff] %v5409_v16  ;;  %7338 = vst [vmem:[#allocation25_spill] sm:$0xff] %v5411_v33  ;;  %v713_v49 = vadd.f32 %v632_v19, %v5159_v13  ;;  %v720_v30 = vadd.f32 %v646_v48, %v5166_v37  ;;  %v885_v41 = vmul.f32 %v5161_v21, %v5411_v33  ;;  %v7340_v3 = vrot.slane %v5291_v54, 1 }
  0xd8   :  { %7339 = vst [vmem:[#allocation28_spill] sm:$0xff] %v5430_v47  ;;  %v5438_v4 = vmul.f32 %v5187_v56, %v5409_v16  ;;  %v1337_v37 = vrot.slane %v1261_v53, 1  ;;  %v7341_v19 = vrot.slane %v5231_v36, 1  ;;  %v882_v54 = vmul.f32 %v5161_v21, %v5409_v16 }
  0xd9   :  { %v5445_v18 = vsel %vm360_vm0, %v7340_v3, %v7212_v2  ;;  %v747_v29 = vadd.f32 %v5151_v27, %v713_v49  ;;  %v754_v13 = vadd.f32 %v5151_v27, %v720_v30  ;;  %969 = vrot.lane.b32.xlu1 %v885_v41, %s4410_s6  ;;  %v1265_v49 = vmul.f32 %v5187_v56, %v5411_v33 }
  0xda   :  { %v5455_v48 = vsel %vm360_vm0, %v7341_v19, %v7213_v39  ;;  %v652_v14 = vpop.permute.xlu0 %651  ;;  %v640_v8 = vpop.permute.xlu1 %639  ;;  %v7216_v3 = vrot.slane %v5438_v4, 1  ;;  %v7215_v30 = vrot.slane %v5430_v47, 1  ;;  %v1075_v40 = vmul.f32 %v5189_v31, %v5352_v12 }
  0xdb   :  { %7342 = vst [vmem:[#allocation29_spill] sm:$0xff] %v5455_v48  ;;  %v779_v53 = vmul.f32 0.1, %v747_v29  ;;  %v786_v41 = vmul.f32 0.1, %v754_v13  ;;  %v723_v2 = vadd.f32 %v652_v14, %v5169_v38  ;;  %v717_v36 = vadd.f32 %v640_v8, %v5200_v59 }
  0xdc   :  { %v5468_v19 = vsel %vm360_vm0, %v1337_v37, %v7216_v3  ;;  %v5473_v39 = vsel %vm360_vm0, %v1124_v57, %v7215_v30  ;;  %v5479_v48 = vmul.f32 %v5189_v31, %v5409_v16 }
  0xdd   :  { %7343 = vst [vmem:[#allocation30_spill] sm:$0xff] %v5473_v39  ;;  %v5481_v38 = vmax.f32 %v747_v29, %v779_v53  ;;  %v5483_v59 = vmax.f32 %v754_v13, %v786_v41  ;;  %v757_v8 = vadd.f32 %v5151_v27, %v723_v2  ;;  %v751_v14 = vadd.f32 %v5151_v27, %v717_v36 }
  0xde   :  { %963 = vrot.lane.b32.xlu1 %v882_v54, %s4410_s6  ;;  %v654_v37 = vpop.permute.xlu0 %653  ;;  %v660_v57 = vpop.permute.xlu1 %659  ;;  %v1151_v13 = vrot.slane %v1075_v40, 1  ;;  %v7346_v40 = vrot.slane %v5479_v48, 1 }
  0xdf   :  { %7344 = vst [vmem:[#allocation31_spill] sm:$0xff] %v5483_v59  ;;  %v789_v3 = vmul.f32 0.1, %v757_v8  ;;  %v783_v47 = vmul.f32 0.1, %v751_v14  ;;  %v724_v12 = vadd.f32 %v654_v37, %v5203_v50  ;;  %v727_v16 = vadd.f32 %v660_v57, %v5227_v42 }
  0xe0   :  { %v5493_v29 = vmul.f32 %v5187_v56, %v5483_v59  ;;  %v5497_v2 = vmul.f32 %v5187_v56, %v5481_v38  ;;  %v1344_v50 = vrot.slane %v1265_v49, 1 }
  0xe1   :  { %v5499_v54 = vmax.f32 %v757_v8, %v789_v3  ;;  %v758_v53 = vadd.f32 %v5151_v27, %v724_v12  ;;  %v761_v41 = vadd.f32 %v5151_v27, %v727_v16  ;;  %v5505_v42 = vmax.f32 %v751_v14, %v783_v47 }
  0xe2   :  { %1381 = vrot.lane.b32.xlu1 %v5317_v44, %s4410_s6  ;;  %v662_v36 = vpop.permute.xlu0 %661  ;;  %v656_v37 = vpop.permute.xlu1 %655  ;;  %v7221_v57 = vrot.slane %v5493_v29, 1  ;;  %v7220_v30 = vrot.slane %v5497_v2, 1  ;;  %v5512_v3 = vsel %vm360_vm0, %v1151_v13, %v7346_v40  ;;  %v7348_v14 = vrot.slane %v5391_v0, 1 }
  0xe3   :  { %7345 = vst [vmem:[#allocation32_spill] sm:$0xff] %v5499_v54  ;;  %7347 = vst [vmem:[#allocation33_spill] sm:$0xff] %v5512_v3  ;;  %v790_v12 = vmul.f32 0.1, %v758_v53  ;;  %v793_v8 = vmul.f32 0.1, %v761_v41  ;;  %v728_v16 = vadd.f32 %v662_v36, %v5274_v28  ;;  %v725_v44 = vadd.f32 %v656_v37, %v5356_v5 }
  0xe4   :  { %v889_v47 = vmul.f32 %v5161_v21, %v5499_v54  ;;  %v5521_v49 = vsel %vm360_vm0, %v1344_v50, %v7221_v57  ;;  %v5528_v13 = vsel %vm360_vm0, %v7348_v14, %v7220_v30  ;;  %v1269_v0 = vmul.f32 %v5187_v56, %v5499_v54 }
  0xe5   :  { %v5530_v40 = vmax.f32 %v758_v53, %v790_v12  ;;  %v5532_v28 = vmax.f32 %v761_v41, %v793_v8  ;;  %v762_v5 = vadd.f32 %v5151_v27, %v728_v16  ;;  %v759_v36 = vadd.f32 %v5151_v27, %v725_v44 }
  0xe6   :  { %1365 = vrot.lane.b32.xlu1 %v5320_v15, %s4410_s6  ;;  %977 = vrot.lane.b32.xlu0 %v889_v47, %s4410_s6  ;;  %v648_v50 = vpop.permute.xlu0 %647  ;;  %v664_v37 = vpop.permute.xlu1 %663  ;;  %v5543_v53 = vmul.f32 %v5187_v56, %v5505_v42 }
  0xe7   :  { %7349 = vst [vmem:[#allocation34_spill] sm:$0xff] %v5530_v40  ;;  %v794_v41 = vmul.f32 0.1, %v762_v5  ;;  %v791_v12 = vmul.f32 0.1, %v759_v36  ;;  %v721_v8 = vadd.f32 %v648_v50, %v5414_v9  ;;  %v729_v16 = vadd.f32 %v664_v37, %v5417_v7 }
  0xe8   :  { %v893_v15 = vmul.f32 %v5161_v21, %v5532_v28  ;;  %v1270_v44 = vmul.f32 %v5187_v56, %v5530_v40  ;;  %v7222_v47 = vrot.slane %v5543_v53, 1  ;;  %v1351_v50 = vrot.slane %v1269_v0, 1 }
  0xe9   :  { %v5552_v14 = vmax.f32 %v762_v5, %v794_v41  ;;  %v5554_v30 = vmax.f32 %v759_v36, %v791_v12  ;;  %v755_v57 = vadd.f32 %v5151_v27, %v721_v8  ;;  %v763_v3 = vadd.f32 %v5151_v27, %v729_v16 }
  0xea   :  { %1375 = vrot.lane.b32.xlu1 %v5377_v1, %s4410_s6  ;;  %985 = vrot.lane.b32.xlu0 %v893_v15, %s4410_s6  ;;  %v181_v9 = vpop.permute.xlu0 %180  ;;  %v189_v7 = vpop.permute.xlu1 %188  ;;  %v1352_v37 = vrot.slane %v1270_v44, 1  ;;  %v7350_v5 = vrot.slane %v5438_v4, 1  ;;  %v1273_v41 = vmul.f32 %v5187_v56, %v5532_v28  ;;  %v890_v1 = vmul.f32 %v5161_v21, %v5530_v40 }
  0xeb   :  { %v787_v12 = vmul.f32 0.1, %v755_v57  ;;  %v795_v8 = vmul.f32 0.1, %v763_v3  ;;  %v5577_v0 = vmul.f32 %v5187_v56, %v5554_v30  ;;  %v1274_v4 = vmul.f32 %v5187_v56, %v5552_v14 }
  0xec   :  { %v5566_v36 = vsel %vm360_vm0, %v7350_v5, %v7222_v47  ;;  %v5573_v16 = vsel %vm360_vm0, %v1351_v50, %v1352_v37  ;;  %v1071_v5 = vmul.f32 %v5189_v31, %v5297_v11  ;;  %v5590_v50 = vmul.f32 %v5189_v31, %v5350_v55 }
  0xed   :  { %7351 = vst [vmem:[#allocation35_spill] sm:$0xff] %v5577_v0  ;;  %v5581_v15 = vmax.f32 %v755_v57, %v787_v12  ;;  %v5583_v44 = vmax.f32 %v763_v3, %v795_v8  ;;  %v1359_v12 = vrot.slane %v1274_v4, 1  ;;  %v1358_v3 = vrot.slane %v1273_v41, 1  ;;  %v4392_v57 = vld [vmem:[%s7170_s1 + $0x18] sm:$0xf] }
  0xee   :  { %979 = vrot.lane.b32.xlu1 %v890_v1, %s4410_s6  ;;  %1367 = vrot.lane.b32.xlu0 %v5382_v63, %s4410_s6  ;;  %v5594_v47 = vpop.permute.xlu0 %172  ;;  %v197_v39 = vpop.permute.xlu1 %196  ;;  %v5599_v8 = vmul.f32 %v5189_v31, %v5384_v35  ;;  %v4390_v1 = vld [vmem:[%s7170_s1 + $0x38] sm:$0xf]  ;;  %v7353_v45 = vrot.slane %v5577_v0, 1  ;;  %v1144_v24 = vrot.slane %v1071_v5, 1  ;;  %v1145_v51 = vrot.slane %v5590_v50, 1 }
  0xef   :  { %v75_v55 = vmul.f32 %v4390_v1, %v5071_v22  ;;  %v4391_v63 = vld [vmem:[%s7170_s1 + $0x58] sm:$0xf]  ;;  %v5611_v4 = vmul.f32 %v5187_v56, %v5583_v44  ;;  %v5615_v41 = vmul.f32 %v5187_v56, %v5581_v15  ;;  %v5621_v1 = vmul.f32 %v4392_v57, %v5071_v22 }
  0xf0   :  { %7352 = vst [vmem:[#allocation36_spill] sm:$0xff] %v5599_v8  ;;  %v79_v11 = vmul.f32 %v4391_v63, %v5071_v22  ;;  %v83_v63 = vmul.f32 %v4393_v25, %v5071_v22  ;;  %v5630_v10 = vsel %vm360_vm0, %v1352_v37, %v7353_v45  ;;  %v5633_v52 = vsel %vm360_vm0, %v1358_v3, %v1359_v12  ;;  %v4394_v57 = vld [vmem:[%s7170_s1 + $0x98] sm:$0xf] }
  0xf1   :  { %v87_v20 = vmul.f32 %v4394_v57, %v5071_v22  ;;  %v91_v25 = vmul.f32 %v5071_v22, %v4924_v60  ;;  %v7234_v61 = vrot.slane %v5611_v4, 1  ;;  %v7233_v57 = vrot.slane %v5599_v8, 1 }
  0xf2   :  { %1397 = vrot.lane.b32.xlu1 %v5468_v19, %s4410_s6  ;;  %1389 = vrot.lane.b32.xlu0 %v5424_v32, %s4410_s6  ;;  %v205_v37 = vpop.permute.xlu0 %204  ;;  %v213_v3 = vpop.permute.xlu1 %212  ;;  %v95_v19 = vmul.f32 %v5071_v22, %v4870_v17  ;;  %v273_v43 = vadd.f32 %v189_v7, %v79_v11  ;;  %v894_v60 = vmul.f32 %v5161_v21, %v5552_v14  ;;  %v7354_v32 = vrot.slane %v5615_v41, 1 }
  0xf3   :  { %v5656_v45 = vsel %vm360_vm0, %v1359_v12, %v7234_v61  ;;  %v7355_v0 = vrot.slane %v5493_v29, 1  ;;  %v5666_v5 = vsel %vm360_vm0, %v1144_v24, %v1145_v51  ;;  %v7356_v11 = vrot.slane %v5306_v6, 1 }
  0xf4   :  { %v1079_v50 = vmul.f32 %v5189_v31, %v5411_v33  ;;  %v5679_v12 = vmul.f32 %v5189_v31, %v5483_v59  ;;  %v269_v29 = vadd.f32 %v181_v9, %v75_v55  ;;  %v886_v24 = vmul.f32 %v5161_v21, %v5483_v59 }
  0xf5   :  { %v5663_v17 = vsel %vm360_vm0, %v7355_v0, %v7354_v32  ;;  %v5673_v7 = vsel %vm360_vm0, %v7356_v11, %v7233_v57  ;;  %v99_v0 = vmul.f32 %v5071_v22, %v4929_v58  ;;  %v1083_v6 = vmul.f32 %v5189_v31, %v5499_v54  ;;  %v7358_v58 = vld [vmem:[#allocation15_spill] sm:$0xff] }
  0xf6   :  { %987 = vrot.lane.b32.xlu1 %v894_v60, %s4410_s6  ;;  %1383 = vrot.lane.b32.xlu0 %v5445_v18, %s4410_s6  ;;  %v618_v32 = vpop.permute.xlu0 %617  ;;  %v221_v11 = vpop.permute.xlu1 %220  ;;  %v1158_v57 = vrot.slane %v1079_v50, 1  ;;  %v1159_v61 = vrot.slane %v5679_v12, 1  ;;  %v1084_v55 = vmul.f32 %v5189_v31, %v5530_v40  ;;  %v5695_v9 = vmul.f32 %v5189_v31, %v5481_v38 }
  0xf7   :  { %v277_v60 = vadd.f32 %v197_v39, %v83_v63  ;;  %v7359_v22 = vrot.slane %v7358_v58, 1  ;;  %v1165_v59 = vrot.slane %v1083_v6, 1  ;;  %v5701_v18 = vmul.f32 %v5189_v31, %v5554_v30 }
  0xf8   :  { %7357 = vst [vmem:[#allocation37_spill] sm:$0xff] %v5695_v9  ;;  %v5704_v50 = vsel %vm360_vm0, %v1158_v57, %v1159_v61  ;;  %v1166_v12 = vrot.slane %v1084_v55, 1  ;;  %v7240_v54 = vrot.slane %v5695_v9, 1  ;;  %v5709_v40 = vmul.f32 %v5189_v31, %v5505_v42 }
  0xf9   :  { %v460_v8 = vadd.f32 %v7359_v22, %v273_v43  ;;  %v281_v33 = vadd.f32 %v205_v37, %v87_v20  ;;  %v7360_v39 = vrot.slane %v5193_v34, 1  ;;  %v7242_v43 = vrot.slane %v5701_v18, 1  ;;  %v7362_v22 = vld [vmem:[#allocation17_spill] sm:$0xff] }
  0xfa   :  { %1405 = vrot.lane.b32.xlu1 %v5521_v49, %s4410_s6  ;;  %v1088_v57 = vmul.f32 %v5189_v31, %v5552_v14  ;;  %971 = vrot.lane.b32.xlu0 %v886_v24, %s4410_s6  ;;  %v626_v6 = vpop.permute.xlu0 %625  ;;  %v229_v55 = vpop.permute.xlu1 %228  ;;  %v5720_v58 = vsel %vm360_vm0, %v1165_v59, %v1166_v12  ;;  %v5725_v34 = vsel %vm360_vm0, %v1145_v51, %v7240_v54  ;;  %v7243_v20 = vrot.slane %v5709_v40, 1 }
  0xfb   :  { %v456_v63 = vadd.f32 %v7360_v39, %v269_v29  ;;  %7361 = vst [vmem:[#allocation15_spill] sm:$0xff] %v5720_v58  ;;  %v5730_v49 = vmul.f32 %v5189_v31, %v5583_v44  ;;  %v285_v37 = vadd.f32 %v213_v3, %v91_v25  ;;  %v710_v29 = vadd.f32 %v626_v6, %v460_v8  ;;  %v7365_v3 = vld [vmem:[#allocation21_spill] sm:$0xff] }
  0xfc   :  { %v7363_v24 = vrot.slane %v7362_v22, 1  ;;  %v5737_v59 = vsel %vm360_vm0, %v1166_v12, %v7242_v43  ;;  %v7364_v51 = vrot.slane %v5479_v48, 1  ;;  %v1173_v58 = vrot.slane %v1088_v57, 1 }
  0xfd   :  { %v7244_v9 = vrot.slane %v5730_v49, 1  ;;  %v1087_v8 = vmul.f32 %v5189_v31, %v5532_v28  ;;  %v744_v25 = vadd.f32 %v5151_v27, %v710_v29  ;;  %v289_v6 = vadd.f32 %v221_v11, %v95_v19 }
  0xfe   :  { %v464_v39 = vadd.f32 %v7363_v24, %v277_v60  ;;  %v5744_v54 = vsel %vm360_vm0, %v7364_v51, %v7243_v20  ;;  %1413 = vrot.lane.b32.xlu1 %v5573_v16, %s4410_s6  ;;  %v7366_v60 = vrot.slane %v7365_v3, 1  ;;  %1391 = vrot.lane.b32.xlu0 %v5528_v13, %s4410_s6  ;;  %v610_v48 = vpop.permute.xlu0 %609  ;;  %v634_v22 = vpop.permute.xlu1 %633  ;;  %v5763_v29 = vmul.f32 %v5189_v31, %v5581_v15 }
  0xff   :  { %v5759_v57 = vsel %vm360_vm0, %v1173_v58, %v7244_v9  ;;  %v1172_v24 = vrot.slane %v1087_v8, 1  ;;  %v776_v16 = vmul.f32 0.1, %v744_v25  ;;  %v293_v51 = vadd.f32 %v229_v55, %v99_v0 }
 0x100   :  { %v468_v12 = vadd.f32 %v7366_v60, %v281_v33  ;;  %v714_v3 = vadd.f32 %v634_v22, %v464_v39  ;;  %v7367_v33 = vld [vmem:[#allocation26_spill] sm:$0xff]  ;;  %v265_v13 = vadd.f32 %v5594_v47, %v5621_v1  ;;  %v706_v60 = vadd.f32 %v618_v32, %v456_v63 }
 0x101   :  { %v7368_v19 = vrot.slane %v7367_v33, 1  ;;  %v5770_v43 = vsel %vm360_vm0, %v1172_v24, %v1173_v58  ;;  %v7247_v20 = vrot.slane %v5763_v29, 1  ;;  %v5773_v8 = vmax.f32 %v744_v25, %v776_v16  ;;  %v7371_v25 = vld [vmem:[#allocation27_spill] sm:$0xff] }
 0x102   :  { %v748_v9 = vadd.f32 %v5151_v27, %v714_v3  ;;  %1415 = vrot.lane.b32.xlu1 %v5630_v10, %s4410_s6  ;;  %1399 = vrot.lane.b32.xlu0 %v5566_v36, %s4410_s6  ;;  %v642_v0 = vpop.permute.xlu0 %641  ;;  %v650_v55 = vpop.permute.xlu1 %649  ;;  %v7372_v22 = vrot.slane %v7371_v25, 1  ;;  %v740_v10 = vadd.f32 %v5151_v27, %v706_v60  ;;  %v7373_v36 = vrot.slane %v5185_v23, 1  ;;  %v4335_v25 = vld [vmem:[%s7171_s2 + $0xd0] sm:$0xff]  }
 0x103   :  { %v472_v11 = vadd.f32 %v7368_v19, %v285_v37  ;;  %v7369_v37 = vld [vmem:[#allocation22_spill] sm:$0xff]  ;;  %v5785_v32 = vsel %vm360_vm0, %v1159_v61, %v7247_v20  ;;  %v718_v58 = vadd.f32 %v642_v0, %v468_v12  ;;  %v5794_v3 = vmul.f32 %v5187_v56, %v5773_v8 }
 0x104   :  { %v7370_v47 = vrot.slane %v7369_v37, 1  ;;  %v780_v63 = vmul.f32 0.1, %v748_v9  ;;  %v480_v24 = vadd.f32 %v7372_v22, %v293_v51  ;;  %v452_v16 = vadd.f32 %v7373_v36, %v265_v13 }
 0x105   :  { %v722_v39 = vadd.f32 %v650_v55, %v472_v11  ;;  %v752_v61 = vadd.f32 %v5151_v27, %v718_v58  ;;  %v875_v23 = vmul.f32 %v5161_v21, %v5384_v35  ;;  %v1328_v19 = vrot.slane %v5794_v3, 1 }
 0x106   :  { %v476_v1 = vadd.f32 %v7370_v47, %v289_v6  ;;  %v5796_v6 = vmax.f32 %v748_v9, %v780_v63  ;;  %1423 = vrot.lane.b32.xlu1 %v5656_v45, %s4410_s6  ;;  %1421 = vrot.lane.b32.xlu0 %v5633_v52, %s4410_s6  ;;  %v658_v12 = vpop.permute.xlu0 %657  ;;  %v666_v51 = vpop.permute.xlu1 %665  ;;  %v772_v0 = vmul.f32 0.1, %v740_v10  ;;  %v702_v55 = vadd.f32 %v610_v48, %v452_v16  ;;  %v4334_v47 = vld [vmem:[%s7171_s2] sm:$0xff]  }
 0x107   :  { %v756_v33 = vadd.f32 %v5151_v27, %v722_v39  ;;  %v784_v11 = vmul.f32 0.1, %v752_v61  ;;  %v730_v60 = vadd.f32 %v666_v51, %v480_v24  ;;  %v7374_v52 = vrot.slane %v5403_v62, 1 }
 0x108   :  { %v726_v13 = vadd.f32 %v658_v12, %v476_v1  ;;  %v5809_v37 = vmul.f32 %v5187_v56, %v5796_v6  ;;  %v879_v62 = vmul.f32 %v5161_v21, %v5481_v38  ;;  %v871_v12 = vmul.f32 %v5161_v21, %v5324_v46 }
 0x109   :  { %v788_v9 = vmul.f32 0.1, %v756_v33  ;;  %v5816_v45 = vsel %vm360_vm0, %v7374_v52, %v1328_v19  ;;  %v5821_v63 = vmax.f32 %v752_v61, %v784_v11  ;;  %v764_v58 = vadd.f32 %v5151_v27, %v730_v60  ;;  %v4336_v11 = vld [vmem:[%s7171_s2 + $0x8] sm:$0x1f]   ;;  %v4337_v60 = vld [vmem:[%s7171_s2 + $0xd8] sm:$0x1f]  }
 0x10a   :  { %v760_v48 = vadd.f32 %v5151_v27, %v726_v13  ;;  %949 = vrot.lane.b32.xlu1 %v875_v23, %s4410_s6  ;;  %1407 = vrot.lane.b32.xlu0 %v5663_v17, %s4410_s6  ;;  %v1335_v39 = vrot.slane %v5809_v37, 1  ;;  %v7245_v17 = vmov 0.0   ;;  %v5846_v61 = vmax.f32 %v740_v10, %v772_v0 }
 0x10b   :  { %v5823_v1 = vmax.f32 %v756_v33, %v788_v9  ;;  %v796_v24 = vmul.f32 0.1, %v764_v58  ;;  %v5842_v16 = vmul.f32 %v5187_v56, %v5821_v63  ;;  %4024 = vmatprep.subr.bf16.mxu1 %v7245_v17  ;;  %4128 = vmatprep.subr.bf16.mxu0 %v7245_v17  ;;  %v736_v33 = vadd.f32 %v5151_v27, %v702_v55 }
 0x10c   :  { %v792_v22 = vmul.f32 0.1, %v760_v48  ;;  %v7375_v51 = vrot.slane %v5497_v2, 1  ;;  %4025 = vmatpush3.bf16.msra.mxu1 %v4334_v47  ;;  %v887_v2 = vmul.f32 %v5161_v21, %v5581_v15  ;;  %4129 = vmatpush3.bf16.msra.mxu0 %v4335_v25  ;;  %v7377_v0 = vrot.slane %v5615_v41, 1 }
 0x10d   :  { %v5838_v36 = vmul.f32 %v5187_v56, %v5823_v1  ;;  %v5861_v10 = vmax.f32 %v764_v58, %v796_v24  ;;  %v7249_v13 = vrot.slane %v5842_v16, 1  ;;  %4026 = vmatprep.subr.bf16.mxu1 %v7245_v17  ;;  %v7378_v47 = vrot.slane %v5543_v53, 1  ;;  %4028 = vmatprep.mubr.msk.bf16.mxu1 %vm4412_vm2, %v7245_v17 }
 0x10e   :  { %v1336_v23 = vsel %vm360_vm0, %v7375_v51, %v1335_v39  ;;  %v5859_v9 = vmax.f32 %v760_v48, %v792_v22  ;;  %957 = vrot.lane.b32.xlu1 %v879_v62, %s4410_s6  ;;  %941 = vrot.lane.b32.xlu0 %v871_v12, %s4410_s6  ;;  %v867_v41 = vmul.f32 %v5161_v21, %v5322_v26  ;;  %v1665_v62 = vsel %vm1663_vm1, %v4336_v11, 0 }
 0x10f   :  { %7376 = vst [vmem:[#allocation17_spill] sm:$0xff] %v5861_v10  ;;  %v1349_v27 = vrot.slane %v5838_v36, 1  ;;  %v5880_v52 = vmul.f32 %v5187_v56, %v5861_v10  ;;  %v1343_v48 = vsel %vm360_vm0, %v7378_v47, %v7249_v13  ;;  %4130 = vmatprep.subr.bf16.mxu0 %v7245_v17  ;;  %4132 = vmatprep.mubr.msk.bf16.mxu0 %vm4412_vm2, %v7245_v17  ;;  %v768_v53 = vmul.f32 0.1, %v736_v33 }
 0x110   :  { %v5889_v58 = vmul.f32 %v5187_v56, %v5859_v9  ;;  %v5902_v25 = vmul.f32 %v5187_v56, %v5846_v61  ;;  %4027 = vmatpush3.bf16.msra.mxu1 %v1665_v62  ;;  %v2697_v12 = vsel %vm1663_vm1, %v4337_v60, 0  ;;  %v891_v51 = vmul.f32 %v5161_v21, %v5554_v30 }
 0x111   :  { %v1350_v55 = vsel %vm360_vm0, %v7377_v0, %v1349_v27  ;;  %v7250_v22 = vrot.slane %v5880_v52, 1  ;;  %4032 = vmatprep.subr.bf16.mxu1 %v7245_v17  ;;  %v7379_v11 = vrot.slane %v5611_v4, 1  ;;  %v7380_v0 = vld [vmem:[#allocation35_spill] sm:$0xff]  ;;  %4131 = vmatpush3.bf16.msra.mxu0 %v2697_v12  ;;  %v883_v60 = vmul.f32 %v5161_v21, %v5505_v42 }
 0x112   :  { %973 = vrot.lane.b32.xlu1 %v887_v2, %s4410_s6  ;;  %v7248_v24 = vrot.slane %v5889_v58, 1  ;;  %933 = vrot.lane.b32.xlu0 %v867_v41, %s4410_s6  ;;  %v7381_v47 = vrot.slane %v7380_v0, 1  ;;  %v5924_v41 = vmax.f32 %v736_v33, %v768_v53  ;;  %v1321_v4 = vrot.slane %v5902_v25, 1  ;;  %v7382_v12 = vld [vmem:[#allocation11_spill] sm:$0xff] }
 0x113   :  { %v1364_v2 = vsel %vm360_vm0, %v7379_v11, %v7250_v22  ;;  %4136 = vmatprep.subr.bf16.mxu0 %v7245_v17  ;;  %v895_v11 = vmul.f32 %v5161_v21, %v5583_v44  ;;  %v7383_v0 = vrot.slane %v7382_v12, 1  ;;  %v5941_v25 = vstv %s3760_s12  ;;  %v7387_v12 = vld [vmem:[#allocation7_spill] sm:$0xff] }
 0x114   :  { %v1357_v62 = vsel %vm360_vm0, %v7381_v47, %v7248_v24  ;;  %v1248_v33 = vmul.f32 %v5187_v56, %v5924_v41  ;;  %7384 = vst [vmem:[#allocation21_spill] sm:$0xff] %v5941_v25  ;;  %v835_v56 = vmul.f32 %v5941_v25, %v7387_v12  ;;  %v7402_v36 = vrot.slane %v5842_v16, 1 }
 0x115   :  { %v1322_v47 = vsel %vm360_vm0, %v7383_v0, %v1321_v4 }
 0x116   :  { %981 = vrot.lane.b32.xlu1 %v891_v51, %s4410_s6  ;;  %965 = vrot.lane.b32.xlu0 %v883_v60, %s4410_s6  ;;  %v1314_v53 = vrot.slane %v1248_v33, 1  ;;  %v7385_v51 = vld [vmem:[#allocation20_spill] sm:$0xff] }
 0x117   :  { %v7386_v60 = vrot.slane %v7385_v51, 1  ;;  %v7389_v33 = vld [vmem:[#allocation8_spill] sm:$0xff] }
 0x118   :  { %v839_v51 = vmul.f32 %v5941_v25, %v7389_v33 }
 0x11a   :  { %989 = vrot.lane.b32.xlu1 %v895_v11, %s4410_s6  ;;  %1377 = vrot.lane.b32.xlu0 %v1322_v47, %s4410_s6  ;;  %v1315_v11 = vsel %vm360_vm0, %v7386_v60, %v1314_v53 }
 0x11e   :  { %1393 = vrot.lane.b32.xlu1 %v1336_v23, %s4410_s6  ;;  %1385 = vrot.lane.b32.xlu0 %v5816_v45, %s4410_s6  ;;  %v7388_v45 = vld [vmem:[#allocation16_spill] sm:$0xff] }
 0x122   :  { %1409 = vrot.lane.b32.xlu1 %v1350_v55, %s4410_s6  ;;  %1369 = vrot.lane.b32.xlu0 %v1315_v11, %s4410_s6  ;;  %v876_v55 = vmul.f32 %v5161_v21, %v5773_v8  ;;  %v880_v11 = vmul.f32 %v5161_v21, %v5796_v6 }
 0x123   :  { %v938_v0 = vpop.permute.xlu0 %937 }
 0x124   :  { %v1029_v47 = vadd.f32 %v938_v0, %v835_v56  ;;  %v868_v0 = vmul.f32 %v5161_v21, %v5924_v41 }
 0x126   :  { %1425 = vrot.lane.b32.xlu1 %v1364_v2, %s4410_s6  ;;  %1401 = vrot.lane.b32.xlu0 %v1343_v48, %s4410_s6  ;;  %v1215_v23 = vadd.f32 %v7388_v45, %v1029_v47  ;;  %v872_v48 = vmul.f32 %v5161_v21, %v5846_v61  ;;  %v7390_v2 = vld [vmem:[#allocation23_spill] sm:$0xff]  ;;  %v7391_v47 = vld [vmem:[#allocation9_spill] sm:$0xff] }
 0x127   :  { %v831_v45 = vmul.f32 %v5941_v25, %v7391_v47  ;;  %v7394_v47 = vld [vmem:[#allocation13_spill] sm:$0xff] }
 0x12a   :  { %951 = vrot.lane.b32.xlu1 %v876_v55, %s4410_s6  ;;  %1417 = vrot.lane.b32.xlu0 %v1357_v62, %s4410_s6  ;;  %v888_v62 = vmul.f32 %v5161_v21, %v5823_v1  ;;  %v892_v55 = vmul.f32 %v5161_v21, %v5859_v9 }
 0x12b   :  { %v946_v60 = vpop.permute.xlu1 %945 }
 0x12c   :  { %v1033_v12 = vadd.f32 %v946_v60, %v839_v51  ;;  %v884_v51 = vmul.f32 %v5161_v21, %v5821_v63 }
 0x12e   :  { %959 = vrot.lane.b32.xlu1 %v880_v11, %s4410_s6  ;;  %943 = vrot.lane.b32.xlu0 %v872_v48, %s4410_s6  ;;  %v5966_v56 = vadd.f32 %v7390_v2, %v1033_v12  ;;  %v7392_v11 = vld [vmem:[#allocation10_spill] sm:$0xff] }
 0x12f   :  { %v832_v12 = vmul.f32 %v5941_v25, %v7392_v11  ;;  %v7393_v2 = vld [vmem:[#allocation14_spill] sm:$0xff] }
 0x132   :  { %975 = vrot.lane.b32.xlu1 %v888_v62, %s4410_s6  ;;  %935 = vrot.lane.b32.xlu0 %v868_v0, %s4410_s6  ;;  %v836_v62 = vmul.f32 %v5941_v25, %v7393_v2  ;;  %v896_v0 = vmul.f32 %v5161_v21, %v5861_v10  ;;  %v7397_v2 = vld [vmem:[#allocation18_spill] sm:$0xff]  ;;  %v7398_v21 = vld [vmem:[#allocation29_spill] sm:$0xff] }
 0x133   :  { %v840_v13 = vmul.f32 %v5941_v25, %v7397_v2 }
 0x134   :  { %v930_v33 = vpop.permute.xlu0 %929 }
 0x135   :  { %v1025_v60 = vadd.f32 %v930_v33, %v831_v45 }
 0x136   :  { %983 = vrot.lane.b32.xlu1 %v892_v55, %s4410_s6  ;;  %967 = vrot.lane.b32.xlu0 %v884_v51, %s4410_s6  ;;  %v7395_v55 = vld [vmem:[#allocation30_spill] sm:$0xff]  ;;  %v7396_v51 = vld [vmem:[#allocation19_spill] sm:$0xff] }
 0x137   :  { %v932_v48 = vpop.permute.xlu1 %931  ;;  %v5989_v17 = vadd.f32 %v7394_v47, %v1025_v60  ;;  %v843_v11 = vmul.f32 %v5941_v25, %v7396_v51  ;;  %v7405_v51 = vld [vmem:[#allocation25_spill] sm:$0xff] }
 0x138   :  { %v1026_v20 = vadd.f32 %v932_v48, %v832_v12  ;;  %v940_v24 = vpop.permute.xlu0 %939 }
 0x139   :  { %v1030_v45 = vadd.f32 %v940_v24, %v836_v62  ;;  %v7400_v62 = vld [vmem:[#allocation5_spill] sm:$0xff] }
 0x13a   :  { %991 = vrot.lane.b32.xlu1 %v896_v0, %s4410_s6  ;;  %1379 = vrot.lane.b32.xlu0 %v1321_v4, %s4410_s6  ;;  %v5994_v33 = vadd.f32 %v7395_v55, %v1026_v20  ;;  %v844_v3 = vmul.f32 %v5941_v25, %v7400_v62  ;;  %v7404_v55 = vrot.slane %v5889_v58, 1  ;;  %v7408_v58 = vld [vmem:[#allocation34_spill] sm:$0xff] }
 0x13b   :  { %v6001_v22 = vadd.f32 %v7398_v21, %v1030_v45  ;;  %v6040_v21 = vstv %s3764_s13 }
 0x13c   :  { %v954_v60 = vpop.permute.xlu1 %953  ;;  %v948_v12 = vpop.permute.xlu0 %947 }
 0x13d   :  { %v1037_v48 = vadd.f32 %v954_v60, %v843_v11  ;;  %v1034_v24 = vadd.f32 %v948_v12, %v840_v13  ;;  %v7399_v13 = vld [vmem:[#allocation6_spill] sm:$0xff]  ;;  %v851_v11 = vmul.f32 %v5941_v25, %v7405_v51  ;;  %v7406_v60 = vld [vmem:[#allocation24_spill] sm:$0xff] }
 0x13e   :  { %1395 = vrot.lane.b32.xlu1 %v1335_v39, %s4410_s6  ;;  %1387 = vrot.lane.b32.xlu0 %v1328_v19, %s4410_s6  ;;  %v847_v37 = vmul.f32 %v5941_v25, %v7399_v13  ;;  %v848_v12 = vmul.f32 %v5941_v25, %v7406_v60  ;;  %v6052_v13 = vmul.f32 %v5941_v25, %v7408_v58 }
 0x13f   :  { %v6010_v20 = vadd.f32 %v5666_v5, %v1037_v48  ;;  %v6013_v4 = vadd.f32 %v5673_v7, %v1034_v24  ;;  %v7401_v7 = vrot.slane %v5880_v52, 1  ;;  %v7407_v48 = vld [vmem:[#allocation32_spill] sm:$0xff]  ;;  %v6048_v24 = vmul.f32 %v5941_v25, %v5532_v28 }
 0x140   :  { %v6068_v28 = vmul.f32 %v5189_v31, %v5796_v6  ;;  %v6129_v58 = vmul.f32 %v5941_v25, %v5505_v42  ;;  %v7426_v42 = vrot.slane %v5763_v29, 1 }
 0x142   :  { %1411 = vrot.lane.b32.xlu1 %v1349_v27, %s4410_s6  ;;  %1371 = vrot.lane.b32.xlu0 %v1314_v53, %s4410_s6  ;;  %v7403_v27 = vld [vmem:[#allocation33_spill] sm:$0xff]  ;;  %7410 = vst [vmem:[#allocation22_spill] sm:$0xff] %v6068_v28 }
 0x143   :  { %v962_v39 = vpop.permute.xlu1 %961 }
 0x144   :  { %v1041_v19 = vadd.f32 %v962_v39, %v847_v37  ;;  %v956_v0 = vpop.permute.xlu0 %955  ;;  %v6059_v37 = vmul.f32 %v5189_v31, %v5846_v61 }
 0x145   :  { %v1038_v5 = vadd.f32 %v956_v0, %v844_v3  ;;  %v6064_v3 = vmul.f32 %v5941_v25, %v5552_v14  ;;  %v7412_v0 = vld [vmem:[#allocation31_spill] sm:$0xff]  ;;  %v6084_v14 = vmul.f32 %v5189_v31, %v5924_v41 }
 0x146   :  { %1427 = vrot.lane.b32.xlu1 %v7401_v7, %s4410_s6  ;;  %1403 = vrot.lane.b32.xlu0 %v7402_v36, %s4410_s6  ;;  %v6030_v53 = vadd.f32 %v7403_v27, %v1041_v19  ;;  %7409 = vst [vmem:[#allocation26_spill] sm:$0xff] %v6059_v37  ;;  %v6072_v19 = vmul.f32 %v5189_v31, %v5773_v8 }
 0x147   :  { %v6033_v47 = vadd.f32 %v5725_v34, %v1038_v5  ;;  %v855_v34 = vmul.f32 %v5941_v25, %v7407_v48  ;;  %v6076_v5 = vmul.f32 %v5941_v25, %v7412_v0  ;;  %v6080_v7 = vmul.f32 %v5189_v31, %v5823_v1  ;;  %7414 = vst [vmem:[#allocation11_spill] sm:$0xff] %v6084_v14 }
 0x148   :  { %v1374_v45 = vpop.permute.xlu0 %1373  ;;  %7411 = vst [vmem:[#allocation27_spill] sm:$0xff] %v6072_v19  ;;  %v6088_v36 = vmul.f32 %v5941_v25, %v5384_v35  ;;  %v6092_v27 = vmul.f32 %v5941_v25, %v5481_v38  ;;  %v7251_v35 = vrot.slane %v6059_v37, 1  ;;  %v6112_v38 = vmul.f32 %v5189_v31, %v5821_v63 }
 0x149   :  { %v1465_v52 = vadd.f32 %v1374_v45, %v1215_v23  ;;  %7413 = vst [vmem:[#allocation35_spill] sm:$0xff] %v6080_v7  ;;  %v6096_v45 = vmul.f32 %v5941_v25, %v5324_v46 }
 0x14a   :  { %1419 = vrot.lane.b32.xlu0 %v7404_v55, %s4410_s6  ;;  %v6100_v55 = vmul.f32 %v5189_v31, %v5861_v10  ;;  %7416 = vst [vmem:[#allocation7_spill] sm:$0xff] %v6112_v38  ;;  %v7428_v10 = vld [vmem:[#allocation28_spill] sm:$0xff] }
 0x14b   :  { %v970_v2 = vpop.permute.xlu1 %969  ;;  %v1499_v39 = vadd.f32 %v6040_v21, %v1465_v52 }
 0x14c   :  { %v1045_v16 = vadd.f32 %v970_v2, %v851_v11  ;;  %7415 = vst [vmem:[#allocation20_spill] sm:$0xff] %v6100_v55  ;;  %v6107_v11 = vmul.f32 %v5941_v25, %v5581_v15  ;;  %v6116_v2 = vmul.f32 %v5941_v25, %v5322_v26  ;;  %v6123_v15 = vmul.f32 %v5941_v25, %v5554_v30 }
 0x14d   :  { %v1531_v52 = vmul.f32 0.1, %v1499_v39  ;;  %v6133_v26 = vmul.f32 %v5941_v25, %v5583_v44  ;;  %v6151_v44 = vmul.f32 %v5941_v25, %v5773_v8  ;;  %v4340_v8 = vld [vmem:[%s7171_s2 + $0x48] sm:$0x1f]   ;;  %v7430_v29 = vrot.slane %v6100_v55, 1 }
 0x14e   :  { %v6055_v23 = vadd.f32 %v5704_v50, %v1045_v16  ;;  %v7252_v16 = vrot.slane %v6068_v28, 1 }
 0x150   :  { %v964_v62 = vpop.permute.xlu1 %963 }
 0x151   :  { %v1042_v50 = vadd.f32 %v964_v62, %v848_v12  ;;  %v1563_v62 = vmax.f32 %v1499_v39, %v1531_v52  ;;  %v6172_v39 = vmul.f32 %v5941_v25, %v5796_v6  ;;  %v7429_v6 = vrot.slane %v7428_v10, 1 }
 0x152   :  { %v6205_v10 = vmul.f32 %v5941_v25, %v5846_v61 }
 0x153   :  { %v6103_v51 = vadd.f32 %v5744_v54, %v1042_v50  ;;  %v7253_v54 = vrot.slane %v6072_v19, 1  ;;  %v7418_v50 = vld [vmem:[#allocation12_spill] sm:$0xff]  ;;  %7424 = vst [vmem:[#allocation8_spill] sm:$0xff] %v6172_v39  ;;  %v1599_v61 = vpack.c.bf16 %v1563_v62, %v1563_v62 }
 0x154   :  { %v1382_v46 = vpop.permute.xlu1 %1381  ;;  %v7419_v0 = vrot.slane %v7418_v50, 1  ;;  %v7422_v50 = vld [vmem:[#allocation36_spill] sm:$0xff]  ;;  %7432 = vst [vmem:[#allocation23_spill] sm:$0xff] %v6205_v10 }
 0x155   :  { %v1469_v60 = vadd.f32 %v1382_v46, %v5966_v56  ;;  %v6138_v56 = vmul.f32 %v5189_v31, %v5859_v9  ;;  %v7420_v31 = vld [vmem:[#allocation37_spill] sm:$0xff] }
 0x156   :  { %v6146_v46 = vsel %vm360_vm0, %v7419_v0, %v7251_v35  ;;  %v7421_v12 = vrot.slane %v7420_v31, 1  ;;  %v7423_v0 = vrot.slane %v7422_v50, 1 }
 0x157   :  { %7417 = vst [vmem:[#allocation16_spill] sm:$0xff] %v6138_v56  ;;  %v1503_v30 = vadd.f32 %v6040_v21, %v1469_v60  ;;  %v7438_v55 = vrot.slane %v6138_v56, 1 }
 0x158   :  { %v1366_v48 = vpop.permute.xlu1 %1365  ;;  %v6158_v60 = vsel %vm360_vm0, %v7421_v12, %v7252_v16  ;;  %v6165_v35 = vsel %vm360_vm0, %v7423_v0, %v7253_v54  ;;  %v978_v12 = vpop.permute.xlu0 %977  ;;  %v7425_v16 = vrot.slane %v6080_v7, 1  ;;  %v4341_v0 = vld [vmem:[%s7171_s2 + $0xe8] sm:$0x1f]   ;;  %v7427_v54 = vrot.slane %v6084_v14, 1 }
 0x159   :  { %v1535_v52 = vmul.f32 0.1, %v1503_v30  ;;  %v1461_v31 = vadd.f32 %v1366_v48, %v5989_v17  ;;  %v4344_v17 = vld [vmem:[%s7171_s2 + $0x58] sm:$0x1f]   ;;  %v1049_v48 = vadd.f32 %v978_v12, %v855_v34  ;;  %v7433_v14 = vrot.slane %v6112_v38, 1 }
 0x15a   :  { %v6180_v50 = vsel %vm360_vm0, %v7426_v42, %v7425_v16  ;;  %v6190_v28 = vsel %vm360_vm0, %v7429_v6, %v7427_v54  ;;  %v7431_v16 = vrot.slane %v5730_v49, 1  ;;  %v7434_v34 = vrot.slane %v5709_v40, 1  ;;  %v4345_v49 = vld [vmem:[%s7171_s2 + $0xf8] sm:$0x1f]  }
 0x15b   :  { %v1567_v54 = vmax.f32 %v1503_v30, %v1535_v52  ;;  %v1495_v6 = vadd.f32 %v6040_v21, %v1461_v31  ;;  %v7436_v30 = vld [vmem:[#allocation15_spill] sm:$0xff]  ;;  %v6226_v31 = vsel %vm1663_vm1, %v4340_v8, 0  ;;  %v6230_v40 = vmul.f32 %v5941_v25, %v5924_v41  ;;  %v4352_v41 = vld [vmem:[%s7171_s2 + $0x68] sm:$0x1f]  }
 0x15c   :  { %v6200_v42 = vsel %vm360_vm0, %v7431_v16, %v7430_v29  ;;  %v6213_v12 = vsel %vm360_vm0, %v7434_v34, %v7433_v14  ;;  %v6220_v29 = vmul.f32 %v5941_v25, %v5823_v1  ;;  %v1376_v16 = vpop.permute.xlu1 %1375  ;;  %v6223_v52 = vadd.f32 %v7436_v30, %v1049_v48  ;;  %v4348_v14 = vld [vmem:[%s7171_s2 + $0x18] sm:$0x1f]   ;;  %v4349_v1 = vld [vmem:[%s7171_s2 + $0x108] sm:$0x1f]   ;;  %v986_v48 = vpop.permute.xlu0 %985 }
 0x15d   :  { %7437 = vst [vmem:[#allocation10_spill] sm:$0xff] %v6230_v40  ;;  %v1527_v62 = vmul.f32 0.1, %v1495_v6  ;;  %v1466_v34 = vadd.f32 %v1376_v16, %v6001_v22  ;;  %v6240_v30 = vsel %vm1663_vm1, %v4341_v0, 0  ;;  %v6243_v8 = vsel %vm1663_vm1, %v4344_v17, 0 }
 0x15e   :  { %7435 = vst [vmem:[#allocation9_spill] sm:$0xff] %v6220_v29  ;;  %v1053_v7 = vadd.f32 %v986_v48, %v6048_v24  ;;  %v7439_v38 = vrot.slane %v5701_v18, 1  ;;  %v6258_v0 = vmul.f32 %v5941_v25, %v5859_v9  ;;  %v6262_v17 = vmul.f32 %v5941_v25, %v5821_v63  ;;  %v4353_v24 = vld [vmem:[%s7171_s2 + $0x118] sm:$0x1f]   ;;  %v4356_v16 = vld [vmem:[%s7171_s2 + $0x28] sm:$0x1f]  }
 0x15f   :  { %v4357_v18 = vld [vmem:[%s7171_s2 + $0x128] sm:$0x1f]   ;;  %v1500_v9 = vadd.f32 %v6040_v21, %v1466_v34  ;;  %v6275_v48 = vsel %vm1663_vm1, %v4345_v49, 0  ;;  %v6277_v63 = vunpack.c.l.b16 %v1599_v61  ;;  %v6293_v34 = vsel %vm1663_vm1, %v4352_v41, 0 }
 0x160   :  { %v6254_v22 = vsel %vm360_vm0, %v7439_v38, %v7438_v55  ;;  %7440 = vst [vmem:[#allocation14_spill] sm:$0xff] %v6258_v0  ;;  %7441 = vst [vmem:[#allocation13_spill] sm:$0xff] %v6262_v17  ;;  %v1600_v55 = vpack.c.bf16 %v1567_v54, %v1567_v54  ;;  %v1559_v38 = vmax.f32 %v1495_v6, %v1527_v62  ;;  %v980_v25 = vpop.permute.xlu1 %979  ;;  %v6283_v17 = vsel %vm1663_vm1, %v4348_v14, 0  ;;  %v4360_v54 = vld [vmem:[%s7171_s2 + $0x78] sm:$0x1f]   ;;  %v1368_v61 = vpop.permute.xlu0 %1367 }
 0x161   :  { %v6280_v56 = vadd.f32 %v5770_v43, %v1053_v7  ;;  %7442 = vst [vmem:[#allocation30_spill] sm:$0xff] %v6283_v17  ;;  %v6286_v0 = vsel %vm1663_vm1, %v4349_v1, 0  ;;  %v1532_v62 = vmul.f32 0.1, %v1500_v9  ;;  %v1050_v49 = vadd.f32 %v980_v25, %v6052_v13  ;;  %7444 = vst [vmem:[#allocation18_spill] sm:$0xff] %v6293_v34 }
 0x162   :  { %7443 = vst [vmem:[#allocation19_spill] sm:$0xff] %v6286_v0  ;;  %v1598_v6 = vpack.c.bf16 %v1559_v38, %v1559_v38  ;;  %v1462_v43 = vadd.f32 %v1368_v61, %v5994_v33  ;;  %v6297_v7 = vsel %vm1663_vm1, %v4353_v24, 0  ;;  %v6300_v14 = vsel %vm1663_vm1, %v4356_v16, 0 }
 0x163   :  { %7445 = vst [vmem:[#allocation29_spill] sm:$0xff] %v6297_v7  ;;  %7446 = vst [vmem:[#allocation6_spill] sm:$0xff] %v6300_v14  ;;  %v6303_v1 = vsel %vm1663_vm1, %v4357_v18, 0  ;;  %v6305_v38 = vunpack.c.l.b16 %v1600_v55  ;;  %v1564_v25 = vmax.f32 %v1500_v9, %v1532_v62  ;;  %v6310_v13 = vadd.f32 %v5737_v59, %v1050_v49 }
 0x164   :  { %7447 = vst [vmem:[#allocation5_spill] sm:$0xff] %v6303_v1  ;;  %v6307_v0 = vunpack.c.l.b16 %v1598_v6  ;;  %v1496_v33 = vadd.f32 %v6040_v21, %v1462_v43  ;;  %v1398_v41 = vpop.permute.xlu1 %1397  ;;  %v1626_v24 = vrot.slane %v6277_v63, 7  ;;  %v1729_v61 = vrot.slane %v6277_v63, 3  ;;  %v1390_v55 = vpop.permute.xlu0 %1389 }
 0x165   :  { %v6316_v16 = vsel %vm1663_vm1, %v4360_v54, 0  ;;  %v1477_v18 = vadd.f32 %v1398_v41, %v6030_v53  ;;  %v1807_v6 = vrot.slane %v6277_v63, 4  ;;  %v1473_v49 = vadd.f32 %v1390_v55, %v6010_v20 }
 0x166   :  { %7448 = vst [vmem:[#allocation33_spill] sm:$0xff] %v6316_v16  ;;  %v1528_v62 = vmul.f32 0.1, %v1496_v33  ;;  %v1728_v43 = vrot.slane %v6307_v0, 4  ;;  %v2249_v14 = vpack.c.bf16 %v1564_v25, %v1564_v25  ;;  %v1629_v16 = vrot.slane %v6305_v38, 6 }
 0x167   :  { %v1511_v54 = vadd.f32 %v6040_v21, %v1477_v18  ;;  %v1731_v53 = vrot.slane %v6305_v38, 2  ;;  %v1507_v7 = vadd.f32 %v6040_v21, %v1473_v49  ;;  %v1809_v59 = vrot.slane %v6305_v38, 3 }
 0x168   :  { %v1560_v41 = vmax.f32 %v1496_v33, %v1528_v62  ;;  %v988_v9 = vpop.permute.xlu1 %987  ;;  %v1880_v34 = vrot.slane %v6305_v38, 7  ;;  %v1384_v40 = vpop.permute.xlu0 %1383  ;;  %v1628_v25 = vsel %vm1627_vm3, %v1626_v24, %v6307_v0  ;;  %v1806_v18 = vrot.slane %v6307_v0, 5 }
 0x169   :  { %v1543_v20 = vmul.f32 0.1, %v1511_v54  ;;  %v1054_v55 = vadd.f32 %v988_v9, %v6064_v3  ;;  %v1539_v29 = vmul.f32 0.1, %v1507_v7  ;;  %v1470_v33 = vadd.f32 %v1384_v40, %v6013_v4 }
 0x16a   :  { %v2248_v1 = vpack.c.bf16 %v1560_v41, %v1560_v41  ;;  %v1730_v62 = vsel %vm1627_vm3, %v1729_v61, %v1728_v43  ;;  %v6337_v49 = vunpack.c.l.b16 %v2249_v14  ;;  %v1878_v3 = vrot.slane %v6307_v0, 1 }
 0x16b   :  { %v1575_v37 = vmax.f32 %v1511_v54, %v1543_v20  ;;  %v6340_v17 = vadd.f32 %v5759_v57, %v1054_v55  ;;  %v1571_v19 = vmax.f32 %v1507_v7, %v1539_v29  ;;  %v1504_v24 = vadd.f32 %v6040_v21, %v1470_v33 }
 0x16c   :  { %v6343_v9 = vunpack.c.l.b16 %v2248_v1  ;;  %v1406_v39 = vpop.permute.xlu1 %1405  ;;  %v972_v40 = vpop.permute.xlu0 %971  ;;  %v1631_v14 = vsel %vm1630_vm4, %v1629_v16, %v1628_v25  ;;  %v1732_v61 = vsel %vm1630_vm4, %v1731_v53, %v1730_v62  ;;  %v1808_v29 = vsel %vm1627_vm3, %v1807_v6, %v1806_v18 }
 0x16d   :  { %v1602_v10 = vpack.c.bf16 %v1575_v37, %v1575_v37  ;;  %v1481_v4 = vadd.f32 %v1406_v39, %v6055_v23  ;;  %v1601_v57 = vpack.c.bf16 %v1571_v19, %v1571_v19  ;;  %v1536_v43 = vmul.f32 0.1, %v1504_v24 }
 0x16e   :  { %v1046_v54 = vadd.f32 %v972_v40, %v6076_v5  ;;  %v2668_v1 = vrot.slane %v6337_v49, 4  ;;  %v2746_v37 = vrot.slane %v6337_v49, 5  ;;  %v1879_v23 = vsel %vm1627_vm3, %v6277_v63, %v1878_v3 }
 0x16f   :  { %v1515_v7 = vadd.f32 %v6040_v21, %v1481_v4  ;;  %v6357_v39 = vunpack.c.l.b16 %v1601_v57  ;;  %v1568_v16 = vmax.f32 %v1504_v24, %v1536_v43  ;;  %v2667_v5 = vrot.slane %v6343_v9, 5 }
 0x170   :  { %v1414_v19 = vpop.permute.xlu1 %1413  ;;  %v6360_v53 = vadd.f32 %v5785_v32, %v1046_v54  ;;  %v6363_v6 = vunpack.c.l.b16 %v1602_v10  ;;  %v1392_v25 = vpop.permute.xlu0 %1391  ;;  %v6367_v18 = vsel %vm1630_vm4, %v1809_v59, %v1808_v29  ;;  %v2745_v62 = vrot.slane %v6343_v9, 6 }
 0x171   :  { %v1547_v20 = vmul.f32 0.1, %v1515_v7  ;;  %v1485_v55 = vadd.f32 %v1414_v19, %v6223_v52  ;;  %v1474_v33 = vadd.f32 %v1392_v25, %v6033_v47  ;;  %v6373_v32 = vsel %vm1630_vm4, %v1880_v34, %v1879_v23 }
 0x172   :  { %v2250_v24 = vpack.c.bf16 %v1568_v16, %v1568_v16  ;;  %v1632_v40 = vrot.slane %v6357_v39, 5  ;;  %v2669_v59 = vsel %vm1627_vm3, %v2668_v1, %v2667_v5  ;;  %v1733_v47 = vrot.slane %v6357_v39, 1 }
 0x173   :  { %v1579_v4 = vmax.f32 %v1515_v7, %v1547_v20  ;;  %v1519_v10 = vadd.f32 %v6040_v21, %v1485_v55  ;;  %v1508_v52 = vadd.f32 %v6040_v21, %v1474_v33  ;;  %v1635_v7 = vrot.slane %v6363_v6, 4 }
 0x174   :  { %v1416_v57 = vpop.permute.xlu1 %1415  ;;  %v1400_v23 = vpop.permute.xlu0 %1399  ;;  %v6385_v20 = vsel %vm1627_vm3, %v2746_v37, %v2745_v62  ;;  %v1811_v55 = vrot.slane %v6357_v39, 2  ;;  %v6388_v1 = vunpack.c.l.b16 %v2250_v24  ;;  %v1634_v33 = vsel %vm1633_vm5, %v1632_v40, %v1631_v14 }
 0x175   :  { %v1603_v54 = vpack.c.bf16 %v1579_v4, %v1579_v4  ;;  %v1551_v29 = vmul.f32 0.1, %v1519_v10  ;;  %v1486_v34 = vadd.f32 %v1416_v57, %v6310_v13  ;;  %v1540_v16 = vmul.f32 0.1, %v1508_v52 }
 0x176   :  { %v1478_v19 = vadd.f32 %v1400_v23, %v6103_v51  ;;  %v1734_v41 = vsel %vm1633_vm5, %v1733_v47, %v1732_v61  ;;  %v1813_v51 = vrot.slane %v6363_v6, 1  ;;  %v1637_v40 = vsel %vm1636_vm6, %v1635_v7, %v1634_v33 }
 0x177   :  { %v1583_v5 = vmax.f32 %v1519_v10, %v1551_v29  ;;  %v1520_v25 = vadd.f32 %v6040_v21, %v1486_v34  ;;  %v1572_v4 = vmax.f32 %v1508_v52, %v1540_v16  ;;  %v6395_v37 = vunpack.c.l.b16 %v1603_v54 }
 0x178   :  { %v1512_v13 = vadd.f32 %v6040_v21, %v1478_v19  ;;  %v1424_v57 = vpop.permute.xlu1 %1423  ;;  %v1422_v10 = vpop.permute.xlu0 %1421  ;;  %v2670_v47 = vrot.slane %v6388_v1, 3 }
 0x179   :  { %v1604_v62 = vpack.c.bf16 %v1583_v5, %v1583_v5  ;;  %v1552_v23 = vmul.f32 0.1, %v1520_v25  ;;  %v1490_v24 = vadd.f32 %v1424_v57, %v6340_v17  ;;  %v2251_v29 = vpack.c.bf16 %v1572_v4, %v1572_v4 }
 0x17a   :  { %v1544_v34 = vmul.f32 0.1, %v1512_v13  ;;  %v1489_v14 = vadd.f32 %v1422_v10, %v6280_v56  ;;  %v1735_v4 = vsel %vm1636_vm6, %v6363_v6, %v1734_v41  ;;  %v1638_v33 = vrot.slane %v6395_v37, 3 }
 0x17b   :  { %v6400_v52 = vunpack.c.l.b16 %v1604_v62  ;;  %v1584_v16 = vmax.f32 %v1520_v25, %v1552_v23  ;;  %v1524_v61 = vadd.f32 %v6040_v21, %v1490_v24  ;;  %v6404_v54 = vunpack.c.l.b16 %v2251_v29 }
 0x17c   :  { %v1576_v19 = vmax.f32 %v1512_v13, %v1544_v34  ;;  %v1523_v17 = vadd.f32 %v6040_v21, %v1489_v14  ;;  %v950_v5 = vpop.permute.xlu1 %949  ;;  %v1408_v7 = vpop.permute.xlu0 %1407  ;;  %v2748_v25 = vrot.slane %v6388_v1, 4  ;;  %v1736_v10 = vrot.slane %v6395_v37, 7 }
 0x17d   :  { %v2254_v56 = vpack.c.bf16 %v1584_v16, %v1584_v16  ;;  %v1556_v57 = vmul.f32 0.1, %v1524_v61  ;;  %v1482_v24 = vadd.f32 %v1408_v7, %v6360_v53  ;;  %v1035_v29 = vadd.f32 %v950_v5, %v6088_v36 }
 0x17e   :  { %v2252_v62 = vpack.c.bf16 %v1576_v19, %v1576_v19  ;;  %v1555_v23 = vmul.f32 0.1, %v1523_v17  ;;  %v1641_v34 = vrot.slane %v6400_v52, 2  ;;  %v2671_v41 = vsel %vm1630_vm4, %v2670_v47, %v2669_v59 }
 0x17f   :  { %v1588_v13 = vmax.f32 %v1524_v61, %v1556_v57  ;;  %v1516_v3 = vadd.f32 %v6040_v21, %v1482_v24  ;;  %v2672_v19 = vrot.slane %v6404_v54, 2  ;;  %v6420_v53 = vunpack.c.l.b16 %v2254_v56 }
 0x180   :  { %v6416_v14 = vunpack.c.l.b16 %v2252_v62  ;;  %v1587_v16 = vmax.f32 %v1523_v17, %v1555_v23  ;;  %v958_v43 = vpop.permute.xlu1 %957  ;;  %v942_v61 = vpop.permute.xlu0 %941  ;;  %v1640_v36 = vsel %vm1639_vm7, %v1638_v33, %v1637_v40  ;;  %v1812_v5 = vsel %vm1633_vm5, %v1811_v55, %v6367_v18 }
 0x181   :  { %v2255_v7 = vpack.c.bf16 %v1588_v13, %v1588_v13  ;;  %v1548_v59 = vmul.f32 0.1, %v1516_v3  ;;  %v1039_v47 = vadd.f32 %v958_v43, %v6092_v27  ;;  %v1737_v17 = vsel %vm1639_vm7, %v1736_v10, %v1735_v4 }
 0x182   :  { %v1605_v57 = vpack.c.bf16 %v1587_v16, %v1587_v16  ;;  %v1031_v62 = vadd.f32 %v942_v61, %v6096_v45  ;;  %v1643_v23 = vsel %vm1642_vm8, %v1641_v34, %v1640_v36  ;;  %v6430_v56 = vadd.f32 %v6165_v35, %v1035_v29 }
 0x183   :  { %v1738_v24 = vrot.slane %v6400_v52, 6  ;;  %v1580_v40 = vmax.f32 %v1516_v3, %v1548_v59  ;;  %v2673_v18 = vsel %vm1633_vm5, %v2672_v19, %v2671_v41  ;;  %v2674_v55 = vrot.slane %v6416_v14, 1 }
 0x184   :  { %v6433_v13 = vunpack.c.l.b16 %v1605_v57  ;;  %v974_v33 = vpop.permute.xlu1 %973  ;;  %v6437_v27 = vunpack.c.l.b16 %v2255_v7  ;;  %v934_v45 = vpop.permute.xlu0 %933  ;;  %v2677_v4 = vrot.slane %v6420_v53, 7  ;;  %v2750_v35 = vrot.slane %v6404_v54, 3 }
 0x185   :  { %v1047_v43 = vadd.f32 %v974_v33, %v6107_v11  ;;  %v2253_v10 = vpack.c.bf16 %v1580_v40, %v1580_v40  ;;  %v1225_v34 = vadd.f32 %v6158_v60, %v1039_v47  ;;  %v1217_v41 = vadd.f32 %v6146_v46, %v1031_v62  ;;  %v4338_v60 = vld [vmem:[%s7171_s2 + $0x40] sm:$0xff]  }
 0x186   :  { %v1644_v29 = vrot.slane %v6433_v13, 1  ;;  %v1740_v3 = vrot.slane %v6433_v13, 5  ;;  %v1739_v16 = vsel %vm1642_vm8, %v1738_v24, %v1737_v17  ;;  %v2749_v19 = vsel %vm1630_vm4, %v2748_v25, %v6385_v20 }
 0x187   :  { %v2752_v11 = vrot.slane %v6416_v14, 2  ;;  %v6450_v7 = vunpack.c.l.b16 %v2253_v10  ;;  %v1027_v61 = vadd.f32 %v934_v45, %v6116_v2  ;;  %v2675_v46 = vsel %vm1636_vm6, %v2674_v55, %v2673_v18 }
 0x188   :  { %v982_v36 = vpop.permute.xlu1 %981  ;;  %v1646_v57 = vsel %vm1645_vm9, %v1644_v29, %v1643_v23  ;;  %v966_v59 = vpop.permute.xlu0 %965  ;;  %v2679_v17 = vrot.slane %v6437_v27, 6  ;;  %v6460_v20 = vadd.f32 %v6180_v50, %v1047_v43  ;;  %v2751_v25 = vsel %vm1633_vm5, %v2750_v35, %v2749_v19  ;;  %v4339_v43 = vld [vmem:[%s7171_s2 + $0xe0] sm:$0xff]  }
 0x189   :  { %v1647_v47 = vpack.c.b16 %v1646_v57, %v1646_v57  ;;  %v1051_v2 = vadd.f32 %v982_v36, %v6123_v15  ;;  %v2676_v62 = vsel %vm1639_vm7, %v6450_v7, %v2675_v46  ;;  %v6467_v23 = vsel %vm1645_vm9, %v1740_v3, %v1739_v16 }
 0x18a   :  { %v2754_v24 = vrot.slane %v6450_v7, 1  ;;  %v1043_v40 = vadd.f32 %v966_v59, %v6129_v58  ;;  %v2678_v33 = vsel %vm1642_vm8, %v2677_v4, %v2676_v62  ;;  %v2753_v50 = vsel %vm1636_vm6, %v2752_v11, %v2751_v25 }
 0x18b   :  { %4029 = vmatmul.mubr.msk.bf16.vlgmr.msra.gmra.mrb[0].mxu1 %vm1659_vm10, %v1647_v47  ;;  %v1814_v15 = vsel %vm1636_vm6, %v1813_v51, %v1812_v5  ;;  %v2680_v55 = vsel %vm1645_vm9, %v2679_v17, %v2678_v33  ;;  %v1213_v58 = vadd.f32 %v6190_v28, %v1027_v61  ;;  %v7449_v45 = vmov 0.0  }
 0x18c   :  { %v990_v18 = vpop.permute.xlu1 %989  ;;  %4033 = vmatpush3.bf16.msra.mxu1 %v4338_v60  ;;  %4036 = vmatprep.mubr.msk.bf16.mxu1 %vm4412_vm2, %v7449_v45  ;;  %v2755_v4 = vsel %vm1639_vm7, %v2754_v24, %v2753_v50  ;;  %v2757_v35 = vrot.slane %v6437_v27, 7  ;;  %v1378_v10 = vpop.permute.xlu0 %1377  ;;  %v2681_v29 = vpack.c.b16 %v2680_v55, %v2680_v55  ;;  %v1742_v51 = vpack.c.b16 %v6467_v23, %v6467_v23 }
 0x18d   :  { %4034 = vmatprep.subr.bf16.mxu1 %v7449_v45  ;;  %v1816_v5 = vrot.slane %v6400_v52, 7  ;;  %v2826_v3 = vrot.slane %v6388_v1, 5  ;;  %v1467_v16 = vadd.f32 %v1378_v10, %v1217_v41  ;;  %v6492_v28 = vadd.f32 %v6254_v22, %v1051_v2 }
 0x18e   :  { %v1815_v19 = vsel %vm1639_vm7, %v6395_v37, %v1814_v15  ;;  %v1818_v11 = vrot.slane %v6433_v13, 6  ;;  %v1055_v61 = vadd.f32 %v990_v18, %v6133_v26  ;;  %4133 = vmatmul.mubr.msk.bf16.vlgmr.msra.gmra.mrb[0].mxu0 %vm1659_vm10, %v2681_v29  ;;  %v6500_v36 = vadd.f32 %v6213_v12, %v1043_v40 }
 0x18f   :  { %v2756_v57 = vsel %vm1642_vm8, %v6420_v53, %v2755_v4  ;;  %v7450_v41 = vrot.slane %v6343_v9, 7  ;;  %v7451_v22 = vrot.slane %v6337_v49, 6  ;;  %v1501_v46 = vadd.f32 %v6040_v21, %v1467_v16  ;;  %4137 = vmatpush3.bf16.msra.mxu0 %v4339_v43  ;;  %4140 = vmatprep.mubr.msk.bf16.mxu0 %vm4412_vm2, %v7449_v45  ;;  %v4342_v4 = vld [vmem:[%s7171_s2 + $0x50] sm:$0xff]  }
 0x190   :  { %v1394_v59 = vpop.permute.xlu1 %1393  ;;  %4035 = vmatpush3.bf16.msra.mxu1 %v6226_v31  ;;  %v2828_v26 = vrot.slane %v6404_v54, 4  ;;  %v2830_v12 = vrot.slane %v6416_v14, 3  ;;  %v2832_v47 = vrot.slane %v6450_v7, 2  ;;  %v1386_v25 = vpop.permute.xlu0 %1385  ;;  %4138 = vmatprep.subr.bf16.mxu0 %v7449_v45  ;;  %v1817_v2 = vsel %vm1642_vm8, %v1816_v5, %v1815_v19 }
 0x191   :  { %v2825_v60 = vsel %vm1627_vm3, %v7451_v22, %v7450_v41  ;;  %v1475_v17 = vadd.f32 %v1394_v59, %v1225_v34  ;;  %4040 = vmatprep.subr.bf16.mxu1 %v7449_v45  ;;  %v1955_v23 = vrot.slane %v6307_v0, 6  ;;  %v1533_v24 = vmul.f32 0.1, %v1501_v46 }
 0x192   :  { %v2827_v62 = vsel %vm1630_vm4, %v2826_v3, %v2825_v60  ;;  %v1471_v31 = vadd.f32 %v1386_v25, %v6430_v56  ;;  %v2758_v40 = vsel %vm1645_vm9, %v2757_v35, %v2756_v57  ;;  %v6526_v50 = vsel %vm1645_vm9, %v1818_v11, %v1817_v2 }
 0x193   :  { %v2829_v34 = vsel %vm1633_vm5, %v2828_v26, %v2827_v62  ;;  %v1509_v33 = vadd.f32 %v6040_v21, %v1475_v17  ;;  %v1882_v18 = vrot.slane %v6357_v39, 6  ;;  %v1565_v55 = vmax.f32 %v1501_v46, %v1533_v24  ;;  %4139 = vmatpush3.bf16.msra.mxu0 %v6240_v30 }
 0x194   :  { %v2831_v15 = vsel %vm1636_vm6, %v2830_v12, %v2829_v34  ;;  %v1505_v43 = vadd.f32 %v6040_v21, %v1471_v31  ;;  %v1410_v56 = vpop.permute.xlu1 %1409  ;;  %v2834_v10 = vrot.slane %v6420_v53, 1  ;;  %v1370_v3 = vpop.permute.xlu0 %1369  ;;  %v1241_v16 = vadd.f32 %v6200_v42, %v1055_v61  ;;  %4144 = vmatprep.subr.bf16.mxu0 %v7449_v45 }
 0x195   :  { %v2833_v35 = vsel %vm1639_vm7, %v2832_v47, %v2831_v15  ;;  %v1541_v29 = vmul.f32 0.1, %v1509_v33  ;;  %v1483_v5 = vadd.f32 %v1410_v56, %v6460_v20  ;;  %v2759_v19 = vpack.c.b16 %v2758_v40, %v2758_v40 }
 0x196   :  { %v1537_v11 = vmul.f32 0.1, %v1505_v43  ;;  %v1463_v57 = vadd.f32 %v1370_v3, %v1213_v58  ;;  %v2835_v30 = vsel %vm1642_vm8, %v2834_v10, %v2833_v35  ;;  %v1884_v41 = vrot.slane %v6363_v6, 5  ;;  %v4343_v58 = vld [vmem:[%s7171_s2 + $0xf0] sm:$0xff]  }
 0x197   :  { %v2897_v22 = vpack.c.bf16 %v1565_v55, %v1565_v55  ;;  %v1517_v60 = vadd.f32 %v6040_v21, %v1483_v5  ;;  %4037 = vmatmul.mubr.msk.bf16.vlgmr.msra.gmra.mrb[0].mxu1 %vm1659_vm10, %v1742_v51  ;;  %v1883_v20 = vsel %vm1633_vm5, %v1882_v18, %v6373_v32  ;;  %v1886_v46 = vrot.slane %v6395_v37, 4 }
 0x198   :  { %v1569_v42 = vmax.f32 %v1505_v43, %v1537_v11  ;;  %v1497_v61 = vadd.f32 %v6040_v21, %v1463_v57  ;;  %v1426_v59 = vpop.permute.xlu1 %1425  ;;  %4041 = vmatpush3.bf16.msra.mxu1 %v4342_v4  ;;  %4044 = vmatprep.mubr.msk.bf16.mxu1 %vm4412_vm2, %v7449_v45  ;;  %v1820_v51 = vpack.c.b16 %v6526_v50, %v6526_v50  ;;  %v1888_v26 = vrot.slane %v6400_v52, 3  ;;  %v1402_v17 = vpop.permute.xlu0 %1401 }
 0x199   :  { %v1573_v32 = vmax.f32 %v1509_v33, %v1541_v29  ;;  %v1549_v12 = vmul.f32 0.1, %v1517_v60  ;;  %v1491_v47 = vadd.f32 %v1426_v59, %v1241_v16  ;;  %4042 = vmatprep.subr.bf16.mxu1 %v7449_v45  ;;  %v6559_v25 = vsel %vm1645_vm9, %v6437_v27, %v2835_v30 }
 0x19a   :  { %v2898_v2 = vpack.c.bf16 %v1569_v42, %v1569_v42  ;;  %v1529_v62 = vmul.f32 0.1, %v1497_v61  ;;  %v1479_v24 = vadd.f32 %v1402_v17, %v6500_v36  ;;  %v1885_v31 = vsel %vm1636_vm6, %v1884_v41, %v1883_v20  ;;  %4141 = vmatmul.mubr.msk.bf16.vlgmr.msra.gmra.mrb[0].mxu0 %vm1659_vm10, %v2759_v19 }
 0x19b   :  { %v6563_v40 = vunpack.c.l.b16 %v2897_v22  ;;  %v1581_v34 = vmax.f32 %v1517_v60, %v1549_v12  ;;  %v1525_v33 = vadd.f32 %v6040_v21, %v1491_v47  ;;  %v1887_v50 = vsel %vm1639_vm7, %v1886_v46, %v1885_v31  ;;  %4145 = vmatpush3.bf16.msra.mxu0 %v4343_v58  ;;  %4148 = vmatprep.mubr.msk.bf16.mxu0 %vm4412_vm2, %v7449_v45 }
 0x19c   :  { %v1561_v15 = vmax.f32 %v1497_v61, %v1529_v62  ;;  %v1513_v18 = vadd.f32 %v6040_v21, %v1479_v24  ;;  %v952_v55 = vpop.permute.xlu1 %951  ;;  %4043 = vmatpush3.bf16.msra.mxu1 %v6243_v8  ;;  %v2837_v36 = vpack.c.b16 %v6559_v25, %v6559_v25  ;;  %v2027_v43 = vrot.slane %v6307_v0, 2  ;;  %v1418_v35 = vpop.permute.xlu0 %1417  ;;  %4146 = vmatprep.subr.bf16.mxu0 %v7449_v45  ;;  %v7453_v25 = vld [vmem:[#allocation23_spill] sm:$0xff] }
 0x19d   :  { %v2899_v56 = vpack.c.bf16 %v1573_v32, %v1573_v32  ;;  %v1557_v4 = vmul.f32 0.1, %v1525_v33  ;;  %4048 = vmatprep.subr.bf16.mxu1 %v7449_v45  ;;  %v1889_v10 = vsel %vm1642_vm8, %v1888_v26, %v1887_v50  ;;  %v1890_v29 = vrot.slane %v6433_v13, 2  ;;  %v4347_v50 = vld [vmem:[%s7171_s2 + $0x100] sm:$0xff]  }
 0x19e   :  { %v6577_v5 = vunpack.c.l.b16 %v2898_v2  ;;  %v2896_v3 = vpack.c.bf16 %v1561_v15, %v1561_v15  ;;  %v1545_v8 = vmul.f32 0.1, %v1513_v18  ;;  %v1487_v16 = vadd.f32 %v1418_v35, %v6492_v28  ;;  %v4346_v28 = vld [vmem:[%s7171_s2 + $0x10] sm:$0xff]  }
 0x19f   :  { %v2901_v19 = vpack.c.bf16 %v1581_v34, %v1581_v34  ;;  %v1589_v11 = vmax.f32 %v1525_v33, %v1557_v4  ;;  %v2925_v57 = vrot.slane %v6563_v40, 7  ;;  %v7452_v30 = vrot.slane %v6277_v63, 5  ;;  %4147 = vmatpush3.bf16.msra.mxu0 %v6275_v48 }
 0x1a0   :  { %v6588_v22 = vunpack.c.l.b16 %v2896_v3  ;;  %v1577_v60 = vmax.f32 %v1513_v18, %v1545_v8  ;;  %v1521_v20 = vadd.f32 %v6040_v21, %v1487_v16  ;;  %v960_v46 = vpop.permute.xlu1 %959  ;;  %v1960_v42 = vrot.slane %v6357_v39, 3  ;;  %4152 = vmatprep.subr.bf16.mxu0 %v7449_v45  ;;  %v7456_v8 = vld [vmem:[#allocation27_spill] sm:$0xff] }
 0x1a1   :  { %v1957_v41 = vsel %vm1627_vm3, %v7452_v30, %v1955_v23  ;;  %v6596_v61 = vunpack.c.l.b16 %v2899_v56  ;;  %v2903_v59 = vpack.c.bf16 %v1589_v11, %v1589_v11  ;;  %v1036_v58 = vadd.f32 %v952_v55, %v6151_v44  ;;  %v944_v23 = vpop.permute.xlu0 %943 }
 0x1a2   :  { %v6601_v26 = vsel %vm1645_vm9, %v1890_v29, %v1889_v10  ;;  %v2900_v32 = vpack.c.bf16 %v1577_v60, %v1577_v60  ;;  %v1553_v12 = vmul.f32 0.1, %v1521_v20  ;;  %v2926_v48 = vsel %vm1627_vm3, %v2925_v57, %v6588_v22  ;;  %v7455_v29 = vld [vmem:[#allocation8_spill] sm:$0xff] }
 0x1a3   :  { %v2927_v47 = vrot.slane %v6577_v5, 6  ;;  %v6606_v17 = vunpack.c.l.b16 %v2901_v19  ;;  %v1032_v2 = vadd.f32 %v944_v23, %v7453_v25  ;;  %4045 = vmatmul.mubr.msk.bf16.vlgmr.msra.gmra.mrb[0].mxu1 %vm1659_vm10, %v1820_v51  ;;  %v7454_v44 = vrot.slane %v6305_v38, 4 }
 0x1a4   :  { %v1962_v24 = vrot.slane %v6363_v6, 2  ;;  %v6614_v31 = vunpack.c.l.b16 %v2900_v32  ;;  %v1585_v34 = vmax.f32 %v1521_v20, %v1553_v12  ;;  %v976_v33 = vpop.permute.xlu1 %975  ;;  %4049 = vmatpush3.bf16.msra.mxu1 %v4346_v28  ;;  %4052 = vmatprep.mubr.msk.bf16.mxu1 %vm4412_vm2, %v7449_v45  ;;  %v6623_v18 = vunpack.c.l.b16 %v2903_v59  ;;  %v7458_v28 = vld [vmem:[#allocation30_spill] sm:$0xff] }
 0x1a5   :  { %v1959_v62 = vsel %vm1630_vm4, %v7454_v44, %v1957_v41  ;;  %v2928_v51 = vsel %vm1630_vm4, %v2927_v47, %v2926_v48  ;;  %v936_v55 = vpop.permute.xlu0 %935  ;;  %4050 = vmatprep.subr.bf16.mxu1 %v7449_v45  ;;  %v1892_v56 = vpack.c.b16 %v6601_v26, %v6601_v26  ;;  %v2929_v4 = vrot.slane %v6596_v61, 5  ;;  %v7461_v26 = vld [vmem:[#allocation9_spill] sm:$0xff]  ;;  %v7462_v44 = vld [vmem:[#allocation10_spill] sm:$0xff] }
 0x1a6   :  { %v1961_v15 = vsel %vm1633_vm5, %v1960_v42, %v1959_v62  ;;  %v1964_v35 = vrot.slane %v6395_v37, 1  ;;  %v2902_v10 = vpack.c.bf16 %v1585_v34, %v1585_v34  ;;  %v1040_v3 = vadd.f32 %v960_v46, %v7455_v29  ;;  %4149 = vmatmul.mubr.msk.bf16.vlgmr.msra.gmra.mrb[0].mxu0 %vm1659_vm10, %v2837_v36  ;;  %v7459_v42 = vld [vmem:[#allocation26_spill] sm:$0xff] }
 0x1a7   :  { %v7457_v16 = vrot.slane %v7456_v8, 1  ;;  %v2931_v11 = vrot.slane %v6614_v31, 4  ;;  %v2930_v57 = vsel %vm1633_vm5, %v2929_v4, %v2928_v51  ;;  %v2933_v30 = vrot.slane %v6606_v17, 3  ;;  %4153 = vmatpush3.bf16.msra.mxu0 %v4347_v50  ;;  %4156 = vmatprep.mubr.msk.bf16.mxu0 %vm4412_vm2, %v7449_v45  ;;  %v7463_v4 = vld [vmem:[#allocation19_spill] sm:$0xff] }
 0x1a8   :  { %v1963_v41 = vsel %vm1636_vm6, %v1962_v24, %v1961_v15  ;;  %v3003_v60 = vrot.slane %v6588_v22, 1  ;;  %v6641_v20 = vunpack.c.l.b16 %v2902_v10  ;;  %v984_v46 = vpop.permute.xlu1 %983  ;;  %4051 = vmatpush3.bf16.msra.mxu1 %v7458_v28  ;;  %v7460_v59 = vrot.slane %v7459_v42, 1  ;;  %4154 = vmatprep.subr.bf16.mxu0 %v7449_v45 }
 0x1a9   :  { %v6633_v19 = vadd.f32 %v7457_v16, %v1036_v58  ;;  %v2932_v23 = vsel %vm1636_vm6, %v2931_v11, %v2930_v57  ;;  %v1965_v36 = vsel %vm1639_vm7, %v1964_v35, %v1963_v41  ;;  %v1048_v32 = vadd.f32 %v976_v33, %v7461_v26  ;;  %v968_v12 = vpop.permute.xlu0 %967  ;;  %4056 = vmatprep.subr.bf16.mxu1 %v7449_v45  ;;  %v4350_v35 = vld [vmem:[%s7171_s2 + $0x60] sm:$0xff]   ;;  %v7464_v11 = vld [vmem:[#allocation14_spill] sm:$0xff] }
 0x1aa   :  { %v1218_v58 = vadd.f32 %v7460_v59, %v1032_v2  ;;  %v2937_v48 = vrot.slane %v6623_v18, 1  ;;  %v1967_v47 = vrot.slane %v6433_v13, 7  ;;  %v3005_v25 = vrot.slane %v6577_v5, 7 }
 0x1ab   :  { %v1028_v62 = vadd.f32 %v936_v55, %v7462_v44  ;;  %v2935_v2 = vrot.slane %v6641_v20, 2  ;;  %v3004_v24 = vsel %vm1627_vm3, %v6563_v40, %v3003_v60  ;;  %v3007_v34 = vrot.slane %v6596_v61, 6  ;;  %4155 = vmatpush3.bf16.msra.mxu0 %v7463_v4 }
 0x1ac   :  { %v2934_v33 = vsel %vm1639_vm7, %v2933_v30, %v2932_v23  ;;  %v1966_v50 = vsel %vm1642_vm8, %v6400_v52, %v1965_v36  ;;  %v3006_v51 = vsel %vm1630_vm4, %v3005_v25, %v3004_v24  ;;  %v3009_v15 = vrot.slane %v6614_v31, 5  ;;  %v6666_v55 = vpop.permute.xlu1 %991  ;;  %v7465_v30 = vld [vmem:[#allocation13_spill] sm:$0xff]  ;;  %4160 = vmatprep.subr.bf16.mxu0 %v7449_v45  ;;  %v7466_v23 = vld [vmem:[#allocation22_spill] sm:$0xff]  ;;  %v7470_v24 = vld [vmem:[#allocation11_spill] sm:$0xff] }
 0x1ad   :  { %v2936_v10 = vsel %vm1642_vm8, %v2935_v2, %v2934_v33  ;;  %v3008_v29 = vsel %vm1633_vm5, %v3007_v34, %v3006_v51  ;;  %v3011_v8 = vrot.slane %v6606_v17, 4  ;;  %v3013_v16 = vrot.slane %v6641_v20, 3  ;;  %v1380_v60 = vpop.permute.xlu0 %1379 }
 0x1ae   :  { %v1052_v57 = vadd.f32 %v984_v46, %v7464_v11  ;;  %v1044_v41 = vadd.f32 %v968_v12, %v7465_v30  ;;  %v6680_v28 = vsel %vm1645_vm9, %v1967_v47, %v1966_v50  ;;  %v3010_v42 = vsel %vm1636_vm6, %v3009_v15, %v3008_v29  ;;  %v7468_v46 = vld [vmem:[#allocation35_spill] sm:$0xff] }
 0x1af   :  { %v1468_v59 = vadd.f32 %v1380_v60, %v1218_v58  ;;  %v7467_v36 = vrot.slane %v7466_v23, 1  ;;  %v2938_v25 = vsel %vm1645_vm9, %v2937_v48, %v2936_v10  ;;  %v3012_v44 = vsel %vm1639_vm7, %v3011_v8, %v3010_v42  ;;  %4053 = vmatmul.mubr.msk.bf16.vlgmr.msra.gmra.mrb[0].mxu1 %vm1659_vm10, %v1892_v56  ;;  %v4351_v56 = vld [vmem:[%s7171_s2 + $0x110] sm:$0xff]   ;;  %v7475_v8 = vld [vmem:[#allocation16_spill] sm:$0xff] }
 0x1b0   :  { %v7469_v12 = vrot.slane %v7468_v46, 1  ;;  %v7471_v34 = vrot.slane %v7470_v24, 1  ;;  %v3014_v47 = vsel %vm1642_vm8, %v3013_v16, %v3012_v44  ;;  %v7472_v58 = vrot.slane %v6277_v63, 1  ;;  %v1396_v50 = vpop.permute.xlu1 %1395  ;;  %4057 = vmatpush3.bf16.msra.mxu1 %v4350_v35  ;;  %4060 = vmatprep.mubr.msk.bf16.mxu1 %vm4412_vm2, %v7449_v45  ;;  %v7473_v35 = vld [vmem:[#allocation7_spill] sm:$0xff] }
 0x1b1   :  { %v1226_v26 = vadd.f32 %v7467_v36, %v1040_v3  ;;  %v1502_v48 = vadd.f32 %v6040_v21, %v1468_v59  ;;  %v2031_v51 = vrot.slane %v6357_v39, 7  ;;  %v2939_v4 = vpack.c.b16 %v2938_v25, %v2938_v25  ;;  %4058 = vmatprep.subr.bf16.mxu1 %v7449_v45  ;;  %v7477_v25 = vld [vmem:[#allocation18_spill] sm:$0xff] }
 0x1b2   :  { %v1234_v2 = vadd.f32 %v7469_v12, %v1048_v32  ;;  %v1214_v33 = vadd.f32 %v7471_v34, %v1028_v62  ;;  %v2029_v3 = vsel %vm1627_vm3, %v7472_v58, %v2027_v43  ;;  %v1969_v32 = vpack.c.b16 %v6680_v28, %v6680_v28  ;;  %v1388_v43 = vpop.permute.xlu0 %1387 }
 0x1b3   :  { %v3015_v62 = vrot.slane %v6623_v18, 2  ;;  %v1476_v15 = vadd.f32 %v1396_v50, %v1226_v26  ;;  %v7474_v10 = vrot.slane %v7473_v35, 1  ;;  %v7476_v16 = vrot.slane %v7475_v8, 1  ;;  %4157 = vmatmul.mubr.msk.bf16.vlgmr.msra.gmra.mrb[0].mxu0 %vm1659_vm10, %v2939_v4  ;;  %v7478_v35 = vld [vmem:[#allocation29_spill] sm:$0xff] }
 0x1b4   :  { %v1534_v30 = vmul.f32 0.1, %v1502_v48  ;;  %v1472_v60 = vadd.f32 %v1388_v43, %v6633_v19  ;;  %v2030_v42 = vsel %vm1630_vm4, %v6305_v38, %v2029_v3  ;;  %v2033_v23 = vrot.slane %v6363_v6, 6  ;;  %4161 = vmatpush3.bf16.msra.mxu0 %v4351_v56  ;;  %v1412_v19 = vpop.permute.xlu1 %1411  ;;  %4059 = vmatpush3.bf16.msra.mxu1 %v7477_v25 }
 0x1b5   :  { %v1230_v29 = vadd.f32 %v7474_v10, %v1044_v41  ;;  %v6713_v11 = vadd.f32 %v7476_v16, %v1052_v57  ;;  %v6717_v28 = vsel %vm1645_vm9, %v3015_v62, %v3014_v47  ;;  %v1510_v59 = vadd.f32 %v6040_v21, %v1476_v15  ;;  %4162 = vmatprep.subr.bf16.mxu0 %v7449_v45 }
 0x1b6   :  { %v3081_v41 = vrot.slane %v6588_v22, 2  ;;  %v3082_v57 = vrot.slane %v6563_v40, 1  ;;  %v1566_v36 = vmax.f32 %v1502_v48, %v1534_v30  ;;  %v1506_v26 = vadd.f32 %v6040_v21, %v1472_v60  ;;  %v1372_v34 = vpop.permute.xlu0 %1371  ;;  %4064 = vmatprep.subr.bf16.mxu1 %v7449_v45  ;;  %4164 = vmatprep.mubr.msk.bf16.mxu0 %vm4412_vm2, %v7449_v45 }
 0x1b7   :  { %v2032_v44 = vsel %vm1633_vm5, %v2031_v51, %v2030_v42  ;;  %v2035_v46 = vrot.slane %v6395_v37, 5  ;;  %v1542_v12 = vmul.f32 0.1, %v1510_v59  ;;  %v1484_v24 = vadd.f32 %v1412_v19, %v1234_v2 }
 0x1b8   :  { %v2037_v47 = vrot.slane %v6400_v52, 4  ;;  %v3083_v58 = vsel %vm1627_vm3, %v3082_v57, %v3081_v41  ;;  %v1538_v3 = vmul.f32 0.1, %v1506_v26  ;;  %v1464_v48 = vadd.f32 %v1372_v34, %v1214_v33  ;;  %4163 = vmatpush3.bf16.msra.mxu0 %v7478_v35  ;;  %v4354_v33 = vld [vmem:[%s7171_s2 + $0x20] sm:$0xff]  }
 0x1b9   :  { %v2039_v50 = vrot.slane %v6433_v13, 3  ;;  %v3085_v56 = vrot.slane %v6596_v61, 7  ;;  %v3545_v62 = vpack.c.bf16 %v1566_v36, %v1566_v36  ;;  %v1574_v2 = vmax.f32 %v1510_v59, %v1542_v12  ;;  %4168 = vmatprep.subr.bf16.mxu0 %v7449_v45 }
 0x1ba   :  { %v1518_v51 = vadd.f32 %v6040_v21, %v1484_v24  ;;  %v3084_v15 = vsel %vm1630_vm4, %v6577_v5, %v3083_v58  ;;  %v1570_v43 = vmax.f32 %v1506_v26, %v1538_v3  ;;  %v1498_v4 = vadd.f32 %v6040_v21, %v1464_v48  ;;  %v1404_v60 = vpop.permute.xlu0 %1403 }
 0x1bb   :  { %v2034_v10 = vsel %vm1636_vm6, %v2033_v23, %v2032_v44  ;;  %v3087_v8 = vrot.slane %v6614_v31, 6  ;;  %v3547_v16 = vpack.c.bf16 %v1574_v2, %v1574_v2  ;;  %v3086_v59 = vsel %vm1633_vm5, %v3085_v56, %v3084_v15  ;;  %4061 = vmatmul.mubr.msk.bf16.vlgmr.msra.gmra.mrb[0].mxu1 %vm1659_vm10, %v1969_v32 }
 0x1bc   :  { %v1550_v30 = vmul.f32 0.1, %v1518_v51  ;;  %v2036_v42 = vsel %vm1639_vm7, %v2035_v46, %v2034_v10  ;;  %v3546_v41 = vpack.c.bf16 %v1570_v43, %v1570_v43  ;;  %v1530_v57 = vmul.f32 0.1, %v1498_v4  ;;  %4065 = vmatpush3.bf16.msra.mxu1 %v4354_v33  ;;  %v4355_v46 = vld [vmem:[%s7171_s2 + $0x120] sm:$0xff]   ;;  %4068 = vmatprep.mubr.msk.bf16.mxu1 %vm4412_vm2, %v7449_v45  ;;  %v7479_v33 = vld [vmem:[#allocation6_spill] sm:$0xff] }
 0x1bd   :  { %v1480_v36 = vadd.f32 %v1404_v60, %v1230_v29  ;;  %v2038_v26 = vsel %vm1642_vm8, %v2037_v47, %v2036_v42  ;;  %v3566_v19 = vunpack.c.l.b16 %v3545_v62  ;;  %v3017_v23 = vpack.c.b16 %v6717_v28, %v6717_v28  ;;  %4066 = vmatprep.subr.bf16.mxu1 %v7449_v45 }
 0x1be   :  { %v1582_v25 = vmax.f32 %v1518_v51, %v1550_v30  ;;  %v2040_v44 = vsel %vm1645_vm9, %v2039_v50, %v2038_v26  ;;  %v1562_v12 = vmax.f32 %v1498_v4, %v1530_v57  ;;  %v3088_v29 = vsel %vm1636_vm6, %v3087_v8, %v3086_v59  ;;  %v1420_v58 = vpop.permute.xlu0 %1419 }
 0x1bf   :  { %v1514_v24 = vadd.f32 %v6040_v21, %v1480_v36  ;;  %v3091_v32 = vrot.slane %v6641_v20, 4  ;;  %v3568_v34 = vunpack.c.l.b16 %v3547_v16  ;;  %v3567_v47 = vunpack.c.l.b16 %v3546_v41  ;;  %4165 = vmatmul.mubr.msk.bf16.vlgmr.msra.gmra.mrb[0].mxu0 %vm1659_vm10, %v3017_v23 }
 0x1c0   :  { %v3549_v28 = vpack.c.bf16 %v1582_v25, %v1582_v25  ;;  %v3089_v3 = vrot.slane %v6606_v17, 5  ;;  %v3544_v48 = vpack.c.bf16 %v1562_v12, %v1562_v12  ;;  %v2041_v56 = vpack.c.b16 %v2040_v44, %v2040_v44  ;;  %4169 = vmatpush3.bf16.msra.mxu0 %v4355_v46  ;;  %4067 = vmatpush3.bf16.msra.mxu1 %v7479_v33  ;;  %v7480_v46 = vld [vmem:[#allocation5_spill] sm:$0xff] }
 0x1c1   :  { %v1546_v50 = vmul.f32 0.1, %v1514_v24  ;;  %v2107_v62 = vrot.slane %v6305_v38, 5  ;;  %v3573_v2 = vrot.slane %v3566_v19, 7  ;;  %v1488_v15 = vadd.f32 %v1420_v58, %v6713_v11  ;;  %4170 = vmatprep.subr.bf16.mxu0 %v7449_v45  ;;  %4072 = vmatprep.subr.bf16.mxu1 %v7449_v45 }
 0x1c2   :  { %v3570_v51 = vunpack.c.l.b16 %v3549_v28  ;;  %v3090_v43 = vsel %vm1639_vm7, %v3089_v3, %v3088_v29  ;;  %v3565_v4 = vunpack.c.l.b16 %v3544_v48  ;;  %v3093_v8 = vrot.slane %v6623_v18, 3  ;;  %4172 = vmatprep.mubr.msk.bf16.mxu0 %vm4412_vm2, %v7449_v45  ;;  %v4358_v29 = vld [vmem:[%s7171_s2 + $0x70] sm:$0xff]  }
 0x1c3   :  { %v1578_v35 = vmax.f32 %v1514_v24, %v1546_v50  ;;  %v3092_v10 = vsel %vm1642_vm8, %v3091_v32, %v3090_v43  ;;  %v3577_v16 = vrot.slane %v3568_v34, 5  ;;  %v3655_v30 = vrot.slane %v3568_v34, 6  ;;  %v4361_v50 = vld [vmem:[%s7171_s2 + $0x138] sm:$0x1f]  }
 0x1c4   :  { %v3575_v60 = vrot.slane %v3567_v47, 6  ;;  %v1522_v42 = vadd.f32 %v6040_v21, %v1488_v15  ;;  %v3574_v11 = vsel %vm1627_vm3, %v3573_v2, %v3565_v4  ;;  %v3651_v59 = vrot.slane %v3565_v4, 1  ;;  %4171 = vmatpush3.bf16.msra.mxu0 %v7480_v46 }
 0x1c5   :  { %v3548_v41 = vpack.c.bf16 %v1578_v35, %v1578_v35  ;;  %v3094_v57 = vsel %vm1645_vm9, %v3093_v8, %v3092_v10  ;;  %v3653_v36 = vrot.slane %v3567_v47, 7  ;;  %v3581_v26 = vrot.slane %v3570_v51, 3  ;;  %4176 = vmatprep.subr.bf16.mxu0 %v7449_v45  ;;  %v4359_v8 = vld [vmem:[%s7171_s2 + $0x130] sm:$0xff]  }
 0x1c6   :  { %v3576_v25 = vsel %vm1630_vm4, %v3575_v60, %v3574_v11  ;;  %v1554_v23 = vmul.f32 0.1, %v1522_v42  ;;  %v3652_v44 = vsel %vm1627_vm3, %v3566_v19, %v3651_v59  ;;  %v2104_v32 = vrot.slane %v6307_v0, 7  ;;  %v7482_v11 = vld [vmem:[#allocation17_spill] sm:$0xff] }
 0x1c7   :  { %v3578_v12 = vsel %vm1633_vm5, %v3577_v16, %v3576_v25  ;;  %v3569_v24 = vunpack.c.l.b16 %v3548_v41  ;;  %v3659_v34 = vrot.slane %v3570_v51, 4  ;;  %v3654_v47 = vsel %vm1630_vm4, %v3653_v36, %v3652_v44  ;;  %4069 = vmatmul.mubr.msk.bf16.vlgmr.msra.gmra.mrb[0].mxu1 %vm1659_vm10, %v2041_v56  ;;  %v7483_v59 = vld [vmem:[#allocation21_spill] sm:$0xff] }
 0x1c8   :  { %v1586_v28 = vmax.f32 %v1522_v42, %v1554_v23  ;;  %v3095_v58 = vpack.c.b16 %v3094_v57, %v3094_v57  ;;  %v3656_v19 = vsel %vm1633_vm5, %v3655_v30, %v3654_v47  ;;  %v7481_v2 = vrot.slane %v6277_v63, 6  ;;  %4073 = vmatpush3.bf16.msra.mxu1 %v4358_v29  ;;  %4076 = vmatprep.mubr.msk.bf16.mxu1 %vm4412_vm2, %v7449_v45 }
 0x1c9   :  { %v3579_v3 = vrot.slane %v3569_v24, 4  ;;  %v3657_v48 = vrot.slane %v3569_v24, 5  ;;  %v2109_v4 = vrot.slane %v6357_v39, 4  ;;  %v2111_v35 = vrot.slane %v6363_v6, 3  ;;  %4074 = vmatprep.subr.bf16.mxu1 %v7449_v45  ;;  %v7484_v24 = vld [vmem:[#allocation33_spill] sm:$0xff] }
 0x1ca   :  { %v2106_v15 = vsel %vm1627_vm3, %v7481_v2, %v2104_v32  ;;  %v3550_v43 = vpack.c.bf16 %v1586_v28, %v1586_v28  ;;  %v2113_v56 = vrot.slane %v6395_v37, 2  ;;  %v862_v41 = vmul.f32 %v7483_v59, %v7482_v11 }
 0x1cb   :  { %v2108_v51 = vsel %vm1630_vm4, %v2107_v62, %v2106_v15  ;;  %v3580_v33 = vsel %vm1636_vm6, %v3579_v3, %v3578_v12  ;;  %v3658_v10 = vsel %vm1636_vm6, %v3657_v48, %v3656_v19  ;;  %v2115_v62 = vrot.slane %v6400_v52, 1  ;;  %4173 = vmatmul.mubr.msk.bf16.vlgmr.msra.gmra.mrb[0].mxu0 %vm1659_vm10, %v3095_v58 }
 0x1cc   :  { %v3582_v16 = vsel %vm1639_vm7, %v3581_v26, %v3580_v33  ;;  %v3660_v30 = vsel %vm1639_vm7, %v3659_v34, %v3658_v10  ;;  %v3571_v60 = vunpack.c.l.b16 %v3550_v43  ;;  %v2110_v42 = vsel %vm1633_vm5, %v2109_v4, %v2108_v51  ;;  %4177 = vmatpush3.bf16.msra.mxu0 %v4359_v8  ;;  %4075 = vmatpush3.bf16.msra.mxu1 %v7484_v24  ;;  %v4362_v51 = vld [vmem:[%s7171_s2 + $0x30] sm:$0xff]   ;;  %v4364_v8 = vld [vmem:[%s7171_s2 + $0x38] sm:$0x1f]   ;;  %v4365_v24 = vld [vmem:[%s7171_s2 + $0x148] sm:$0x1f]  }
 0x1cd   :  { %v3189_v57 = vsel %vm1663_vm1, %v4361_v50, 0  ;;  %v3159_v36 = vrot.slane %v6588_v22, 3  ;;  %v3160_v25 = vrot.slane %v6563_v40, 2  ;;  %v2112_v26 = vsel %vm1636_vm6, %v2111_v35, %v2110_v42  ;;  %4178 = vmatprep.subr.bf16.mxu0 %v7449_v45  ;;  %4080 = vmatprep.subr.bf16.mxu1 %v7449_v45 }
 0x1ce   :  { %v3583_v23 = vrot.slane %v3571_v60, 2  ;;  %v3661_v44 = vrot.slane %v3571_v60, 3  ;;  %v2177_v12 = vrot.slane %v6277_v63, 2  ;;  %v2114_v46 = vsel %vm1639_vm7, %v2113_v56, %v2112_v26  ;;  %4180 = vmatprep.mubr.msk.bf16.mxu0 %vm4412_vm2, %v7449_v45 }
 0x1cf   :  { %v3161_v29 = vsel %vm1627_vm3, %v3160_v25, %v3159_v36  ;;  %v3162_v32 = vrot.slane %v6577_v5, 1  ;;  %v3165_v34 = vrot.slane %v6614_v31, 7  ;;  %v2116_v63 = vsel %vm1642_vm8, %v2115_v62, %v2114_v46  ;;  %v4363_v36 = vld [vmem:[%s7171_s2 + $0x140] sm:$0xff]  }
 0x1d0   :  { %v6828_v47 = vsel %vm1642_vm8, %v3583_v23, %v3582_v16  ;;  %v6831_v28 = vsel %vm1642_vm8, %v3661_v44, %v3660_v30  ;;  %v2179_v58 = vrot.slane %v6305_v38, 1  ;;  %v2117_v19 = vsel %vm1645_vm9, %v6433_v13, %v2116_v63  ;;  %4179 = vmatpush3.bf16.msra.mxu0 %v3189_v57  ;;  %v1428_v57 = vpop.permute.xlu1 %1427  ;;  %v7485_v44 = vld [vmem:[#allocation20_spill] sm:$0xff] }
 0x1d1   :  { %v3163_v3 = vsel %vm1630_vm4, %v3162_v32, %v3161_v29  ;;  %v3169_v48 = vrot.slane %v6641_v20, 5  ;;  %v2176_v50 = vrot.slane %v6307_v0, 3  ;;  %v1056_v2 = vadd.f32 %v6666_v55, %v862_v41  ;;  %4184 = vmatprep.subr.bf16.mxu0 %v7449_v45 }
 0x1d2   :  { %v3164_v15 = vsel %vm1633_vm5, %v6596_v61, %v3163_v3  ;;  %v3167_v43 = vrot.slane %v6606_v17, 6  ;;  %v3171_v38 = vrot.slane %v6623_v18, 4  ;;  %v3237_v0 = vrot.slane %v6588_v22, 4 }
 0x1d3   :  { %v3166_v4 = vsel %vm1636_vm6, %v3165_v34, %v3164_v15  ;;  %v2178_v35 = vsel %vm1627_vm3, %v2177_v12, %v2176_v50  ;;  %v3238_v55 = vrot.slane %v6563_v40, 3  ;;  %v2118_v33 = vpack.c.b16 %v2117_v19, %v2117_v19 }
 0x1d4   :  { %v3168_v10 = vsel %vm1639_vm7, %v3167_v43, %v3166_v4  ;;  %v2182_v56 = vrot.slane %v6363_v6, 7  ;;  %v3240_v62 = vrot.slane %v6577_v5, 2  ;;  %v2180_v30 = vsel %vm1630_vm4, %v2179_v58, %v2178_v35 }
 0x1d5   :  { %v3170_v16 = vsel %vm1642_vm8, %v3169_v48, %v3168_v10  ;;  %v3239_v60 = vsel %vm1627_vm3, %v3238_v55, %v3237_v0  ;;  %v3242_v42 = vrot.slane %v6596_v61, 1  ;;  %4077 = vmatmul.mubr.msk.bf16.vlgmr.msra.gmra.mrb[0].mxu1 %vm1659_vm10, %v2118_v33  ;;  %v2181_v59 = vsel %vm1633_vm5, %v6357_v39, %v2180_v30  ;;  %v4366_v55 = vld [vmem:[%s7171_s2 + $0x80] sm:$0xff]  }
 0x1d6   :  { %v3172_v11 = vsel %vm1645_vm9, %v3171_v38, %v3170_v16  ;;  %v2184_v41 = vrot.slane %v6395_v37, 6  ;;  %v3241_v6 = vsel %vm1630_vm4, %v3240_v62, %v3239_v60  ;;  %4081 = vmatpush3.bf16.msra.mxu1 %v4362_v51  ;;  %4084 = vmatprep.mubr.msk.bf16.mxu1 %vm4412_vm2, %v7449_v45  ;;  %v2186_v25 = vrot.slane %v6400_v52, 5  ;;  %v4368_v62 = vld [vmem:[%s7171_s2 + $0x88] sm:$0x1f]  }
 0x1d7   :  { %v3243_v23 = vsel %vm1633_vm5, %v3242_v42, %v3241_v6  ;;  %v7486_v26 = vrot.slane %v7485_v44, 1  ;;  %v3173_v12 = vpack.c.b16 %v3172_v11, %v3172_v11  ;;  %4082 = vmatprep.subr.bf16.mxu1 %v7449_v45  ;;  %v2206_v37 = vsel %vm1663_vm1, %v4364_v8, 0 }
 0x1d8   :  { %v2188_v46 = vrot.slane %v6433_v13, 4  ;;  %v2183_v29 = vsel %vm1636_vm6, %v2182_v56, %v2181_v59  ;;  %v3244_v34 = vsel %vm1636_vm6, %v6614_v31, %v3243_v23  ;;  %v3247_v63 = vrot.slane %v6641_v20, 6 }
 0x1d9   :  { %v1242_v39 = vadd.f32 %v7486_v26, %v1056_v2  ;;  %4181 = vmatmul.mubr.msk.bf16.vlgmr.msra.gmra.mrb[0].mxu0 %vm1659_vm10, %v3173_v12  ;;  %v2185_v52 = vsel %vm1639_vm7, %v2184_v41, %v2183_v29  ;;  %v3245_v19 = vrot.slane %v6606_v17, 7  ;;  %v3267_v13 = vsel %vm1663_vm1, %v4365_v24, 0  ;;  %v4369_v26 = vld [vmem:[%s7171_s2 + $0x158] sm:$0x1f]  }
 0x1da   :  { %4185 = vmatpush3.bf16.msra.mxu0 %v4363_v36  ;;  %4083 = vmatpush3.bf16.msra.mxu1 %v2206_v37  ;;  %v2187_v58 = vsel %vm1642_vm8, %v2186_v25, %v2185_v52  ;;  %v2279_v48 = vrot.slane %v6388_v1, 6  ;;  %v3315_v50 = vrot.slane %v6588_v22, 5  ;;  %v2277_v15 = vrot.slane %v6337_v49, 7 }
 0x1db   :  { %v1492_v32 = vadd.f32 %v1428_v57, %v1242_v39  ;;  %4186 = vmatprep.subr.bf16.mxu0 %v7449_v45  ;;  %v2189_v3 = vsel %vm1645_vm9, %v2188_v46, %v2187_v58  ;;  %4088 = vmatprep.subr.bf16.mxu1 %v7449_v45  ;;  %v3246_v2 = vsel %vm1639_vm7, %v3245_v19, %v3244_v34  ;;  %v2281_v43 = vrot.slane %v6404_v54, 5  ;;  %v4367_v57 = vld [vmem:[%s7171_s2 + $0x150] sm:$0xff]  }
 0x1dc   :  { %4188 = vmatprep.mubr.msk.bf16.mxu0 %vm4412_vm2, %v7449_v45  ;;  %v3316_v38 = vrot.slane %v6563_v40, 4  ;;  %v3248_v4 = vsel %vm1642_vm8, %v3247_v63, %v3246_v2  ;;  %v2283_v35 = vrot.slane %v6416_v14, 4  ;;  %v3318_v0 = vrot.slane %v6577_v5, 3 }
 0x1dd   :  { %v1526_v51 = vadd.f32 %v6040_v21, %v1492_v32  ;;  %v3249_v33 = vrot.slane %v6623_v18, 5  ;;  %v2278_v10 = vsel %vm1627_vm3, %v2277_v15, %v6343_v9  ;;  %v2285_v8 = vrot.slane %v6450_v7, 3 }
 0x1de   :  { %4187 = vmatpush3.bf16.msra.mxu0 %v3267_v13  ;;  %v3317_v21 = vsel %vm1627_vm3, %v3316_v38, %v3315_v50  ;;  %v2190_v56 = vpack.c.b16 %v2189_v3, %v2189_v3  ;;  %v2280_v16 = vsel %vm1630_vm4, %v2279_v48, %v2278_v10  ;;  %v3320_v11 = vrot.slane %v6596_v61, 2  ;;  %v4372_v10 = vld [vmem:[%s7171_s2 + $0x98] sm:$0x1f]  }
 0x1df   :  { %4192 = vmatprep.subr.bf16.mxu0 %v7449_v45  ;;  %v3319_v30 = vsel %vm1630_vm4, %v3318_v0, %v3317_v21  ;;  %v3250_v60 = vsel %vm1645_vm9, %v3249_v33, %v3248_v4  ;;  %v2282_v42 = vsel %vm1633_vm5, %v2281_v43, %v2280_v16  ;;  %v1558_v59 = vmul.f32 0.1, %v1526_v51 }
 0x1e0   :  { %v2284_v41 = vsel %vm1636_vm6, %v2283_v35, %v2282_v42  ;;  %v3322_v6 = vrot.slane %v6614_v31, 1  ;;  %v3321_v25 = vsel %vm1633_vm5, %v3320_v11, %v3319_v30  ;;  %v3251_v23 = vpack.c.b16 %v3250_v60, %v3250_v60  ;;  %v4371_v42 = vld [vmem:[%s7171_s2 + $0x160] sm:$0xff]  }
 0x1e1   :  { %4085 = vmatmul.mubr.msk.bf16.vlgmr.msra.gmra.mrb[0].mxu1 %vm1659_vm10, %v2190_v56  ;;  %v2286_v36 = vsel %vm1639_vm7, %v2285_v8, %v2284_v41  ;;  %v2307_v44 = vsel %vm1663_vm1, %v4368_v62, 0  ;;  %v2287_v39 = vrot.slane %v6420_v53, 2  ;;  %v3393_v12 = vrot.slane %v6588_v22, 6 }
 0x1e2   :  { %4089 = vmatpush3.bf16.msra.mxu1 %v4366_v55  ;;  %4092 = vmatprep.mubr.msk.bf16.mxu1 %vm4412_vm2, %v7449_v45  ;;  %v3394_v37 = vrot.slane %v6563_v40, 5  ;;  %v1590_v24 = vmax.f32 %v1526_v51, %v1558_v59  ;;  %v3323_v29 = vsel %vm1636_vm6, %v3322_v6, %v3321_v25  ;;  %v3325_v32 = vrot.slane %v6641_v20, 7  ;;  %v4370_v51 = vld [vmem:[%s7171_s2 + $0x90] sm:$0xff]   ;;  %v4373_v6 = vld [vmem:[%s7171_s2 + $0x168] sm:$0x1f]  }
 0x1e3   :  { %4090 = vmatprep.subr.bf16.mxu1 %v7449_v45  ;;  %v2288_v46 = vsel %vm1642_vm8, %v2287_v39, %v2286_v36  ;;  %v2289_v52 = vrot.slane %v6437_v27, 1  ;;  %v2355_v34 = vrot.slane %v6343_v9, 1  ;;  %v3345_v58 = vsel %vm1663_vm1, %v4369_v26, 0 }
 0x1e4   :  { %v3395_v63 = vsel %vm1627_vm3, %v3394_v37, %v3393_v12  ;;  %v2357_v19 = vrot.slane %v6388_v1, 7  ;;  %v3396_v13 = vrot.slane %v6577_v5, 4  ;;  %v3324_v48 = vsel %vm1639_vm7, %v6606_v17, %v3323_v29 }
 0x1e5   :  { %4189 = vmatmul.mubr.msk.bf16.vlgmr.msra.gmra.mrb[0].mxu0 %vm1659_vm10, %v3251_v23  ;;  %v2290_v3 = vsel %vm1645_vm9, %v2289_v52, %v2288_v46  ;;  %v2359_v50 = vrot.slane %v6404_v54, 6  ;;  %v3551_v2 = vpack.c.bf16 %v1590_v24, %v1590_v24  ;;  %v3326_v15 = vsel %vm1642_vm8, %v3325_v32, %v3324_v48 }
 0x1e6   :  { %4193 = vmatpush3.bf16.msra.mxu0 %v4367_v57  ;;  %4091 = vmatpush3.bf16.msra.mxu1 %v2307_v44  ;;  %v2361_v43 = vrot.slane %v6416_v14, 5  ;;  %v3397_v38 = vsel %vm1630_vm4, %v3396_v13, %v3395_v63  ;;  %v3327_v4 = vrot.slane %v6623_v18, 6  ;;  %v2356_v35 = vsel %vm1627_vm3, %v6337_v49, %v2355_v34 }
 0x1e7   :  { %4194 = vmatprep.subr.bf16.mxu0 %v7449_v45  ;;  %4096 = vmatprep.subr.bf16.mxu1 %v7449_v45  ;;  %v2363_v0 = vrot.slane %v6450_v7, 4  ;;  %v3398_v55 = vrot.slane %v6596_v61, 3  ;;  %v2291_v33 = vpack.c.b16 %v2290_v3, %v2290_v3  ;;  %v2358_v8 = vsel %vm1630_vm4, %v2357_v19, %v2356_v35  ;;  %v4374_v19 = vld [vmem:[%s7171_s2 + $0xa0] sm:$0xff]  }
 0x1e8   :  { %4196 = vmatprep.mubr.msk.bf16.mxu0 %vm4412_vm2, %v7449_v45  ;;  %v3400_v21 = vrot.slane %v6614_v31, 2  ;;  %v3328_v56 = vsel %vm1645_vm9, %v3327_v4, %v3326_v15  ;;  %v2360_v62 = vsel %vm1633_vm5, %v2359_v50, %v2358_v8  ;;  %v3572_v30 = vunpack.c.l.b16 %v3551_v2  ;;  %v4376_v2 = vld [vmem:[%s7171_s2 + $0xa8] sm:$0x1f]  }
 0x1e9   :  { %v3399_v16 = vsel %vm1633_vm5, %v3398_v55, %v3397_v38  ;;  %v2362_v60 = vsel %vm1636_vm6, %v2361_v43, %v2360_v62  ;;  %v3329_v59 = vpack.c.b16 %v3328_v56, %v3328_v56  ;;  %v2385_v41 = vsel %vm1663_vm1, %v4372_v10, 0  ;;  %v4375_v55 = vld [vmem:[%s7171_s2 + $0x170] sm:$0xff]  }
 0x1ea   :  { %4195 = vmatpush3.bf16.msra.mxu0 %v3345_v58  ;;  %v2364_v11 = vsel %vm1639_vm7, %v2363_v0, %v2362_v60  ;;  %v2365_v57 = vrot.slane %v6420_v53, 3  ;;  %v3401_v36 = vsel %vm1636_vm6, %v3400_v21, %v3399_v16  ;;  %v3402_v25 = vrot.slane %v6606_v17, 1 }
 0x1eb   :  { %4200 = vmatprep.subr.bf16.mxu0 %v7449_v45  ;;  %v3471_v23 = vrot.slane %v6588_v22, 7  ;;  %v3585_v44 = vrot.slane %v3572_v30, 1  ;;  %v2367_v39 = vrot.slane %v6437_v27, 2  ;;  %v2433_v37 = vrot.slane %v6343_v9, 2 }
 0x1ec   :  { %v2366_v26 = vsel %vm1642_vm8, %v2365_v57, %v2364_v11  ;;  %v3403_v12 = vsel %vm1639_vm7, %v3402_v25, %v3401_v36  ;;  %v3472_v24 = vrot.slane %v6563_v40, 6  ;;  %v3423_v46 = vsel %vm1663_vm1, %v4373_v6, 0  ;;  %v4378_v57 = vld [vmem:[%s7171_s2 + $0xb0] sm:$0xff]  }
 0x1ed   :  { %4093 = vmatmul.mubr.msk.bf16.vlgmr.msra.gmra.mrb[0].mxu1 %vm1659_vm10, %v2291_v33  ;;  %v7013_v22 = vsel %vm1645_vm9, %v3585_v44, %v6828_v47  ;;  %v2368_v29 = vsel %vm1645_vm9, %v2367_v39, %v2366_v26  ;;  %v2434_v32 = vrot.slane %v6337_v49, 1  ;;  %v2437_v52 = vrot.slane %v6404_v54, 7  ;;  %v4380_v44 = vld [vmem:[%s7171_s2 + $0xb8] sm:$0x1f]  }
 0x1ee   :  { %4097 = vmatpush3.bf16.msra.mxu1 %v4370_v51  ;;  %4100 = vmatprep.mubr.msk.bf16.mxu1 %vm4412_vm2, %v7449_v45  ;;  %v3473_v40 = vsel %vm1627_vm3, %v3472_v24, %v3471_v23  ;;  %v3663_v34 = vrot.slane %v3572_v30, 2  ;;  %v3404_v63 = vsel %vm1642_vm8, %v6641_v20, %v3403_v12  ;;  %v2439_v58 = vrot.slane %v6416_v14, 6  ;;  %v4379_v24 = vld [vmem:[%s7171_s2 + $0x180] sm:$0xff]  }
 0x1ef   :  { %4098 = vmatprep.subr.bf16.mxu1 %v7449_v45  ;;  %v3474_v47 = vrot.slane %v6577_v5, 5  ;;  %v3405_v13 = vrot.slane %v6623_v18, 7  ;;  %v2435_v3 = vsel %vm1627_vm3, %v2434_v32, %v2433_v37  ;;  %v2441_v48 = vrot.slane %v6450_v7, 5  ;;  %v4381_v32 = vld [vmem:[%s7171_s2 + $0x188] sm:$0x1f]  }
 0x1f0   :  { %v2369_v50 = vpack.c.b16 %v2368_v29, %v2368_v29  ;;  %v2436_v5 = vsel %vm1630_vm4, %v6388_v1, %v2435_v3  ;;  %v7040_v43 = vsel %vm1645_vm9, %v3663_v34, %v6831_v28  ;;  %v3476_v4 = vrot.slane %v6596_v61, 4 }
 0x1f1   :  { %4197 = vmatmul.mubr.msk.bf16.vlgmr.msra.gmra.mrb[0].mxu0 %vm1659_vm10, %v3329_v59  ;;  %v3475_v15 = vsel %vm1630_vm4, %v3474_v47, %v3473_v40  ;;  %v3406_v38 = vsel %vm1645_vm9, %v3405_v13, %v3404_v63  ;;  %v2438_v51 = vsel %vm1633_vm5, %v2437_v52, %v2436_v5  ;;  %v3478_v0 = vrot.slane %v6614_v31, 3  ;;  %v4377_v31 = vld [vmem:[%s7171_s2 + $0x178] sm:$0x1f]  }
 0x1f2   :  { %4201 = vmatpush3.bf16.msra.mxu0 %v4371_v42  ;;  %4099 = vmatpush3.bf16.msra.mxu1 %v2385_v41  ;;  %v2440_v35 = vsel %vm1636_vm6, %v2439_v58, %v2438_v51  ;;  %v3477_v33 = vsel %vm1633_vm5, %v3476_v4, %v3475_v15  ;;  %v3407_v10 = vpack.c.b16 %v3406_v38, %v3406_v38  ;;  %v2463_v61 = vsel %vm1663_vm1, %v4376_v2, 0  ;;  %v4384_v2 = vld [vmem:[%s7171_s2 + $0xc8] sm:$0x1f]   ;;  %v4383_v15 = vld [vmem:[%s7171_s2 + $0x190] sm:$0xff]  }
 0x1f3   :  { %4202 = vmatprep.subr.bf16.mxu0 %v7449_v45  ;;  %4104 = vmatprep.subr.bf16.mxu1 %v7449_v45  ;;  %v2442_v28 = vsel %vm1639_vm7, %v2441_v48, %v2440_v35  ;;  %v2443_v8 = vrot.slane %v6420_v53, 4  ;;  %v3479_v56 = vsel %vm1636_vm6, %v3478_v0, %v3477_v33  ;;  %v3482_v62 = vrot.slane %v6641_v20, 1 }
 0x1f4   :  { %4204 = vmatprep.mubr.msk.bf16.mxu0 %vm4412_vm2, %v7449_v45  ;;  %v2445_v16 = vrot.slane %v6437_v27, 3  ;;  %v3480_v30 = vrot.slane %v6606_v17, 2  ;;  %v2511_v60 = vrot.slane %v6343_v9, 3  ;;  %v3501_v42 = vsel %vm1663_vm1, %v4377_v31, 0 }
 0x1f5   :  { %v2444_v21 = vsel %vm1642_vm8, %v2443_v8, %v2442_v28  ;;  %v2514_v11 = vrot.slane %v6388_v1, 1  ;;  %v2512_v41 = vrot.slane %v6337_v49, 2  ;;  %v2517_v6 = vrot.slane %v6416_v14, 7 }
 0x1f6   :  { %4203 = vmatpush3.bf16.msra.mxu0 %v3423_v46  ;;  %v2446_v59 = vsel %vm1645_vm9, %v2445_v16, %v2444_v21  ;;  %v3481_v20 = vsel %vm1639_vm7, %v3480_v30, %v3479_v56  ;;  %v2519_v25 = vrot.slane %v6450_v7, 6  ;;  %v2521_v52 = vrot.slane %v6420_v53, 5 }
 0x1f7   :  { %4208 = vmatprep.subr.bf16.mxu0 %v7449_v45  ;;  %v3483_v17 = vsel %vm1642_vm8, %v3482_v62, %v3481_v20  ;;  %v2513_v36 = vsel %vm1627_vm3, %v2512_v41, %v2511_v60  ;;  %v2447_v23 = vpack.c.b16 %v2446_v59, %v2446_v59  ;;  %v2589_v40 = vrot.slane %v6343_v9, 4 }
 0x1f8   :  { %v2515_v26 = vsel %vm1630_vm4, %v2514_v11, %v2513_v36  ;;  %v3484_v39 = vsel %vm1645_vm9, %v6623_v18, %v3483_v17  ;;  %v2541_v18 = vsel %vm1663_vm1, %v4380_v44, 0  ;;  %v2592_v63 = vrot.slane %v6388_v1, 2 }
 0x1f9   :  { %4101 = vmatmul.mubr.msk.bf16.vlgmr.msra.gmra.mrb[0].mxu1 %vm1659_vm10, %v2369_v50  ;;  %v2516_v12 = vsel %vm1633_vm5, %v6404_v54, %v2515_v26  ;;  %v3485_v29 = vpack.c.b16 %v3484_v39, %v3484_v39  ;;  %v2523_v58 = vrot.slane %v6437_v27, 4  ;;  %v2590_v47 = vrot.slane %v6337_v49, 3  ;;  %v4382_v49 = vld [vmem:[%s7171_s2 + $0xc0] sm:$0xff]  }
 0x1fa   :  { %4105 = vmatpush3.bf16.msra.mxu1 %v4374_v19  ;;  %4108 = vmatprep.mubr.msk.bf16.mxu1 %vm4412_vm2, %v7449_v45  ;;  %v2518_v37 = vsel %vm1636_vm6, %v2517_v6, %v2516_v12  ;;  %v2594_v19 = vrot.slane %v6404_v54, 1  ;;  %v3603_v13 = vsel %vm1663_vm1, %v4381_v32, 0  ;;  %v2597_v48 = vrot.slane %v6450_v7, 7 }
 0x1fb   :  { %4106 = vmatprep.subr.bf16.mxu1 %v7449_v45  ;;  %v2520_v46 = vsel %vm1639_vm7, %v2519_v25, %v2518_v37  ;;  %v2591_v1 = vsel %vm1627_vm3, %v2590_v47, %v2589_v40  ;;  %v3587_v38 = vpack.c.b16 %v7013_v22, %v7013_v22  ;;  %v2619_v51 = vsel %vm1663_vm1, %v4384_v2, 0 }
 0x1fc   :  { %v2522_v34 = vsel %vm1642_vm8, %v2521_v52, %v2520_v46  ;;  %v2593_v3 = vsel %vm1630_vm4, %v2592_v63, %v2591_v1  ;;  %v2599_v4 = vrot.slane %v6420_v53, 6  ;;  %v2601_v0 = vrot.slane %v6437_v27, 5  ;;  %v3765_v27 = vld [vmem:[%s7172_s3] ss:$0 sm:$0xff]  ;;  %s3945_s3 = sld [smem:[#allocation2 + $0xa]] }
 0x1fd   :  { %4205 = vmatmul.mubr.msk.bf16.vlgmr.msra.gmra.mrb[0].mxu0 %vm1659_vm10, %v3407_v10  ;;  %v2524_v9 = vsel %vm1645_vm9, %v2523_v58, %v2522_v34  ;;  %v2595_v54 = vsel %vm1633_vm5, %v2594_v19, %v2593_v3  ;;  %v3665_v53 = vpack.c.b16 %v7040_v43, %v7040_v43  ;;  %v3944_v43 = vld [vmem:[%s7173_s4] ss:$0 sm:$0xff] }
 0x1fe   :  { %4209 = vmatpush3.bf16.msra.mxu0 %v4375_v55  ;;  %4107 = vmatpush3.bf16.msra.mxu1 %v2463_v61  ;;  %v2525_v50 = vpack.c.b16 %v2524_v9, %v2524_v9  ;;  %v2596_v5 = vsel %vm1636_vm6, %v6416_v14, %v2595_v54  ;;  %v4385_v14 = vld [vmem:[%s7171_s2 + $0x198] sm:$0x1f]  }
 0x1ff   :  { %4210 = vmatprep.subr.bf16.mxu0 %v7449_v45  ;;  %4112 = vmatprep.subr.bf16.mxu1 %v7449_v45  ;;  %v2598_v7 = vsel %vm1639_vm7, %v2597_v48, %v2596_v5  ;;  %v3681_v22 = vsel %vm1663_vm1, %v4385_v14, 0 }
 0x200   :  { %4212 = vmatprep.mubr.msk.bf16.mxu0 %vm4412_vm2, %v7449_v45  ;;  %v2600_v35 = vsel %vm1642_vm8, %v2599_v4, %v2598_v7 }
 0x201   :  { %v2602_v55 = vsel %vm1645_vm9, %v2601_v0, %v2600_v35 }
 0x202   :  { %4211 = vmatpush3.bf16.msra.mxu0 %v3501_v42  ;;  %v2603_v28 = vpack.c.b16 %v2602_v55, %v2602_v55  ;;  %v3742_v59 = vstv %s3945_s3 }
 0x203   :  { %4216 = vmatprep.subr.bf16.mxu0 %v7449_v45 }
 0x205   :  { %4109 = vmatmul.mubr.msk.bf16.vlgmr.msra.gmra.mrb[0].mxu1 %vm1659_vm10, %v2447_v23 }
 0x206   :  { %4113 = vmatpush3.bf16.msra.mxu1 %v4378_v57  ;;  %4116 = vmatprep.mubr.msk.bf16.mxu1 %vm4412_vm2, %v7449_v45 }
 0x207   :  { %4114 = vmatprep.subr.bf16.mxu1 %v7449_v45 }
 0x209   :  { %4213 = vmatmul.mubr.msk.bf16.vlgmr.msra.gmra.mrb[0].mxu0 %vm1659_vm10, %v3485_v29 }
 0x20a   :  { %4217 = vmatpush3.bf16.msra.mxu0 %v4379_v24  ;;  %4115 = vmatpush3.bf16.msra.mxu1 %v2541_v18 }
 0x20b   :  { %4218 = vmatprep.subr.bf16.mxu0 %v7449_v45  ;;  %4120 = vmatprep.subr.bf16.mxu1 %v7449_v45 }
 0x20c   :  { %4220 = vmatprep.mubr.msk.bf16.mxu0 %vm4412_vm2, %v7449_v45 }
 0x20e   :  { %4219 = vmatpush3.bf16.msra.mxu0 %v3603_v13 }
 0x20f   :  { %4224 = vmatprep.subr.bf16.mxu0 %v7449_v45 }
 0x211   :  { %4117 = vmatmul.mubr.msk.bf16.vlgmr.msra.gmra.mrb[0].mxu1 %vm1659_vm10, %v2525_v50 }
 0x212   :  { %4121 = vmatpush3.bf16.msra.mxu1 %v4382_v49  ;;  %4124 = vmatprep.mubr.msk.bf16.mxu1 %vm4412_vm2, %v7449_v45 }
 0x213   :  { %4122 = vmatprep.subr.bf16.mxu1 %v7449_v45 }
 0x215   :  { %4221 = vmatmul.mubr.msk.bf16.vlgmr.msra.gmra.mrb[0].mxu0 %vm1659_vm10, %v3587_v38 }
 0x216   :  { %4225 = vmatpush3.bf16.msra.mxu0 %v4383_v15  ;;  %4123 = vmatpush3.bf16.msra.mxu1 %v2619_v51 }
 0x217   :  { %4226 = vmatprep.subr.bf16.mxu0 %v7449_v45  ;;  %4228 = vmatprep.mubr.msk.bf16.mxu0 %vm4412_vm2, %v7449_v45 }
 0x21a   :  { %4227 = vmatpush3.bf16.msra.mxu0 %v3681_v22 }
 0x21d   :  { %4125 = vmatmul.mubr.msk.bf16.vlgmr.msra.gmra.mrb[0].mxu1 %vm1659_vm10, %v2603_v28 }
 0x221   :  { %4229 = vmatmul.mubr.msk.bf16.vlgmr.msra.gmra.mrb[0].mxu0 %vm1659_vm10, %v3665_v53 }
 0x2f0   :  { %v2655_v33 = vpop.f32.mrb[0].mxu1 }
 0x2f1   :  { %v4126_v10 = vpop.f32.mrb[1].mxu1  ;;  %v4232_v31 = vadd.f32 %v3765_v27, %v2655_v33 }
 0x2f2   :  { %v2658_v61 = vpop.f32.mrb[2].mxu1 }
 0x2f3   :  { %v4127_v45 = vpop.f32.mrb[3].mxu1 }
 0x2f4   :  { %v3717_v8 = vpop.f32.mrb[0].mxu0 }
 0x2f5   :  { %v4233_v21 = vadd.f32 %v4232_v31, %v3717_v8  ;;  %v4230_v56 = vpop.f32.mrb[1].mxu0 }
 0x2f6   :  { %v3720_v62 = vpop.f32.mrb[2].mxu0 }
 0x2f7   :  { %v3727_v16 = vmul.f32 0.1, %v4233_v21  ;;  %v4231_v30 = vpop.f32.mrb[3].mxu0 }
 0x2f9   :  { %v3728_v60 = vmax.f32 %v4233_v21, %v3727_v16 }
 0x2fb   :  { %v3736_v42 = vmul.f32 %v3944_v43, %v3728_v60 }
 0x2fd   :  { %v3738_v11 = vsel %vm3737_vm11, %v3736_v42, 0.0 }
 0x2fe   :  { %3739 = vadd.xlane.f32.xlu0 %v3738_v11 }
 0x38b   :  { %v3740_v20 = vpop.xlane.xlu0 %3739 }
 0x38c   :  { %v3743_v41 = vadd.f32 %v3742_v59, %v3740_v20 }
 0x38e   :  { %v3744_v17 = vsub.f32 0.0, %v3743_v41 }
 0x390   :  { %v3745_v6 = vmul.f32 1.442695, %v3744_v17 }
 0x392   :  { %4386 = vpow2.f32 %v3745_v6 }
 0x39c   :  { %v4387_v57 = vpop.eup %4386 }
 0x39d   :  { %v3747_v36 = vadd.f32 1.0, %v4387_v57 }
 0x39f   :  { %4388 = vrcp.f32 %v3747_v36 }
 0x3a9   :  { %v4389_v25 = vpop.eup %4388 }
 0x3aa   :  { %3750 = vst.msk [vmem:[%s7174_s5] sm:$0xff] %vm3749_vm12, %v4389_v25 }
 0x3ab   :  { %3755 = vsyncpa [#allocation3], 1 }

</bundles_post_ra>
